<compile_context>
chip_gen: v7x
topology: tpu7x:2x2x1
jax: 0.10.0
libtpu: 0.0.40
codegen_flags: <defaults>
</compile_context>

<pallas_src>
import jax
import jax.numpy as jnp
from jax.experimental import pallas as pl
from jax.experimental.pallas import tpu as pltpu


def _sigmoid(z):
    return 1.0 / (1.0 + jnp.exp(-z))


def _cbam_kernel(x_ref, w1t_ref, w2t_ref, ksp_ref, bsp_ref, o_ref):
    """One grid step: a (TB, C, H*W) lane-dense tile of the batch."""
    x = x_ref[...].astype(jnp.float32)                       # (TB, C, HW)
    tb = x.shape[0]

    # ---------------- channel attention ----------------
    p_avg = jnp.mean(x, axis=2)                              # (TB, C)
    p_max = jnp.max(x, axis=2)                               # (TB, C)
    p = jnp.concatenate([p_avg, p_max], axis=0)              # (2*TB, C)

    w1t = w1t_ref[...]                                       # (C, Crp)
    w2t = w2t_ref[...]                                       # (Crp, C)
    h1 = jnp.maximum(
        jnp.dot(p, w1t, preferred_element_type=jnp.float32,
                precision=jax.lax.Precision.HIGHEST), 0.0)   # (2*TB, Crp)
    mlp = jnp.dot(h1, w2t, preferred_element_type=jnp.float32,
                  precision=jax.lax.Precision.HIGHEST)       # (2*TB, C)
    ca = _sigmoid(mlp[:tb] + mlp[tb:])                       # (TB, C)
    out1 = x * ca[:, :, None]                                # (TB, C, HW)

    # ---------------- spatial attention ----------------
    am = jnp.mean(out1, axis=1)                              # (TB, HW)  channel mean
    mx = jnp.max(out1, axis=1)                               # (TB, HW)  channel max
    sp_in = jnp.concatenate([am, mx], axis=1)                # (TB, 2*HW)
    conv = jnp.dot(sp_in, ksp_ref[...],
                   preferred_element_type=jnp.float32,
                   precision=jax.lax.Precision.HIGHEST) + bsp_ref[0]   # (TB, HW)
    sa = _sigmoid(conv)                                      # (TB, HW)

    o_ref[...] = (out1 * sa[:, None, :]).astype(o_ref.dtype)


def _spatial_conv_matrix(wsp, H, W):
    """Lower the 7x7 conv (2 in-ch -> 1 out-ch, pad=3) to a dense matmul operator.

    Returns K of shape (2*H*W, H*W) with
      out[q] = sum_{c, p} in[c, p] * K[c*H*W + p, q]
    exactly equal to the zero-padded 7x7 convolution.
    """
    w = wsp.reshape(2, 7, 7).astype(jnp.float32)
    pi = jnp.arange(H)
    pj = jnp.arange(W)
    di = pi[:, None] - pi[None, :] + 3                       # (H, H): kh index
    dj = pj[:, None] - pj[None, :] + 3                       # (W, W): kw index
    vi = (di >= 0) & (di <= 6)
    vj = (dj >= 0) & (dj <= 6)
    dic = jnp.clip(di, 0, 6)
    djc = jnp.clip(dj, 0, 6)
    k = w[:, dic[:, None, :, None], djc[None, :, None, :]]   # (2, H, W, H, W)
    mask = (vi[:, None, :, None] & vj[None, :, None, :]).astype(jnp.float32)
    k = k * mask[None]
    return k.reshape(2 * H * W, H * W)


def cbam_forward(x, w1, w2, wsp, bsp):
    """x: (N, C, H, W); w1: (Cr, C); w2: (C, Cr); wsp: (1, 2, 7, 7); bsp: (1,)."""
    N, C, H, W = x.shape
    HW = H * W
    Cr = w1.shape[0]

    # Lane-dense layout for all element-wise work and the output store.
    x_flat = x.reshape(N, C, HW)

    # Zero-pad the MLP bottleneck dim to 128 lanes (mathematically inert:
    # the extra columns of h1 are relu(0)=0 and hit zero rows of w2t).
    Crp = Cr if Cr >= 128 else 128
    w1t = jnp.zeros((C, Crp), jnp.float32).at[:, :Cr].set(jnp.transpose(w1).astype(jnp.float32))
    w2t = jnp.zeros((Crp, C), jnp.float32).at[:Cr, :].set(jnp.transpose(w2).astype(jnp.float32))

    ksp = _spatial_conv_matrix(wsp, H, W)                    # (2*HW, HW)
    bsp = bsp.astype(jnp.float32)

    # Batch tile: largest divisor of N whose double-buffered in+out blocks stay
    # well inside the scoped VMEM budget on every generation (v7x: 64 MiB phys).
    elem_bytes = C * HW * x.dtype.itemsize
    budget = 8 * 1024 * 1024
    tb_cap = max(1, budget // (4 * elem_bytes))
    tb = 1
    for d in range(1, N + 1):
        if N % d == 0 and d <= tb_cap:
            tb = d

    out_flat = pl.pallas_call(
        _cbam_kernel,
        out_shape=jax.ShapeDtypeStruct((N, C, HW), x.dtype),
        grid=(N // tb,),
        in_specs=[
            pl.BlockSpec((tb, C, HW), lambda n: (n, 0, 0)),
            pl.BlockSpec((C, Crp), lambda n: (0, 0)),
            pl.BlockSpec((Crp, C), lambda n: (0, 0)),
            pl.BlockSpec((2 * HW, HW), lambda n: (0, 0)),
            pl.BlockSpec(memory_space=pltpu.MemorySpace.SMEM),
        ],
        out_specs=pl.BlockSpec((tb, C, HW), lambda n: (n, 0, 0)),
        compiler_params=pltpu.CompilerParams(
            dimension_semantics=("parallel",)),
    )(x_flat, w1t, w2t, ksp, bsp)
    return out_flat.reshape(N, C, H, W)


def cbam_reference(x, w1, w2, wsp, bsp):
    """Pure-JAX reference matching the PyTorch module semantics."""
    hp = jax.lax.Precision.HIGHEST
    avg = jnp.mean(x, axis=(2, 3), keepdims=True)
    mx = jnp.max(x, axis=(2, 3), keepdims=True)

    def mlp(p):
        h = jnp.einsum("nchw,oc->nohw", p, w1, precision=hp)
        h = jnp.maximum(h, 0.0)
        return jnp.einsum("nchw,oc->nohw", h, w2, precision=hp)

    ca = jax.nn.sigmoid(mlp(avg) + mlp(mx))
    out1 = ca * x

    am = jnp.mean(out1, axis=1, keepdims=True)
    mm = jnp.max(out1, axis=1, keepdims=True)
    cat = jnp.concatenate([am, mm], axis=1)
    conv = jax.lax.conv_general_dilated(
        cat, wsp, window_strides=(1, 1), padding=[(3, 3), (3, 3)],
        dimension_numbers=("NCHW", "OIHW", "NCHW"), precision=hp)
    sa = jax.nn.sigmoid(conv + bsp.reshape(1, 1, 1, 1))
    return sa * out1


if __name__ == "__main__":
    N, C, H, W = 2, 32, 16, 16
    ratio = 16
    Cr = C // ratio

    key = jax.random.PRNGKey(0)
    k1, k2, k3, k4, kx = jax.random.split(key, 5)
    # Conv2d(C, C//r, 1, bias=False)  -> weight (Cr, C)
    w1 = jax.random.normal(k1, (Cr, C), jnp.float32) * 0.1
    # Conv2d(C//r, C, 1, bias=False)  -> weight (C, Cr)
    w2 = jax.random.normal(k2, (C, Cr), jnp.float32) * 0.1
    # Conv2d(2, 1, 7, padding=3)      -> weight (1, 2, 7, 7), bias (1,)
    wsp = jax.random.normal(k3, (1, 2, 7, 7), jnp.float32) * 0.1
    bsp = jax.random.normal(k4, (1,), jnp.float32) * 0.1

    x = jax.random.normal(kx, (N, C, H, W), jnp.float32)

    out = jax.block_until_ready(cbam_forward(x, w1, w2, wsp, bsp))
    ref = jax.block_until_ready(cbam_reference(x, w1, w2, wsp, bsp))

    assert out.shape == (N, C, H, W)
    err = jnp.max(jnp.abs(out - ref))
    assert jnp.allclose(out, ref, atol=2e-4, rtol=2e-4), f"max abs diff {err}"

    print("KERNEL_OK")
</pallas_src>

<mosaic_0001>
module attributes {stable_mosaic.version = 11 : i64} {
  func.func @_cbam_kernel(%arg0: i32, %arg1: memref<2x32x256xf32, #tpu.memory_space<vmem>>, %arg2: memref<32x128xf32, #tpu.memory_space<vmem>>, %arg3: memref<128x32xf32, #tpu.memory_space<vmem>>, %arg4: memref<512x256xf32, #tpu.memory_space<vmem>>, %arg5: memref<1xf32, #tpu.memory_space<smem>>, %arg6: memref<2x32x256xf32, #tpu.memory_space<vmem>>) attributes {dimension_semantics = [#tpu.dimension_semantics<parallel>], iteration_bounds = array<i64: 1>, scalar_prefetch = 0 : i64, scratch_operands = 0 : i64, tpu.core_type = #tpu.core_type<tc>, window_params = [{transform_indices = @transform_0, window_bounds = array<i64: 2, 32, 256>}, {pipeline_mode = #tpu.pipeline_mode<synchronous>, transform_indices = @transform_1, window_bounds = array<i64: 32, 128>}, {pipeline_mode = #tpu.pipeline_mode<synchronous>, transform_indices = @transform_2, window_bounds = array<i64: 128, 32>}, {pipeline_mode = #tpu.pipeline_mode<synchronous>, transform_indices = @transform_3, window_bounds = array<i64: 512, 256>}, {transform_indices = @transform_4, window_bounds = array<i64: 1>}, {transform_indices = @transform_5, window_bounds = array<i64: 2, 32, 256>}]} {
    %c0 = arith.constant 0 : index
    %c0_0 = arith.constant 0 : index
    %c0_1 = arith.constant 0 : index
    %0 = vector.load %arg1[%c0, %c0_0, %c0_1] : memref<2x32x256xf32, #tpu.memory_space<vmem>>, vector<2x32x256xf32>
    %cst = arith.constant dense<0.000000e+00> : vector<2x32xf32>
    %1 = vector.multi_reduction <add>, %0, %cst [2] : vector<2x32x256xf32> to vector<2x32xf32>
    %cst_2 = arith.constant 2.560000e+02 : f32
    %2 = vector.broadcast %cst_2 : f32 to vector<2x32xf32>
    %3 = arith.divf %1, %2 : vector<2x32xf32>
    %cst_3 = arith.constant dense<0xFF800000> : vector<2x32xf32>
    %4 = vector.multi_reduction <maximumf>, %0, %cst_3 [2] : vector<2x32x256xf32> to vector<2x32xf32>
    %5 = tpu.concatenate %3, %4 in 0 : vector<2x32xf32>, vector<2x32xf32> -> vector<4x32xf32>
    %c0_4 = arith.constant 0 : index
    %c0_5 = arith.constant 0 : index
    %6 = vector.load %arg2[%c0_4, %c0_5] : memref<32x128xf32, #tpu.memory_space<vmem>>, vector<32x128xf32>
    %c0_6 = arith.constant 0 : index
    %c0_7 = arith.constant 0 : index
    %7 = vector.load %arg3[%c0_6, %c0_7] : memref<128x32xf32, #tpu.memory_space<vmem>>, vector<128x32xf32>
    %cst_8 = arith.constant dense<0.000000e+00> : vector<4x128xf32>
    %8 = tpu.matmul %5, %6, %cst_8 {dimension_numbers = #tpu.dot_dimension_numbers<[1], [0], [0], [1], [0, 0, 1, 1], [], []>, precision = #tpu.contract_precision<fp32>} : vector<4x32xf32>, vector<32x128xf32>, vector<4x128xf32> -> vector<4x128xf32>
    %cst_9 = arith.constant 0.000000e+00 : f32
    %9 = vector.broadcast %cst_9 : f32 to vector<4x128xf32>
    %10 = arith.maximumf %8, %9 : vector<4x128xf32>
    %cst_10 = arith.constant dense<0.000000e+00> : vector<4x32xf32>
    %11 = tpu.matmul %10, %7, %cst_10 {dimension_numbers = #tpu.dot_dimension_numbers<[1], [0], [0], [1], [0, 0, 1, 1], [], []>, precision = #tpu.contract_precision<fp32>} : vector<4x128xf32>, vector<128x32xf32>, vector<4x32xf32> -> vector<4x32xf32>
    %12 = vector.extract_strided_slice %11 {offsets = [0, 0], sizes = [2, 32], strides = [1, 1]} : vector<4x32xf32> to vector<2x32xf32>
    %13 = vector.extract_strided_slice %11 {offsets = [2, 0], sizes = [2, 32], strides = [1, 1]} : vector<4x32xf32> to vector<2x32xf32>
    %14 = arith.addf %12, %13 : vector<2x32xf32>
    %cst_11 = arith.constant 0.000000e+00 : f32
    %15 = vector.broadcast %cst_11 : f32 to vector<2x32xf32>
    %16 = arith.subf %15, %14 : vector<2x32xf32>
    %17 = math.exp %16 : vector<2x32xf32>
    %cst_12 = arith.constant 1.000000e+00 : f32
    %18 = vector.broadcast %cst_12 : f32 to vector<2x32xf32>
    %19 = arith.addf %18, %17 : vector<2x32xf32>
    %cst_13 = arith.constant 1.000000e+00 : f32
    %20 = vector.broadcast %cst_13 : f32 to vector<2x32xf32>
    %21 = arith.divf %20, %19 : vector<2x32xf32>
    %22 = vector.shape_cast %21 : vector<2x32xf32> to vector<2x32x1xf32>
    %23 = vector.broadcast %22 : vector<2x32x1xf32> to vector<2x32x256xf32>
    %24 = arith.mulf %0, %23 : vector<2x32x256xf32>
    %cst_14 = arith.constant dense<0.000000e+00> : vector<2x256xf32>
    %25 = vector.multi_reduction <add>, %24, %cst_14 [1] : vector<2x32x256xf32> to vector<2x256xf32>
    %cst_15 = arith.constant 3.200000e+01 : f32
    %26 = vector.broadcast %cst_15 : f32 to vector<2x256xf32>
    %27 = arith.divf %25, %26 : vector<2x256xf32>
    %cst_16 = arith.constant dense<0xFF800000> : vector<2x256xf32>
    %28 = vector.multi_reduction <maximumf>, %24, %cst_16 [1] : vector<2x32x256xf32> to vector<2x256xf32>
    %29 = tpu.concatenate %27, %28 in 1 : vector<2x256xf32>, vector<2x256xf32> -> vector<2x512xf32>
    %c0_17 = arith.constant 0 : index
    %c0_18 = arith.constant 0 : index
    %30 = vector.load %arg4[%c0_17, %c0_18] : memref<512x256xf32, #tpu.memory_space<vmem>>, vector<512x256xf32>
    %cst_19 = arith.constant dense<0.000000e+00> : vector<2x256xf32>
    %31 = tpu.matmul %29, %30, %cst_19 {dimension_numbers = #tpu.dot_dimension_numbers<[1], [0], [0], [1], [0, 0, 1, 1], [], []>, precision = #tpu.contract_precision<fp32>} : vector<2x512xf32>, vector<512x256xf32>, vector<2x256xf32> -> vector<2x256xf32>
    %c0_20 = arith.constant 0 : index
    %32 = memref.load %arg5[%c0_20] : memref<1xf32, #tpu.memory_space<smem>>
    %33 = vector.broadcast %32 : f32 to vector<2x256xf32>
    %34 = arith.addf %31, %33 : vector<2x256xf32>
    %cst_21 = arith.constant 0.000000e+00 : f32
    %35 = vector.broadcast %cst_21 : f32 to vector<2x256xf32>
    %36 = arith.subf %35, %34 : vector<2x256xf32>
    %37 = math.exp %36 : vector<2x256xf32>
    %cst_22 = arith.constant 1.000000e+00 : f32
    %38 = vector.broadcast %cst_22 : f32 to vector<2x256xf32>
    %39 = arith.addf %38, %37 : vector<2x256xf32>
    %cst_23 = arith.constant 1.000000e+00 : f32
    %40 = vector.broadcast %cst_23 : f32 to vector<2x256xf32>
    %41 = arith.divf %40, %39 : vector<2x256xf32>
    %42 = vector.shape_cast %41 : vector<2x256xf32> to vector<2x1x256xf32>
    %43 = vector.broadcast %42 : vector<2x1x256xf32> to vector<2x32x256xf32>
    %44 = arith.mulf %24, %43 : vector<2x32x256xf32>
    %c0_24 = arith.constant 0 : index
    %c0_25 = arith.constant 0 : index
    %c0_26 = arith.constant 0 : index
    %45 = vector.load %arg6[%c0_24, %c0_25, %c0_26] : memref<2x32x256xf32, #tpu.memory_space<vmem>>, vector<2x32x256xf32>
    tpu.vector_store %arg6[%c0_24, %c0_25, %c0_26], %44 {strides = array<i32>} : memref<2x32x256xf32, #tpu.memory_space<vmem>>, vector<2x32x256xf32>,
    return
  }
  func.func @transform_0(%arg0: i32) -> (i32, i32, i32) {
    %c0_i32 = arith.constant 0 : i32
    %c0_i32_0 = arith.constant 0 : i32
    %c0_i32_1 = arith.constant 0 : i32
    return %arg0, %c0_i32, %c0_i32_0 : i32, i32, i32
  }
  func.func @transform_1(%arg0: i32) -> (i32, i32) {
    %c0_i32 = arith.constant 0 : i32
    %c0_i32_0 = arith.constant 0 : i32
    %c0_i32_1 = arith.constant 0 : i32
    return %c0_i32, %c0_i32_0 : i32, i32
  }
  func.func @transform_2(%arg0: i32) -> (i32, i32) {
    %c0_i32 = arith.constant 0 : i32
    %c0_i32_0 = arith.constant 0 : i32
    %c0_i32_1 = arith.constant 0 : i32
    return %c0_i32, %c0_i32_0 : i32, i32
  }
  func.func @transform_3(%arg0: i32) -> (i32, i32) {
    %c0_i32 = arith.constant 0 : i32
    %c0_i32_0 = arith.constant 0 : i32
    %c0_i32_1 = arith.constant 0 : i32
    return %c0_i32, %c0_i32_0 : i32, i32
  }
  func.func @transform_4(%arg0: i32) -> i32 {
    %c0_i32 = arith.constant 0 : i32
    %c0_i32_0 = arith.constant 0 : i32
    return %c0_i32 : i32
  }
  func.func @transform_5(%arg0: i32) -> (i32, i32, i32) {
    %c0_i32 = arith.constant 0 : i32
    %c0_i32_0 = arith.constant 0 : i32
    %c0_i32_1 = arith.constant 0 : i32
    return %arg0, %c0_i32, %c0_i32_0 : i32, i32, i32
  }
}

</mosaic_0001>

<bundles_post_ra>
// kernel: tpu_custom_call.1
= control target key start
LH: loop header
LB: loop body
LE: loop exit
PB: predicated region body
PF: predicated region fallthrough
CT: control target
= control target key end

     0   :  { %11 = vsyncpa [#allocation4], 0  ;;  %s8375_s0 = inlined_call_operand.vmem [shape: f32[2,32,256], index: 0, kind: input, shape index: {}]   ;;  %s8376_s1 = inlined_call_operand.vmem [shape: f32[32,128], index: 1, kind: input, shape index: {}]   ;;  %s8377_s2 = inlined_call_operand.vmem [shape: f32[128,32], index: 2, kind: input, shape index: {}]   ;;  %s8378_s3 = inlined_call_operand.hbm [shape: f32[512,256], index: 3, kind: input, shape index: {}]   ;;  %s8379_s4 = inlined_call_operand.<no memory space> [shape: f32[1], index: 4, kind: input, shape index: {}]   ;;  %s8380_s5 = inlined_call_operand.hbm [shape: f32[2,32,256], index: 5, kind: output, shape index: {}]  }
   0x1   :  { %12 = vsyncpa [#allocation5], 0  ;;  %s5813_s18 = smov [#allocation3]   ;;  %s5765_s22 = scalar_lea.hbm %s8378_s3, 16384 }
   0x2   :  { %s24_s19 = sshll.u32 %s5813_s18, 4  ;;  %p5766_p0 = scmp.ne.s32.totalorder %s8378_s3, %s5765_s22  ;;  %s25_s19 = int_to_ptr.vmem [resolvable:$true] %s24_s19 }
   0x3   :  { %p5769_p1 = scmp.lt.u32.totalorder %s5765_s22, %s8378_s3 }
   0x5   :  { %p5771_p2 = pnand %p5769_p1, %p5766_p0 }
   0x7   :  { %5774 = shalt.err (!%p5771_p2)
}
   0x8   :  { %s5775_s27 = scalar_lea.vmem %s25_s19, 16384  ;;  %p5780_p4 = scmp.lt.s32.totalorder %s25_s19, %s25_s19 }
   0x9   :  { %p5776_p3 = scmp.ne.s32.totalorder %s25_s19, %s5775_s27  ;;  %p5781_p5 = scmp.lt.s32.totalorder %s5775_s27, %s5775_s27 }
   0xb   :  { %p5782_p6 = por %p5781_p5, %p5780_p4 }
   0xd   :  { %p5783_p7 = pnand %p5782_p6, %p5776_p3 }
   0xf   :  { %5786 = shalt.err (!%p5783_p7)
}
  0x10   :  { %s5814_s28 = smov 256   ;;  %s5815_s29 = smov 16  }
  0x11   :  { %30 = dma.hbm_to_vmem [thread:$0]  %s8378_s3, 16384, %s25_s19, [#allocation4], %s5814_s28, %s5814_s28, %s5815_s29  }
  0x12   :  { %5809 = dma.done.wait [#allocation4], 16384  }
  0x13   :  { %5810 = vsyncadd [#allocation4], 4294950912  ;;  %v44_v0 = vld [vmem:[%s8375_s0 + $0x40] sm:$0xff]  ;;  %v45_v1 = vld [vmem:[%s8375_s0 + $0x48] sm:$0xff]  ;;  %v5816_v35 = vmov 0.0|0.0   ;;  %vm5817_vm0 = vmmov 0  }
  0x14   :  { %v36_v2 = vld [vmem:[%s8375_s0] sm:$0xff]  ;;  %v64_v3 = vadd.f32 %v45_v1, %v44_v0  ;;  %v37_v4 = vld [vmem:[%s8375_s0 + $0x8] sm:$0xff]  ;;  %v46_v5 = vld [vmem:[%s8375_s0 + $0x50] sm:$0xff]  ;;  %v97_v27 = vmax.f32 %v44_v0, %v45_v1  ;;  %4737 = vmatprep.subr.bf16.mxu0 %v5816_v35  ;;  %v5818_v40 = vmov 0.0   ;;  %4773 = vmatprep.subr.bf16.mxu1 %v5816_v35  ;;  %vm128_vm1 = vcmask 130112  }
  0x15   :  { %v47_v6 = vld [vmem:[%s8375_s0 + $0x58] sm:$0xff]  ;;  %v52_v7 = vadd.f32 %v37_v4, %v36_v2  ;;  %v38_v8 = vld [vmem:[%s8375_s0 + $0x10] sm:$0xff]  ;;  %v48_v12 = vld [vmem:[%s8375_s0 + $0x60] sm:$0xff]  ;;  %v85_v25 = vmax.f32 %v36_v2, %v37_v4  ;;  %4469 = vmatprep.mubr.msk.f32.mxu0 %vm5817_vm0, %v5818_v40  ;;  %4559 = vmatprep.mubr.msk.f32.mxu1 %vm5817_vm0, %v5818_v40  ;;  %vm135_vm2 = vcmask 195712   ;;  %vm142_vm3 = vcmask 261312  }
  0x16   :  { %v39_v9 = vld [vmem:[%s8375_s0 + $0x18] sm:$0xff]  ;;  %65 = vadd.xlane.f32.xlu1 %v64_v3  ;;  %v67_v10 = vadd.f32 %v47_v6, %v46_v5  ;;  %v49_v13 = vld [vmem:[%s8375_s0 + $0x68] sm:$0xff]  ;;  %v40_v14 = vld [vmem:[%s8375_s0 + $0x20] sm:$0xff]  ;;  %v100_v26 = vmax.f32 %v46_v5, %v47_v6  ;;  %vm163_vm4 = vcmask 1041409   ;;  %vm212_vm5 = vcmask 1043459  }
  0x17   :  { %53 = vadd.xlane.f32.xlu0 %v52_v7  ;;  %v55_v11 = vadd.f32 %v39_v9, %v38_v8  ;;  %v41_v15 = vld [vmem:[%s8375_s0 + $0x28] sm:$0xff]  ;;  %v70_v16 = vadd.f32 %v49_v13, %v48_v12  ;;  %v50_v18 = vld [vmem:[%s8375_s0 + $0x70] sm:$0xff]  ;;  %v51_v19 = vld [vmem:[%s8375_s0 + $0x78] sm:$0xff]  ;;  %v88_v24 = vmax.f32 %v38_v8, %v39_v9  ;;  %v103_v28 = vmax.f32 %v48_v12, %v49_v13 }
  0x18   :  { %v58_v17 = vadd.f32 %v41_v15, %v40_v14  ;;  %v42_v20 = vld [vmem:[%s8375_s0 + $0x30] sm:$0xff]  ;;  %v43_v21 = vld [vmem:[%s8375_s0 + $0x38] sm:$0xff]  ;;  %v73_v22 = vadd.f32 %v51_v19, %v50_v18  ;;  %v91_v29 = vmax.f32 %v40_v14, %v41_v15  ;;  %v106_v30 = vmax.f32 %v50_v18, %v51_v19  ;;  %v217_v32 = vld [vmem:[%s8376_s1] sm:$0xff] }
  0x19   :  { %v61_v23 = vadd.f32 %v43_v21, %v42_v20  ;;  %v94_v31 = vmax.f32 %v42_v20, %v43_v21  ;;  %v218_v33 = vld [vmem:[%s8376_s1 + $0x8] sm:$0xff]  ;;  %v219_v34 = vld [vmem:[%s8376_s1 + $0x10] sm:$0xff]  ;;  %v242_v36 = vand.u32 4294901760, %v217_v32  ;;  %v220_v38 = vld [vmem:[%s8376_s1 + $0x18] sm:$0xff]  ;;  %vm215_vm6 = vcmask 1041408  }
  0x1a   :  { %68 = vadd.xlane.f32.xlu1 %v67_v10  ;;  %v245_v37 = vand.u32 4294901760, %v218_v33  ;;  %v248_v39 = vand.u32 4294901760, %v219_v34  ;;  %v251_v41 = vand.u32 4294901760, %v220_v38  ;;  %v221_v2 = vld [vmem:[%s8377_s2] sm:$0xff]  ;;  %v222_v3 = vld [vmem:[%s8377_s2 + $0x8] sm:$0xff]  ;;  %v223_v4 = vld [vmem:[%s8377_s2 + $0x10] sm:$0xff] }
  0x1b   :  { %56 = vadd.xlane.f32.xlu0 %v55_v11  ;;  %v5934_v43 = vsub.f32 %v217_v32, %v242_v36  ;;  %v728_v5 = vand.u32 4294901760, %v221_v2  ;;  %v731_v6 = vand.u32 4294901760, %v222_v3  ;;  %v224_v7 = vld [vmem:[%s8377_s2 + $0x18] sm:$0xff]  ;;  %v734_v8 = vand.u32 4294901760, %v223_v4  ;;  %v225_v9 = vld [vmem:[%s8377_s2 + $0x20] sm:$0xff]  ;;  %v226_v10 = vld [vmem:[%s8377_s2 + $0x28] sm:$0xff] }
  0x1c   :  { %v5932_v42 = vpack.c.bf16 %v245_v37, %v242_v36  ;;  %v5936_v44 = vsub.f32 %v218_v33, %v245_v37  ;;  %v5938_v45 = vsub.f32 %v219_v34, %v248_v39  ;;  %v5940_v46 = vsub.f32 %v220_v38, %v251_v41  ;;  %v227_v14 = vld [vmem:[%s8377_s2 + $0x30] sm:$0xff]  ;;  %v228_v15 = vld [vmem:[%s8377_s2 + $0x38] sm:$0xff]  ;;  %v230_v21 = vld [vmem:[%s8377_s2 + $0x48] sm:$0xff] }
  0x1d   :  { %v5943_v47 = vpack.c.bf16 %v251_v41, %v248_v39  ;;  %v323_v48 = vand.u32 4294901760, %v5934_v43  ;;  %v737_v11 = vand.u32 4294901760, %v224_v7  ;;  %v740_v12 = vand.u32 4294901760, %v225_v9 }
  0x1e   :  { %71 = vadd.xlane.f32.xlu1 %v70_v16  ;;  %4739 = vmatpush3.bf16.msra.mxu0 %v5932_v42  ;;  %v330_v49 = vand.u32 4294901760, %v5936_v44  ;;  %v337_v54 = vand.u32 4294901760, %v5938_v45  ;;  %v344_v55 = vand.u32 4294901760, %v5940_v46  ;;  %v4750_v62 = vpack.c.bf16 %v5936_v44, %v5934_v43  ;;  %v229_v16 = vld [vmem:[%s8377_s2 + $0x40] sm:$0xff] }
  0x1f   :  { %59 = vadd.xlane.f32.xlu0 %v58_v17  ;;  %4740 = vmatprep.subr.bf16.mxu0 %v5816_v35  ;;  %v324_v50 = vsub.f32 %v5934_v43, %v323_v48  ;;  %v4753_v63 = vpack.c.bf16 %v5940_v46, %v5938_v45  ;;  %v743_v13 = vand.u32 4294901760, %v226_v10  ;;  %v5995_v17 = vpack.c.bf16 %v731_v6, %v728_v5  ;;  %v231_v43 = vld [vmem:[%s8377_s2 + $0x50] sm:$0xff] }
  0x20   :  { %v331_v51 = vsub.f32 %v5936_v44, %v330_v49  ;;  %v338_v57 = vsub.f32 %v5938_v45, %v337_v54  ;;  %v345_v58 = vsub.f32 %v5940_v46, %v344_v55  ;;  %v5964_v0 = vpack.c.bf16 %v330_v49, %v323_v48  ;;  %v232_v44 = vld [vmem:[%s8377_s2 + $0x58] sm:$0xff] }
  0x21   :  { %v325_v52 = vand.u32 4294901760, %v324_v50  ;;  %v5966_v1 = vpack.c.bf16 %v344_v55, %v337_v54  ;;  %v5997_v18 = vsub.f32 %v221_v2, %v728_v5  ;;  %v5999_v19 = vsub.f32 %v222_v3, %v731_v6  ;;  %4775 = vmatpush3.bf16.msra.mxu1 %v5995_v17 }
  0x22   :  { %74 = vadd.xlane.f32.xlu1 %v73_v22  ;;  %4742 = vmatpush3.bf16.msra.mxu0 %v5943_v47  ;;  %v332_v53 = vand.u32 4294901760, %v331_v51  ;;  %v339_v59 = vand.u32 4294901760, %v338_v57  ;;  %v346_v60 = vand.u32 4294901760, %v345_v58  ;;  %v6001_v20 = vsub.f32 %v223_v4, %v734_v8 }
  0x23   :  { %62 = vadd.xlane.f32.xlu0 %v61_v23  ;;  %4743 = vmatprep.subr.bf16.mxu0 %v5816_v35  ;;  %v6006_v22 = vpack.c.bf16 %v737_v11, %v734_v8  ;;  %v6008_v23 = vsub.f32 %v224_v7, %v737_v11  ;;  %v6025_v34 = vpack.c.bf16 %v743_v13, %v740_v12  ;;  %v117_v50 = vlaneseq }
  0x24   :  { %v5954_v56 = vpack.c.bf16 %v332_v53, %v325_v52  ;;  %v5958_v61 = vpack.c.bf16 %v346_v60, %v339_v59  ;;  %4776 = vmatprep.subr.bf16.mxu1 %v5816_v35  ;;  %vm237_vm7 = vcmask 261120   ;;  %v758_v45 = vand.u32 4294901760, %v231_v43 }
  0x25   :  { %4778 = vmatpush3.bf16.msra.mxu1 %v6006_v22  ;;  %v118_v53 = vand.u32 127, %v117_v50  ;;  %v6038_v55 = vshrl.u32 %v117_v50, 7  ;;  %v761_v46 = vand.u32 4294901760, %v232_v44 }
  0x26   :  { %89 = vmax.xlane.f32.xlu1 %v88_v24  ;;  %v6010_v24 = vsub.f32 %v225_v9, %v740_v12  ;;  %4779 = vmatprep.subr.bf16.mxu1 %v5816_v35 }
  0x27   :  { %86 = vmax.xlane.f32.xlu0 %v85_v25  ;;  %v6013_v25 = vsub.f32 %v226_v10, %v743_v13  ;;  %8797 = vst [vmem:[#allocation9_spill] sm:$0xff] %v6038_v55  ;;  %v123_v57 = vadd.s32 4294967288, %v118_v53  ;;  %v130_v58 = vadd.s32 4294967280, %v118_v53  ;;  %v137_v60 = vadd.s32 4294967272, %v118_v53 }
  0x28   :  { %v121_v3 = vsub.s32 %v118_v53, %v6038_v55 }
  0x29   :  { %4781 = vmatpush3.bf16.msra.mxu1 %v6025_v34  ;;  %v126_v4 = vsub.s32 %v123_v57, %v6038_v55  ;;  %v133_v6 = vsub.s32 %v130_v58, %v6038_v55  ;;  %v140_v13 = vsub.s32 %v137_v60, %v6038_v55 }
  0x2a   :  { %101 = vmax.xlane.f32.xlu1 %v100_v26  ;;  %v746_v26 = vand.u32 4294901760, %v227_v14  ;;  %4782 = vmatprep.subr.bf16.mxu1 %v5816_v35 }
  0x2b   :  { %98 = vmax.xlane.f32.xlu0 %v97_v27  ;;  %v749_v27 = vand.u32 4294901760, %v228_v15 }
  0x2d   :  { %v6029_v36 = vpack.c.bf16 %v749_v27, %v746_v26 }
  0x2e   :  { %104 = vmax.xlane.f32.xlu1 %v103_v28  ;;  %v752_v28 = vand.u32 4294901760, %v229_v16 }
  0x2f   :  { %92 = vmax.xlane.f32.xlu0 %v91_v29  ;;  %v755_v29 = vand.u32 4294901760, %v230_v21  ;;  %4784 = vmatpush3.bf16.msra.mxu1 %v6029_v36 }
  0x30   :  { %v6020_v32 = vsub.f32 %v229_v16, %v752_v28  ;;  %4785 = vmatprep.subr.bf16.mxu1 %v5816_v35 }
  0x31   :  { %v6022_v33 = vsub.f32 %v230_v21, %v755_v29  ;;  %v6033_v37 = vpack.c.bf16 %v755_v29, %v752_v28 }
  0x32   :  { %107 = vmax.xlane.f32.xlu1 %v106_v30  ;;  %v6016_v30 = vsub.f32 %v227_v14, %v746_v26 }
  0x33   :  { %95 = vmax.xlane.f32.xlu0 %v94_v31  ;;  %v6018_v31 = vsub.f32 %v228_v15, %v749_v27  ;;  %4787 = vmatpush3.bf16.msra.mxu1 %v6033_v37 }
  0x34   :  { %4788 = vmatprep.subr.bf16.mxu1 %v5816_v35 }
  0xa3   :  { %v66_v38 = vpop.xlane.xlu1 %65 }
  0xa4   :  { %v54_v39 = vpop.xlane.xlu0 %53  ;;  %v81_v7 = vmul.f32 0.00390625, %v66_v38 }
  0xa5   :  { %v77_v8 = vmul.f32 0.00390625, %v54_v39 }
  0xa6   :  { %v147_v26 = vrot.slane %v81_v7, %v121_v3 }
  0xa7   :  { %v69_v41 = vpop.xlane.xlu1 %68  ;;  %v122_v27 = vrot.slane %v77_v8, %v121_v3 }
  0xa8   :  { %v57_v48 = vpop.xlane.xlu0 %56  ;;  %v82_v5 = vmul.f32 0.00390625, %v69_v41 }
  0xa9   :  { %v78_v9 = vmul.f32 0.00390625, %v57_v48 }
  0xaa   :  { %v151_v21 = vrot.slane %v82_v5, %v126_v4 }
  0xab   :  { %v72_v49 = vpop.xlane.xlu1 %71  ;;  %v127_v28 = vrot.slane %v78_v9, %v126_v4 }
  0xac   :  { %v60_v51 = vpop.xlane.xlu0 %59  ;;  %v83_v10 = vmul.f32 0.00390625, %v72_v49 }
  0xad   :  { %v79_v12 = vmul.f32 0.00390625, %v60_v51  ;;  %v129_v60 = vsel %vm128_vm1, %v127_v28, %v122_v27 }
  0xae   :  { %v156_v29 = vrot.slane %v83_v10, %v133_v6 }
  0xaf   :  { %v75_v52 = vpop.xlane.xlu1 %74  ;;  %v134_v38 = vrot.slane %v79_v12, %v133_v6 }
  0xb0   :  { %v63_v54 = vpop.xlane.xlu0 %62  ;;  %v84_v14 = vmul.f32 0.00390625, %v75_v52 }
  0xb1   :  { %v80_v16 = vmul.f32 0.00390625, %v63_v54  ;;  %v152_v54 = vsel %vm128_vm1, %v151_v21, %v147_v26  ;;  %v136_v8 = vsel %vm135_vm2, %v134_v38, %v129_v60 }
  0xb2   :  { %v161_v39 = vrot.slane %v84_v14, %v140_v13  ;;  %v157_v5 = vsel %vm135_vm2, %v156_v29, %v152_v54 }
  0xb3   :  { %v90_v59 = vpop.xlane.xlu1 %89  ;;  %v141_v51 = vrot.slane %v80_v16, %v140_v13 }
  0xb4   :  { %v87_v2 = vpop.xlane.xlu0 %86  ;;  %v181_v53 = vrot.slane %v90_v59, %v126_v4  ;;  %v162_v9 = vsel %vm142_vm3, %v161_v39, %v157_v5 }
  0xb5   :  { %v177_v57 = vrot.slane %v87_v2, %v121_v3  ;;  %v143_v2 = vsel %vm142_vm3, %v141_v51, %v136_v8 }
  0xb6   :  { %v164_v16 = vsel %vm163_vm4, %v162_v9, %v143_v2  ;;  %v835_v9 = vand.u32 4294901760, %v6001_v20 }
  0xb7   :  { %v102_v11 = vpop.xlane.xlu1 %101 }
  0xb8   :  { %v99_v15 = vpop.xlane.xlu0 %98  ;;  %v200_v48 = vrot.slane %v102_v11, %v126_v4 }
  0xb9   :  { %v196_v49 = vrot.slane %v99_v15, %v121_v3  ;;  %v182_v3 = vsel %vm128_vm1, %v181_v53, %v177_v57  ;;  %v821_v57 = vand.u32 4294901760, %v5997_v18 }
  0xbb   :  { %v105_v41 = vpop.xlane.xlu1 %104  ;;  %v201_v10 = vsel %vm128_vm1, %v200_v48, %v196_v49  ;;  %v6117_v48 = vsub.f32 %v232_v44, %v761_v46  ;;  %v822_v5 = vsub.f32 %v5997_v18, %v821_v57 }
  0xbc   :  { %v93_v50 = vpop.xlane.xlu0 %92  ;;  %v205_v52 = vrot.slane %v105_v41, %v133_v6 }
  0xbd   :  { %v186_v58 = vrot.slane %v93_v50, %v133_v6  ;;  %v823_v8 = vand.u32 4294901760, %v822_v5 }
  0xbe   :  { %v206_v4 = vsel %vm135_vm2, %v205_v52, %v201_v10  ;;  %v828_v52 = vand.u32 4294901760, %v5999_v19  ;;  %v842_v10 = vand.u32 4294901760, %v6008_v23 }
  0xbf   :  { %v108_v7 = vpop.xlane.xlu1 %107  ;;  %v187_v12 = vsel %vm135_vm2, %v186_v58, %v182_v3 }
  0xc0   :  { %v210_v11 = vrot.slane %v108_v7, %v140_v13  ;;  %v96_v59 = vpop.xlane.xlu0 %95  ;;  %v829_v7 = vsub.f32 %v5999_v19, %v828_v52  ;;  %v843_v2 = vsub.f32 %v6008_v23, %v842_v10 }
  0xc1   :  { %v191_v6 = vrot.slane %v96_v59, %v140_v13  ;;  %v6115_v13 = vsub.f32 %v231_v43, %v758_v45  ;;  %v836_v59 = vsub.f32 %v6001_v20, %v835_v9 }
  0xc2   :  { %v211_v14 = vsel %vm142_vm3, %v210_v11, %v206_v4  ;;  %v830_v11 = vand.u32 4294901760, %v829_v7 }
  0xc3   :  { %v192_v15 = vsel %vm142_vm3, %v191_v6, %v187_v12  ;;  %v837_v4 = vand.u32 4294901760, %v836_v59  ;;  %v844_v6 = vand.u32 4294901760, %v843_v2  ;;  %v849_v12 = vand.u32 4294901760, %v6010_v24 }
  0xc4   :  { %v213_v21 = vsel %vm212_vm5, %v211_v14, %v192_v15  ;;  %v4798_v3 = vpack.c.bf16 %v830_v11, %v823_v8  ;;  %v856_v14 = vand.u32 4294901760, %v6013_v25 }
  0xc5   :  { %v216_v26 = vsel %vm215_vm6, %v164_v16, %v213_v21  ;;  %v4801_v15 = vpack.c.bf16 %v844_v6, %v837_v4  ;;  %v850_v16 = vsub.f32 %v6010_v24, %v849_v12 }
  0xc6   :  { %v239_v27 = vsel %vm237_vm7, %v216_v26, 0  ;;  %v857_v21 = vsub.f32 %v6013_v25, %v856_v14 }
  0xc7   :  { %v310_v28 = vand.u32 4294901760, %v239_v27  ;;  %v851_v26 = vand.u32 4294901760, %v850_v16 }
  0xc9   :  { %v311_v29 = vsub.f32 %v239_v27, %v310_v28  ;;  %v858_v27 = vand.u32 4294901760, %v857_v21 }
  0xcb   :  { %v312_v41 = vand.u32 4294901760, %v311_v29 }
  0xcd   :  { %v313_v38 = vsub.f32 %v311_v29, %v312_v41 }
  0xcf   :  { %v314_v39 = vand.u32 4294901760, %v313_v38 }
  0xd1   :  { %4470 = vmatmul.mubr.f32.vlgmr.msra.gmra.mrb[0].mxu0 %v314_v39 }
  0xd2   :  { %4745 = vmatpush3.bf16.msra.mxu0 %v5954_v56  ;;  %4480 = vmatprep.mubr.msk.f32.mxu0 %vm5817_vm0, %v5818_v40  ;;  %v6097_v56 = vpack.c.bf16 %v761_v46, %v758_v45  ;;  %v877_v45 = vand.u32 4294901760, %v6020_v32  ;;  %v884_v46 = vand.u32 4294901760, %v6022_v33 }
  0xd3   :  { %4746 = vmatprep.subr.bf16.mxu0 %v5816_v35 }
  0xd4   :  { %4790 = vmatpush3.bf16.msra.mxu1 %v6097_v56 }
  0xd5   :  { %4791 = vmatprep.subr.bf16.mxu1 %v5816_v35 }
  0xd6   :  { %4748 = vmatpush3.bf16.msra.mxu0 %v5958_v61 }
  0xd7   :  { %4749 = vmatprep.subr.bf16.mxu0 %v5816_v35 }
  0xd9   :  { %4481 = vmatmul.mubr.f32.vlgmr.msra.gmra.mrb[0].mxu0 %v310_v28 }
  0xda   :  { %4751 = vmatpush3.bf16.msra.mxu0 %v4750_v62  ;;  %4491 = vmatprep.mubr.msk.f32.mxu0 %vm5817_vm0, %v5818_v40 }
  0xdb   :  { %4752 = vmatprep.subr.bf16.mxu0 %v5816_v35 }
  0xde   :  { %4754 = vmatpush3.bf16.msra.mxu0 %v4753_v63 }
  0xdf   :  { %4755 = vmatprep.subr.bf16.mxu0 %v5816_v35 }
  0xe1   :  { %4492 = vmatmul.mubr.f32.vlgmr.msra.gmra.mrb[0].mxu0 %v311_v29  ;;  %v870_v29 = vand.u32 4294901760, %v6018_v31 }
  0xe2   :  { %4757 = vmatpush3.bf16.msra.mxu0 %v5932_v42  ;;  %4502 = vmatprep.mubr.msk.f32.mxu0 %vm5817_vm0, %v5818_v40 }
  0xe3   :  { %4758 = vmatprep.subr.bf16.mxu0 %v5816_v35  ;;  %v871_v39 = vsub.f32 %v6018_v31, %v870_v29 }
  0xe5   :  { %v872_v44 = vand.u32 4294901760, %v871_v39 }
  0xe6   :  { %4760 = vmatpush3.bf16.msra.mxu0 %v5943_v47 }
  0xe7   :  { %4761 = vmatprep.subr.bf16.mxu0 %v5816_v35 }
  0xe9   :  { %4503 = vmatmul.mubr.f32.vlgmr.msra.gmra.mrb[0].mxu0 %v312_v41  ;;  %v4804_v41 = vpack.c.bf16 %v858_v27, %v851_v26 }
  0xea   :  { %4763 = vmatpush3.bf16.msra.mxu0 %v5964_v0  ;;  %4513 = vmatprep.mubr.msk.f32.mxu0 %vm5817_vm0, %v5818_v40  ;;  %v235_v0 = vld [vmem:[%s8377_s2 + $0x70] sm:$0xff] }
  0xeb   :  { %4764 = vmatprep.subr.bf16.mxu0 %v5816_v35  ;;  %v770_v51 = vand.u32 4294901760, %v235_v0 }
  0xed   :  { %v6129_v58 = vsub.f32 %v235_v0, %v770_v51 }
  0xee   :  { %4766 = vmatpush3.bf16.msra.mxu0 %v5966_v1  ;;  %v236_v1 = vld [vmem:[%s8377_s2 + $0x78] sm:$0xff] }
  0xef   :  { %4767 = vmatprep.subr.bf16.mxu0 %v5816_v35  ;;  %v773_v53 = vand.u32 4294901760, %v236_v1  ;;  %v8382_v27 = vand.u32 4294901760, %v6129_v58 }
  0xf1   :  { %4514 = vmatmul.mubr.f32.vlgmr.msra.gmra.mrb[0].mxu0 %v310_v28  ;;  %v6127_v54 = vpack.c.bf16 %v773_v53, %v770_v51  ;;  %v6131_v60 = vsub.f32 %v236_v1, %v773_v53  ;;  %v891_v1 = vand.u32 4294901760, %v6115_v13  ;;  %v898_v51 = vand.u32 4294901760, %v6117_v48 }
  0xf2   :  { %4769 = vmatpush3.bf16.msra.mxu0 %v5932_v42  ;;  %4524 = vmatprep.mubr.msk.f32.mxu0 %vm5817_vm0, %v5818_v40  ;;  %v233_v42 = vld [vmem:[%s8377_s2 + $0x60] sm:$0xff] }
  0xf3   :  { %4770 = vmatprep.subr.bf16.mxu0 %v5816_v35  ;;  %v764_v61 = vand.u32 4294901760, %v233_v42  ;;  %v892_v5 = vsub.f32 %v6115_v13, %v891_v1  ;;  %v899_v7 = vsub.f32 %v6117_v48, %v898_v51 }
  0xf5   :  { %v6120_v49 = vsub.f32 %v233_v42, %v764_v61  ;;  %v893_v8 = vand.u32 4294901760, %v892_v5  ;;  %v900_v11 = vand.u32 4294901760, %v899_v7  ;;  %v4825_v5 = vpack.c.bf16 %v6008_v23, %v6001_v20 }
  0xf6   :  { %4772 = vmatpush3.bf16.msra.mxu0 %v5943_v47  ;;  %v234_v47 = vld [vmem:[%s8377_s2 + $0x68] sm:$0xff]  ;;  %v4828_v7 = vpack.c.bf16 %v6013_v25, %v6010_v24  ;;  %v4882_v20 = vpack.c.bf16 %v884_v46, %v877_v45  ;;  %v4885_v23 = vpack.c.bf16 %v898_v51, %v891_v1 }
  0xf7   :  { %v767_v62 = vand.u32 4294901760, %v234_v47  ;;  %v905_v59 = vand.u32 4294901760, %v6120_v49  ;;  %v4813_v4 = vpack.c.bf16 %v900_v11, %v893_v8  ;;  %v4831_v8 = vpack.c.bf16 %v6018_v31, %v6016_v30 }
  0xf8   :  { %v4834_v11 = vpack.c.bf16 %v6022_v33, %v6020_v32  ;;  %v8800_v31 = vand.u32 4294901760, %v6131_v60 }
  0xf9   :  { %4525 = vmatmul.mubr.f32.vlgmr.msra.gmra.mrb[0].mxu0 %v310_v28  ;;  %v6107_v63 = vpack.c.bf16 %v767_v62, %v764_v61  ;;  %v6122_v50 = vsub.f32 %v234_v47, %v767_v62  ;;  %v863_v28 = vand.u32 4294901760, %v6016_v30  ;;  %v878_v47 = vsub.f32 %v6020_v32, %v877_v45  ;;  %v1538_v45 = vld [vmem:[#allocation3 + $0x68] sm:$0xff] }
  0xfa   :  { %v885_v61 = vsub.f32 %v6022_v33, %v884_v46  ;;  %v906_v6 = vsub.f32 %v6120_v49, %v905_v59 }
  0xfb   :  { %4793 = vmatpush3.bf16.msra.mxu1 %v6107_v63  ;;  %v864_v38 = vsub.f32 %v6016_v30, %v863_v28  ;;  %v879_v62 = vand.u32 4294901760, %v878_v47  ;;  %v8383_v2 = vand.u32 4294901760, %v6122_v50  ;;  %v8798_v24 = vand.u32 4294901760, %v6122_v50 }
  0xfc   :  { %4794 = vmatprep.subr.bf16.mxu1 %v5816_v35  ;;  %v886_v0 = vand.u32 4294901760, %v885_v61  ;;  %v907_v21 = vand.u32 4294901760, %v906_v6  ;;  %v4837_v6 = vpack.c.bf16 %v6117_v48, %v6115_v13  ;;  %v8799_v30 = vand.u32 4294901760, %v6129_v58  ;;  %v1530_v13 = vld [vmem:[#allocation3 + $0x28] sm:$0xff]  ;;  %v1532_v48 = vld [vmem:[#allocation3 + $0x38] sm:$0xff] }
  0xfd   :  { %v865_v43 = vand.u32 4294901760, %v864_v38  ;;  %v913_v16 = vsub.f32 %v6122_v50, %v8383_v2  ;;  %v8381_v38 = vand.u32 4294901760, %v6131_v60  ;;  %v4888_v25 = vpack.c.bf16 %v8798_v24, %v905_v59 }
  0xfe   :  { %v4810_v53 = vpack.c.bf16 %v886_v0, %v879_v62  ;;  %v4822_v0 = vpack.c.bf16 %v5999_v19, %v5997_v18  ;;  %v4876_v18 = vpack.c.bf16 %v856_v14, %v849_v12  ;;  %v4879_v19 = vpack.c.bf16 %v870_v29, %v863_v28  ;;  %v1535_v12 = vld [vmem:[#allocation3 + $0x50] sm:$0xff] }
  0xff   :  { %4796 = vmatpush3.bf16.msra.mxu1 %v6127_v54  ;;  %v4807_v42 = vpack.c.bf16 %v872_v44, %v865_v43  ;;  %v914_v26 = vand.u32 4294901760, %v913_v16  ;;  %v920_v43 = vsub.f32 %v6129_v58, %v8382_v27  ;;  %v927_v44 = vsub.f32 %v6131_v60, %v8381_v38 }
 0x100   :  { %4797 = vmatprep.subr.bf16.mxu1 %v5816_v35  ;;  %v4840_v16 = vpack.c.bf16 %v6122_v50, %v6120_v49  ;;  %v4891_v32 = vpack.c.bf16 %v8800_v31, %v8799_v30  ;;  %v1663_v49 = vand.u32 4294901760, %v1530_v13  ;;  %v1667_v50 = vand.u32 4294901760, %v1532_v48 }
 0x101   :  { %v4816_v39 = vpack.c.bf16 %v914_v26, %v907_v21  ;;  %v921_v47 = vand.u32 4294901760, %v920_v43  ;;  %v928_v61 = vand.u32 4294901760, %v927_v44  ;;  %v4843_v21 = vpack.c.bf16 %v6131_v60, %v6129_v58 }
 0x102   :  { %v6328_v29 = vpack.c.bf16 %v1667_v50, %v1663_v49  ;;  %v6333_v46 = vsub.f32 %v1532_v48, %v1667_v50 }
 0x103   :  { %v4819_v62 = vpack.c.bf16 %v928_v61, %v921_v47 }
 0x104   :  { %8807 = vst [vmem:[#allocation16_spill] sm:$0xff] %v6328_v29  ;;  %8809 = vst [vmem:[#allocation18_spill] sm:$0xff] %v6333_v46 }
 0x1cc   :  { %v722_v26 = vpop.f32.mrb[0].mxu0 }
 0x1cd   :  { %v726_v43 = vmax.f32 %v722_v26, 0.0  ;;  %v4526_v44 = vpop.f32.mrb[1].mxu0 }
 0x1ce   :  { %v1543_v44 = vld [vmem:[#allocation3 + $0x90] sm:$0xff] }
 0x1cf   :  { %v6213_v47 = vand.u32 4294901760, %v726_v43  ;;  %v1693_v31 = vand.u32 4294901760, %v1543_v44 }
 0x1d1   :  { %v809_v61 = vsub.f32 %v726_v43, %v6213_v47  ;;  %v6378_v48 = vsub.f32 %v1543_v44, %v1693_v31 }
 0x1d3   :  { %v810_v38 = vand.u32 4294901760, %v809_v61  ;;  %8827 = vst [vmem:[#allocation36_spill] sm:$0xff] %v6378_v48 }
 0x1d5   :  { %v811_v27 = vsub.f32 %v809_v61, %v810_v38 }
 0x1d7   :  { %v812_v2 = vand.u32 4294901760, %v811_v27  ;;  %v1679_v27 = vand.u32 4294901760, %v1538_v45 }
 0x1d9   :  { %4560 = vmatmul.mubr.f32.vlgmr.msra.gmra.mrb[0].mxu1 %v812_v2 }
 0x1da   :  { %4799 = vmatpush3.bf16.msra.mxu1 %v4798_v3  ;;  %4594 = vmatprep.mubr.msk.f32.mxu1 %vm5817_vm0, %v5818_v40  ;;  %v4870_v3 = vpack.c.bf16 %v828_v52, %v821_v57  ;;  %v1529_v57 = vld [vmem:[#allocation3 + $0x20] sm:$0xff]  ;;  %v1534_v52 = vld [vmem:[#allocation3 + $0x48] sm:$0xff] }
 0x1db   :  { %4800 = vmatprep.subr.bf16.mxu1 %v5816_v35  ;;  %v1671_v51 = vand.u32 4294901760, %v1534_v52 }
 0x1de   :  { %4802 = vmatpush3.bf16.msra.mxu1 %v4801_v15  ;;  %v4873_v15 = vpack.c.bf16 %v842_v10, %v835_v9  ;;  %v1536_v9 = vld [vmem:[#allocation3 + $0x58] sm:$0xff]  ;;  %v1533_v10 = vld [vmem:[#allocation3 + $0x40] sm:$0xff] }
 0x1df   :  { %4803 = vmatprep.subr.bf16.mxu1 %v5816_v35  ;;  %v1675_v59 = vand.u32 4294901760, %v1536_v9  ;;  %v1673_v2 = vand.u32 4294901760, %v1533_v10 }
 0x1e1   :  { %v6353_v43 = vsub.f32 %v1533_v10, %v1673_v2 }
 0x1e2   :  { %4805 = vmatpush3.bf16.msra.mxu1 %v4804_v41  ;;  %v6330_v41 = vsub.f32 %v1530_v13, %v1663_v49  ;;  %v1549_v49 = vld [vmem:[#allocation3 + $0xc0] sm:$0xff] }
 0x1e3   :  { %4806 = vmatprep.subr.bf16.mxu1 %v5816_v35  ;;  %8817 = vst [vmem:[#allocation26_spill] sm:$0xff] %v6353_v43 }
 0x1e4   :  { %8808 = vst [vmem:[#allocation17_spill] sm:$0xff] %v6330_v41 }
 0x1e6   :  { %4808 = vmatpush3.bf16.msra.mxu1 %v4807_v42  ;;  %v1665_v42 = vand.u32 4294901760, %v1529_v57 }
 0x1e7   :  { %4809 = vmatprep.subr.bf16.mxu1 %v5816_v35 }
 0x1ea   :  { %4811 = vmatpush3.bf16.msra.mxu1 %v4810_v53  ;;  %v1540_v53 = vld [vmem:[#allocation3 + $0x78] sm:$0xff] }
 0x1eb   :  { %4812 = vmatprep.subr.bf16.mxu1 %v5816_v35 }
 0x1ee   :  { %4814 = vmatpush3.bf16.msra.mxu1 %v4813_v4  ;;  %v1677_v4 = vand.u32 4294901760, %v1535_v12 }
 0x1ef   :  { %4815 = vmatprep.subr.bf16.mxu1 %v5816_v35 }
 0x1f0   :  { %v6351_v26 = vpack.c.bf16 %v1677_v4, %v1673_v2 }
 0x1f2   :  { %4817 = vmatpush3.bf16.msra.mxu1 %v4816_v39  ;;  %v1539_v39 = vld [vmem:[#allocation3 + $0x70] sm:$0xff]  ;;  %8816 = vst [vmem:[#allocation25_spill] sm:$0xff] %v6351_v26 }
 0x1f3   :  { %4818 = vmatprep.subr.bf16.mxu1 %v5816_v35 }
 0x1f6   :  { %4820 = vmatpush3.bf16.msra.mxu1 %v4819_v62 }
 0x1f7   :  { %4821 = vmatprep.subr.bf16.mxu1 %v5816_v35 }
 0x1f9   :  { %4595 = vmatmul.mubr.f32.vlgmr.msra.gmra.mrb[0].mxu1 %v6213_v47 }
 0x1fa   :  { %4823 = vmatpush3.bf16.msra.mxu1 %v4822_v0  ;;  %4629 = vmatprep.mubr.msk.f32.mxu1 %vm5817_vm0, %v5818_v40  ;;  %v6341_v0 = vsub.f32 %v1529_v57, %v1665_v42 }
 0x1fb   :  { %4824 = vmatprep.subr.bf16.mxu1 %v5816_v35 }
 0x1fc   :  { %8811 = vst [vmem:[#allocation20_spill] sm:$0xff] %v6341_v0 }
 0x1fe   :  { %4826 = vmatpush3.bf16.msra.mxu1 %v4825_v5 }
 0x1ff   :  { %4827 = vmatprep.subr.bf16.mxu1 %v5816_v35 }
 0x202   :  { %4829 = vmatpush3.bf16.msra.mxu1 %v4828_v7  ;;  %v6345_v7 = vsub.f32 %v1534_v52, %v1671_v51  ;;  %v1551_v52 = vld [vmem:[#allocation3 + $0xd0] sm:$0xff] }
 0x203   :  { %4830 = vmatprep.subr.bf16.mxu1 %v5816_v35 }
 0x204   :  { %8813 = vst [vmem:[#allocation22_spill] sm:$0xff] %v6345_v7 }
 0x206   :  { %4832 = vmatpush3.bf16.msra.mxu1 %v4831_v8  ;;  %v1542_v8 = vld [vmem:[#allocation3 + $0x88] sm:$0xff] }
 0x207   :  { %4833 = vmatprep.subr.bf16.mxu1 %v5816_v35 }
 0x20a   :  { %4835 = vmatpush3.bf16.msra.mxu1 %v4834_v11  ;;  %v1544_v11 = vld [vmem:[#allocation3 + $0x98] sm:$0xff] }
 0x20b   :  { %4836 = vmatprep.subr.bf16.mxu1 %v5816_v35 }
 0x20e   :  { %4838 = vmatpush3.bf16.msra.mxu1 %v4837_v6  ;;  %v1541_v6 = vld [vmem:[#allocation3 + $0x80] sm:$0xff] }
 0x20f   :  { %4839 = vmatprep.subr.bf16.mxu1 %v5816_v35 }
 0x212   :  { %4841 = vmatpush3.bf16.msra.mxu1 %v4840_v16  ;;  %v6347_v16 = vpack.c.bf16 %v1675_v59, %v1671_v51 }
 0x213   :  { %4842 = vmatprep.subr.bf16.mxu1 %v5816_v35 }
 0x214   :  { %8814 = vst [vmem:[#allocation23_spill] sm:$0xff] %v6347_v16 }
 0x216   :  { %4844 = vmatpush3.bf16.msra.mxu1 %v4843_v21  ;;  %v6349_v21 = vsub.f32 %v1536_v9, %v1675_v59 }
 0x217   :  { %4845 = vmatprep.subr.bf16.mxu1 %v5816_v35 }
 0x218   :  { %8815 = vst [vmem:[#allocation24_spill] sm:$0xff] %v6349_v21 }
 0x219   :  { %4630 = vmatmul.mubr.f32.vlgmr.msra.gmra.mrb[0].mxu1 %v809_v61  ;;  %v1683_v61 = vand.u32 4294901760, %v1540_v53 }
 0x21a   :  { %4847 = vmatpush3.bf16.msra.mxu1 %v5995_v17  ;;  %4664 = vmatprep.mubr.msk.f32.mxu1 %vm5817_vm0, %v5818_v40 }
 0x21b   :  { %4848 = vmatprep.subr.bf16.mxu1 %v5816_v35  ;;  %v6363_v24 = vpack.c.bf16 %v1683_v61, %v1679_v27 }
 0x21d   :  { %8820 = vst [vmem:[#allocation29_spill] sm:$0xff] %v6363_v24 }
 0x21e   :  { %4850 = vmatpush3.bf16.msra.mxu1 %v6006_v22 }
 0x21f   :  { %4851 = vmatprep.subr.bf16.mxu1 %v5816_v35 }
 0x222   :  { %4853 = vmatpush3.bf16.msra.mxu1 %v6025_v34 }
 0x223   :  { %4854 = vmatprep.subr.bf16.mxu1 %v5816_v35 }
 0x226   :  { %4856 = vmatpush3.bf16.msra.mxu1 %v6029_v36 }
 0x227   :  { %4857 = vmatprep.subr.bf16.mxu1 %v5816_v35 }
 0x22a   :  { %4859 = vmatpush3.bf16.msra.mxu1 %v6033_v37 }
 0x22b   :  { %4860 = vmatprep.subr.bf16.mxu1 %v5816_v35 }
 0x22e   :  { %4862 = vmatpush3.bf16.msra.mxu1 %v6097_v56 }
 0x22f   :  { %4863 = vmatprep.subr.bf16.mxu1 %v5816_v35 }
 0x232   :  { %4865 = vmatpush3.bf16.msra.mxu1 %v6107_v63 }
 0x233   :  { %4866 = vmatprep.subr.bf16.mxu1 %v5816_v35 }
 0x236   :  { %4868 = vmatpush3.bf16.msra.mxu1 %v6127_v54 }
 0x237   :  { %4869 = vmatprep.subr.bf16.mxu1 %v5816_v35 }
 0x239   :  { %4665 = vmatmul.mubr.f32.vlgmr.msra.gmra.mrb[0].mxu1 %v810_v38  ;;  %v1537_v38 = vld [vmem:[#allocation3 + $0x60] sm:$0xff] }
 0x23a   :  { %4871 = vmatpush3.bf16.msra.mxu1 %v4870_v3  ;;  %4699 = vmatprep.mubr.msk.f32.mxu1 %vm5817_vm0, %v5818_v40  ;;  %v6358_v3 = vsub.f32 %v1538_v45, %v1679_v27  ;;  %v1709_v27 = vand.u32 4294901760, %v1551_v52 }
 0x23b   :  { %4872 = vmatprep.subr.bf16.mxu1 %v5816_v35 }
 0x23c   :  { %8819 = vst [vmem:[#allocation28_spill] sm:$0xff] %v6358_v3 }
 0x23e   :  { %4874 = vmatpush3.bf16.msra.mxu1 %v4873_v15  ;;  %v1681_v15 = vand.u32 4294901760, %v1537_v38 }
 0x23f   :  { %4875 = vmatprep.subr.bf16.mxu1 %v5816_v35 }
 0x240   :  { %v6367_v30 = vsub.f32 %v1537_v38, %v1681_v15 }
 0x242   :  { %4877 = vmatpush3.bf16.msra.mxu1 %v4876_v18  ;;  %v1685_v18 = vand.u32 4294901760, %v1539_v39  ;;  %8822 = vst [vmem:[#allocation31_spill] sm:$0xff] %v6367_v30 }
 0x243   :  { %4878 = vmatprep.subr.bf16.mxu1 %v5816_v35 }
 0x244   :  { %v6381_v50 = vpack.c.bf16 %v1685_v18, %v1681_v15 }
 0x246   :  { %4880 = vmatpush3.bf16.msra.mxu1 %v4879_v19  ;;  %v1687_v19 = vand.u32 4294901760, %v1542_v8  ;;  %8828 = vst [vmem:[#allocation37_spill] sm:$0xff] %v6381_v50 }
 0x247   :  { %4881 = vmatprep.subr.bf16.mxu1 %v5816_v35 }
 0x24a   :  { %4883 = vmatpush3.bf16.msra.mxu1 %v4882_v20  ;;  %v1691_v20 = vand.u32 4294901760, %v1544_v11 }
 0x24b   :  { %4884 = vmatprep.subr.bf16.mxu1 %v5816_v35 }
 0x24c   :  { %v6385_v9 = vpack.c.bf16 %v1691_v20, %v1687_v19 }
 0x24e   :  { %4886 = vmatpush3.bf16.msra.mxu1 %v4885_v23  ;;  %v1689_v23 = vand.u32 4294901760, %v1541_v6  ;;  %8829 = vst [vmem:[#allocation38_spill] sm:$0xff] %v6385_v9 }
 0x24f   :  { %4887 = vmatprep.subr.bf16.mxu1 %v5816_v35 }
 0x250   :  { %v6376_v13 = vsub.f32 %v1541_v6, %v1689_v23  ;;  %v6399_v38 = vpack.c.bf16 %v1693_v31, %v1689_v23  ;;  %v6410_v6 = vsub.f32 %v1551_v52, %v1709_v27 }
 0x252   :  { %4889 = vmatpush3.bf16.msra.mxu1 %v4888_v25  ;;  %v6365_v25 = vsub.f32 %v1540_v53, %v1683_v61  ;;  %8826 = vst [vmem:[#allocation35_spill] sm:$0xff] %v6376_v13  ;;  %v1705_v53 = vand.u32 4294901760, %v1549_v49  ;;  %8835 = vst [vmem:[#allocation44_spill] sm:$0xff] %v6399_v38 }
 0x253   :  { %4890 = vmatprep.subr.bf16.mxu1 %v5816_v35  ;;  %8839 = vst [vmem:[#allocation48_spill] sm:$0xff] %v6410_v6  ;;  %v1582_v6 = vld [vmem:[#allocation3 + $0x1c8] sm:$0xff] }
 0x254   :  { %8821 = vst [vmem:[#allocation30_spill] sm:$0xff] %v6365_v25  ;;  %v6421_v15 = vpack.c.bf16 %v1709_v27, %v1705_v53 }
 0x256   :  { %4892 = vmatpush3.bf16.msra.mxu1 %v4891_v32  ;;  %v1546_v32 = vld [vmem:[#allocation3 + $0xa8] sm:$0xff]  ;;  %8842 = vst [vmem:[#allocation51_spill] sm:$0xff] %v6421_v15 }
 0x257   :  { %4893 = vmatprep.subr.bf16.mxu1 %v5816_v35  ;;  %v1695_v57 = vand.u32 4294901760, %v1546_v32 }
 0x259   :  { %4700 = vmatmul.mubr.f32.vlgmr.msra.gmra.mrb[0].mxu1 %v6213_v47 }
 0x25a   :  { %4895 = vmatpush3.bf16.msra.mxu1 %v5995_v17  ;;  %4734 = vmatprep.mubr.msk.f32.mxu1 %vm5817_vm0, %v5818_v40  ;;  %v1526_v40 = vld [vmem:[#allocation3 + $0x8] sm:$0xff]  ;;  %v1528_v17 = vld [vmem:[#allocation3 + $0x18] sm:$0xff] }
 0x25b   :  { %4896 = vmatprep.subr.bf16.mxu1 %v5816_v35  ;;  %v1655_v33 = vand.u32 4294901760, %v1526_v40 }
 0x25e   :  { %4898 = vmatpush3.bf16.msra.mxu1 %v6006_v22  ;;  %v1525_v22 = vld [vmem:[#allocation3] sm:$0xff] }
 0x25f   :  { %4899 = vmatprep.subr.bf16.mxu1 %v5816_v35 }
 0x262   :  { %4901 = vmatpush3.bf16.msra.mxu1 %v6025_v34  ;;  %v1659_v34 = vand.u32 4294901760, %v1528_v17 }
 0x263   :  { %4902 = vmatprep.subr.bf16.mxu1 %v5816_v35 }
 0x264   :  { %v6320_v58 = vsub.f32 %v1528_v17, %v1659_v34  ;;  %v6370_v17 = vsub.f32 %v1539_v39, %v1685_v18 }
 0x266   :  { %4904 = vmatpush3.bf16.msra.mxu1 %v6029_v36  ;;  %v1527_v36 = vld [vmem:[#allocation3 + $0x10] sm:$0xff]  ;;  %8803 = vst [vmem:[#allocation12_spill] sm:$0xff] %v6320_v58  ;;  %8823 = vst [vmem:[#allocation32_spill] sm:$0xff] %v6370_v17 }
 0x267   :  { %4905 = vmatprep.subr.bf16.mxu1 %v5816_v35 }
 0x26a   :  { %4907 = vmatpush3.bf16.msra.mxu1 %v6033_v37  ;;  %v1657_v37 = vand.u32 4294901760, %v1525_v22 }
 0x26b   :  { %4908 = vmatprep.subr.bf16.mxu1 %v5816_v35 }
 0x26c   :  { %v6322_v60 = vsub.f32 %v1525_v22, %v1657_v37  ;;  %v6372_v22 = vsub.f32 %v1542_v8, %v1687_v19  ;;  %v6404_v8 = vsub.f32 %v1549_v49, %v1705_v53  ;;  %v1553_v49 = vld [vmem:[#allocation3 + $0xe0] sm:$0xff]  ;;  %v1560_v53 = vld [vmem:[#allocation3 + $0x118] sm:$0xff] }
 0x26d   :  { %v1713_v52 = vand.u32 4294901760, %v1553_v49 }
 0x26e   :  { %4910 = vmatpush3.bf16.msra.mxu1 %v6097_v56  ;;  %v1661_v56 = vand.u32 4294901760, %v1527_v36  ;;  %8804 = vst [vmem:[#allocation13_spill] sm:$0xff] %v6322_v60  ;;  %8824 = vst [vmem:[#allocation33_spill] sm:$0xff] %v6372_v22 }
 0x26f   :  { %4911 = vmatprep.subr.bf16.mxu1 %v5816_v35  ;;  %8837 = vst [vmem:[#allocation46_spill] sm:$0xff] %v6404_v8  ;;  %v1584_v8 = vld [vmem:[#allocation3 + $0x1d8] sm:$0xff] }
 0x270   :  { %v6324_v14 = vpack.c.bf16 %v1661_v56, %v1657_v37  ;;  %v6326_v28 = vsub.f32 %v1527_v36, %v1661_v56  ;;  %v1550_v36 = vld [vmem:[#allocation3 + $0xc8] sm:$0xff]  ;;  %v6374_v37 = vsub.f32 %v1544_v11, %v1691_v20  ;;  %v1552_v56 = vld [vmem:[#allocation3 + $0xd8] sm:$0xff] }
 0x271   :  { %v1703_v45 = vand.u32 4294901760, %v1550_v36  ;;  %v1707_v51 = vand.u32 4294901760, %v1552_v56 }
 0x272   :  { %4913 = vmatpush3.bf16.msra.mxu1 %v6107_v63  ;;  %v1531_v63 = vld [vmem:[#allocation3 + $0x30] sm:$0xff]  ;;  %8805 = vst [vmem:[#allocation14_spill] sm:$0xff] %v6324_v14  ;;  %8806 = vst [vmem:[#allocation15_spill] sm:$0xff] %v6326_v28 }
 0x273   :  { %4914 = vmatprep.subr.bf16.mxu1 %v5816_v35  ;;  %v6316_v35 = vpack.c.bf16 %v1659_v34, %v1655_v33  ;;  %v1669_v1 = vand.u32 4294901760, %v1531_v63  ;;  %v1547_v34 = vld [vmem:[#allocation3 + $0xb0] sm:$0xff]  ;;  %8825 = vst [vmem:[#allocation34_spill] sm:$0xff] %v6374_v37  ;;  %v6402_v39 = vsub.f32 %v1552_v56, %v1707_v51  ;;  %v6417_v61 = vpack.c.bf16 %v1707_v51, %v1703_v45  ;;  %v1558_v51 = vld [vmem:[#allocation3 + $0x108] sm:$0xff] }
 0x274   :  { %v1719_v27 = vand.u32 4294901760, %v1558_v51 }
 0x275   :  { %8801 = vst [vmem:[#allocation10_spill] sm:$0xff] %v6316_v35  ;;  %5238 = vmatprep.subr.bf16.mxu0 %v6316_v35  ;;  %v6339_v62 = vpack.c.bf16 %v1669_v1, %v1665_v42  ;;  %v6343_v5 = vsub.f32 %v1531_v63, %v1669_v1  ;;  %v6388_v42 = vsub.f32 %v1546_v32, %v1695_v57  ;;  %8836 = vst [vmem:[#allocation45_spill] sm:$0xff] %v6402_v39 }
 0x276   :  { %4916 = vmatpush3.bf16.msra.mxu1 %v6127_v54  ;;  %v6318_v54 = vsub.f32 %v1526_v40, %v1655_v33  ;;  %5240 = vmatpush1.bf16.msra.mxu0 %v6324_v14  ;;  %v1548_v40 = vld [vmem:[#allocation3 + $0xb8] sm:$0xff]  ;;  %v1545_v33 = vld [vmem:[#allocation3 + $0xa0] sm:$0xff]  ;;  %8841 = vst [vmem:[#allocation50_spill] sm:$0xff] %v6417_v61 }
 0x277   :  { %4918 = vmatprep.subr.bf16.mxu1 %v6316_v35  ;;  %5242 = vmatprep.subr.bf16.mxu0 %v6328_v29  ;;  %8810 = vst [vmem:[#allocation19_spill] sm:$0xff] %v6339_v62  ;;  %8812 = vst [vmem:[#allocation21_spill] sm:$0xff] %v6343_v5  ;;  %v1699_v63 = vand.u32 4294901760, %v1548_v40  ;;  %v1697_v10 = vand.u32 4294901760, %v1545_v33 }
 0x278   :  { %8802 = vst [vmem:[#allocation11_spill] sm:$0xff] %v6318_v54  ;;  %8830 = vst [vmem:[#allocation39_spill] sm:$0xff] %v6388_v42 }
 0x279   :  { %4735 = vmatmul.mubr.f32.vlgmr.msra.gmra.mrb[0].mxu1 %v6213_v47  ;;  %v6356_v47 = vsub.f32 %v1535_v12, %v1677_v4  ;;  %v1701_v12 = vand.u32 4294901760, %v1547_v34  ;;  %v6390_v1 = vsub.f32 %v1548_v40, %v1699_v63  ;;  %v6392_v59 = vsub.f32 %v1545_v33, %v1697_v10  ;;  %v1554_v40 = vld [vmem:[#allocation3 + $0xe8] sm:$0xff]  ;;  %v1556_v33 = vld [vmem:[#allocation3 + $0xf8] sm:$0xff] }
 0x27a   :  { %4920 = vmatpush1.bf16.msra.mxu1 %v6324_v14  ;;  %5244 = vmatpush1.bf16.msra.mxu0 %v6339_v62  ;;  %v6396_v4 = vsub.f32 %v1550_v36, %v1703_v45  ;;  %v6407_v11 = vpack.c.bf16 %v1699_v63, %v1695_v57  ;;  %v1711_v36 = vand.u32 4294901760, %v1554_v40  ;;  %v1715_v56 = vand.u32 4294901760, %v1556_v33  ;;  %v1555_v57 = vld [vmem:[#allocation3 + $0xf0] sm:$0xff]  ;;  %v1578_v14 = vld [vmem:[#allocation3 + $0x1a8] sm:$0xff] }
 0x27b   :  { %4922 = vmatprep.subr.bf16.mxu1 %v6328_v29  ;;  %8818 = vst [vmem:[#allocation27_spill] sm:$0xff] %v6356_v47  ;;  %5246 = vmatprep.subr.bf16.mxu0 %v6347_v16  ;;  %8831 = vst [vmem:[#allocation40_spill] sm:$0xff] %v6390_v1  ;;  %v6394_v2 = vsub.f32 %v1547_v34, %v1701_v12  ;;  %v6413_v44 = vpack.c.bf16 %v1701_v12, %v1697_v10  ;;  %v1717_v10 = vand.u32 4294901760, %v1555_v57 }
 0x27c   :  { %8832 = vst [vmem:[#allocation41_spill] sm:$0xff] %v6392_v59  ;;  %8834 = vst [vmem:[#allocation43_spill] sm:$0xff] %v6396_v4  ;;  %v6428_v12 = vpack.c.bf16 %v1715_v56, %v1711_v36  ;;  %v1759_v35 = vand.u32 4294901760, %v1578_v14 }
 0x27d   :  { %8833 = vst [vmem:[#allocation42_spill] sm:$0xff] %v6394_v2  ;;  %8838 = vst [vmem:[#allocation47_spill] sm:$0xff] %v6407_v11  ;;  %v6430_v45 = vpack.c.bf16 %v1717_v10, %v1713_v52 }
 0x27e   :  { %4924 = vmatpush1.bf16.msra.mxu1 %v6339_v62  ;;  %5248 = vmatpush1.bf16.msra.mxu0 %v6351_v26  ;;  %8840 = vst [vmem:[#allocation49_spill] sm:$0xff] %v6413_v44  ;;  %8843 = vst [vmem:[#allocation52_spill] sm:$0xff] %v6428_v12 }
 0x27f   :  { %4926 = vmatprep.subr.bf16.mxu1 %v6347_v16  ;;  %5250 = vmatprep.subr.bf16.mxu0 %v6363_v24  ;;  %8844 = vst [vmem:[#allocation53_spill] sm:$0xff] %v6430_v45 }
 0x282   :  { %4928 = vmatpush1.bf16.msra.mxu1 %v6351_v26  ;;  %5252 = vmatpush1.bf16.msra.mxu0 %v6381_v50 }
 0x283   :  { %4930 = vmatprep.subr.bf16.mxu1 %v6363_v24  ;;  %5254 = vmatprep.subr.bf16.mxu0 %v6385_v9 }
 0x286   :  { %4932 = vmatpush1.bf16.msra.mxu1 %v6381_v50  ;;  %5256 = vmatpush1.bf16.msra.mxu0 %v6399_v38 }
 0x287   :  { %4934 = vmatprep.subr.bf16.mxu1 %v6385_v9  ;;  %5258 = vmatprep.subr.bf16.mxu0 %v6407_v11 }
 0x28a   :  { %4936 = vmatpush1.bf16.msra.mxu1 %v6399_v38  ;;  %5260 = vmatpush1.bf16.msra.mxu0 %v6413_v44  ;;  %v6495_v38 = vld [vmem:[#allocation3 + $0x150] sm:$0xff] }
 0x28b   :  { %4938 = vmatprep.subr.bf16.mxu1 %v6407_v11  ;;  %5262 = vmatprep.subr.bf16.mxu0 %v6417_v61 }
 0x28e   :  { %4940 = vmatpush1.bf16.msra.mxu1 %v6413_v44  ;;  %5264 = vmatpush1.bf16.msra.mxu0 %v6421_v15  ;;  %v6447_v44 = vsub.s32 0, %v6038_v55 }
 0x28f   :  { %4942 = vmatprep.subr.bf16.mxu1 %v6417_v61  ;;  %5266 = vmatprep.subr.bf16.mxu0 %v6428_v12 }
 0x290   :  { %8850 = vst [vmem:[#allocation59_spill] sm:$0xff] %v6447_v44 }
 0x292   :  { %4944 = vmatpush1.bf16.msra.mxu1 %v6421_v15  ;;  %5268 = vmatpush1.bf16.msra.mxu0 %v6430_v45 }
 0x293   :  { %4946 = vmatprep.subr.bf16.mxu1 %v6428_v12 }
 0x296   :  { %4948 = vmatpush1.bf16.msra.mxu1 %v6430_v45  ;;  %v6467_v45 = vld [vmem:[#allocation3 + $0x130] sm:$0xff] }
 0x34c   :  { %v1364_v18 = vpop.f32.mrb[0].mxu1 }
 0x34d   :  { %v1369_v19 = vrot.slane %v1364_v18, 2  ;;  %v4736_v20 = vpop.f32.mrb[1].mxu1 }
 0x34e   :  { %v1559_v20 = vld [vmem:[#allocation3 + $0x110] sm:$0xff] }
 0x34f   :  { %v1371_v23 = vadd.f32 %v1369_v19, %v1364_v18  ;;  %v1723_v18 = vand.u32 4294901760, %v1560_v53  ;;  %v1557_v19 = vld [vmem:[#allocation3 + $0x100] sm:$0xff]  ;;  %v1725_v61 = vand.u32 4294901760, %v1559_v20 }
 0x350   :  { %v1721_v15 = vand.u32 4294901760, %v1557_v19 }
 0x351   :  { %v1372_v31 = vsub.f32 0.0, %v1371_v23  ;;  %v6434_v23 = vsub.f32 %v1554_v40, %v1711_v36  ;;  %v6454_v36 = vld [vmem:[#allocation3 + $0x138] sm:$0xff] }
 0x352   :  { %v6450_v40 = vpack.c.bf16 %v1725_v61, %v1721_v15  ;;  %v8393_v11 = vand.u32 4294901760, %v6454_v36 }
 0x353   :  { %v1373_v32 = vmul.f32 1.442695, %v1372_v31  ;;  %8845 = vst [vmem:[#allocation54_spill] sm:$0xff] %v6434_v23  ;;  %v6436_v31 = vsub.f32 %v1556_v33, %v1715_v56  ;;  %v6452_v33 = vld [vmem:[#allocation3 + $0x128] sm:$0xff]  ;;  %v6457_v56 = vsub.f32 %v1558_v51, %v1719_v27  ;;  %v8395_v51 = vand.u32 4294901760, %v6467_v45 }
 0x354   :  { %8851 = vst [vmem:[#allocation60_spill] sm:$0xff] %v6450_v40  ;;  %v8394_v12 = vand.u32 4294901760, %v6452_v33  ;;  %v8872_v23 = vand.u32 4294901760, %v6467_v45 }
 0x355   :  { %5737 = vpow2.f32 %v1373_v32  ;;  %8846 = vst [vmem:[#allocation55_spill] sm:$0xff] %v6436_v31  ;;  %v6438_v32 = vsub.f32 %v1553_v49, %v1713_v52  ;;  %8852 = vst [vmem:[#allocation61_spill] sm:$0xff] %v6457_v56  ;;  %v6459_v49 = vsub.f32 %v1560_v53, %v1723_v18  ;;  %v6463_v52 = vsub.f32 %v1559_v20, %v1725_v61  ;;  %v6487_v53 = vld [vmem:[#allocation3 + $0x148] sm:$0xff] }
 0x356   :  { %v6479_v61 = vpack.c.bf16 %v8393_v11, %v8394_v12  ;;  %v6499_v12 = vsub.s32 1, %v6038_v55  ;;  %v6519_v55 = vld [vmem:[#allocation3 + $0x168] sm:$0xff] }
 0x357   :  { %8847 = vst [vmem:[#allocation56_spill] sm:$0xff] %v6438_v32  ;;  %8853 = vst [vmem:[#allocation62_spill] sm:$0xff] %v6459_v49  ;;  %v8415_v50 = vand.u32 4294901760, %v6519_v55  ;;  %v1579_v49 = vld [vmem:[#allocation3 + $0x1b0] sm:$0xff] }
 0x358   :  { %8855 = vst [vmem:[#allocation64_spill] sm:$0xff] %v6463_v52  ;;  %8856 = vst [vmem:[#allocation65_spill] sm:$0xff] %v6479_v61 }
 0x359   :  { %8858 = vst [vmem:[#allocation67_spill] sm:$0xff] %v6499_v12 }
 0x35f   :  { %v5738_v34 = vpop.eup %5737 }
 0x360   :  { %v1375_v63 = vadd.f32 1.0, %v5738_v34  ;;  %v6440_v34 = vsub.f32 %v1555_v57, %v1717_v10  ;;  %v6461_v57 = vsub.f32 %v1557_v19, %v1721_v15  ;;  %v6465_v10 = vld [vmem:[#allocation3 + $0x120] sm:$0xff]  ;;  %v8404_v19 = vand.u32 4294901760, %v6487_v53 }
 0x362   :  { %5739 = vrcp.f32 %v1375_v63  ;;  %8848 = vst [vmem:[#allocation57_spill] sm:$0xff] %v6440_v34  ;;  %v6443_v63 = vpack.c.bf16 %v1723_v18, %v1719_v27  ;;  %8854 = vst [vmem:[#allocation63_spill] sm:$0xff] %v6461_v57  ;;  %v6489_v27 = vld [vmem:[#allocation3 + $0x158] sm:$0xff]  ;;  %v1577_v57 = vld [vmem:[#allocation3 + $0x1a0] sm:$0xff]  ;;  %v1765_v34 = vand.u32 4294901760, %v1579_v49 }
 0x363   :  { %v8403_v20 = vand.u32 4294901760, %v6489_v27  ;;  %v1761_v56 = vand.u32 4294901760, %v1577_v57 }
 0x364   :  { %8849 = vst [vmem:[#allocation58_spill] sm:$0xff] %v6443_v63  ;;  %5270 = vmatprep.subr.bf16.mxu0 %v6443_v63  ;;  %4950 = vmatprep.subr.bf16.mxu1 %v6443_v63  ;;  %v8396_v63 = vand.u32 4294901760, %v6465_v10 }
 0x365   :  { %5272 = vmatpush1.bf16.msra.mxu0 %v6450_v40  ;;  %4952 = vmatpush1.bf16.msra.mxu1 %v6450_v40  ;;  %v6493_v40 = vld [vmem:[#allocation3 + $0x140] sm:$0xff]  ;;  %v6510_v9 = vpack.c.bf16 %v8403_v20, %v8404_v19 }
 0x366   :  { %v6485_v15 = vpack.c.bf16 %v8395_v51, %v8396_v63  ;;  %5274 = vmatprep.subr.bf16.mxu0 %v6479_v61  ;;  %v8408_v51 = vand.u32 4294901760, %v6493_v40  ;;  %v8407_v63 = vand.u32 4294901760, %v6495_v38  ;;  %4954 = vmatprep.subr.bf16.mxu1 %v6479_v61  ;;  %v6521_v61 = vld [vmem:[#allocation3 + $0x178] sm:$0xff]  ;;  %v6526_v19 = vld [vmem:[#allocation3 + $0x160] sm:$0xff] }
 0x367   :  { %8859 = vst [vmem:[#allocation68_spill] sm:$0xff] %v6510_v9  ;;  %v8414_v20 = vand.u32 4294901760, %v6521_v61  ;;  %v8887_v4 = vand.u32 4294901760, %v6521_v61 }
 0x368   :  { %8857 = vst [vmem:[#allocation66_spill] sm:$0xff] %v6485_v15 }
 0x369   :  { %5276 = vmatpush1.bf16.msra.mxu0 %v6485_v15  ;;  %4956 = vmatpush1.bf16.msra.mxu1 %v6485_v15  ;;  %v6528_v15 = vld [vmem:[#allocation3 + $0x170] sm:$0xff]  ;;  %v6539_v26 = vpack.c.bf16 %v8414_v20, %v8415_v50  ;;  %v6555_v50 = vld [vmem:[#allocation3 + $0x180] sm:$0xff]  ;;  %v6638_v2 = vsub.f32 %v6521_v61, %v8887_v4 }
 0x36a   :  { %5278 = vmatprep.subr.bf16.mxu0 %v6510_v9  ;;  %4958 = vmatprep.subr.bf16.mxu1 %v6510_v9  ;;  %v6550_v9 = vld [vmem:[#allocation3 + $0x198] sm:$0xff]  ;;  %v1753_v62 = vand.u32 4294901760, %v6555_v50  ;;  %v8891_v1 = vand.u32 4294901760, %v6528_v15 }
 0x36b   :  { %8861 = vst [vmem:[#allocation70_spill] sm:$0xff] %v6539_v26  ;;  %v8429_v20 = vand.u32 4294901760, %v6550_v9  ;;  %8888 = vst [vmem:[#allocation87_spill] sm:$0xff] %v6638_v2 }
 0x36c   :  { %v5740_v18 = vpop.eup %5739  ;;  %v6648_v42 = vsub.f32 %v6528_v15, %v8891_v1  ;;  %v6661_v61 = vsub.f32 %v6555_v50, %v1753_v62  ;;  %v6667_v1 = vsub.f32 %v1578_v14, %v1759_v35 }
 0x36d   :  { %v1381_v11 = vrot.slane %v5740_v18, %v6447_v44  ;;  %v6517_v44 = vpack.c.bf16 %v8407_v63, %v8408_v51  ;;  %v1400_v24 = vrot.slane %v5740_v18, %v6499_v12  ;;  %v8419_v63 = vand.u32 4294901760, %v6526_v19  ;;  %v6548_v12 = vld [vmem:[#allocation3 + $0x188] sm:$0xff] }
 0x36e   :  { %v8418_v51 = vand.u32 4294901760, %v6528_v15  ;;  %v8430_v16 = vand.u32 4294901760, %v6548_v12  ;;  %8892 = vst [vmem:[#allocation89_spill] sm:$0xff] %v6648_v42  ;;  %8897 = vst [vmem:[#allocation92_spill] sm:$0xff] %v6661_v61 }
 0x36f   :  { %1387 = vbcast.lane.b32.xlu1 %v1381_v11, 264  ;;  %1383 = vbcast.lane.b32.xlu0 %v1381_v11, 256  ;;  %8860 = vst [vmem:[#allocation69_spill] sm:$0xff] %v6517_v44  ;;  %8899 = vst [vmem:[#allocation94_spill] sm:$0xff] %v6667_v1  ;;  %v5763_v1 = vld [vmem:[%s8375_s0 + $0x70] sm:$0xff] }
 0x370   :  { %5280 = vmatpush1.bf16.msra.mxu0 %v6517_v44  ;;  %4960 = vmatpush1.bf16.msra.mxu1 %v6517_v44  ;;  %v6546_v18 = vpack.c.bf16 %v8418_v51, %v8419_v63  ;;  %v6557_v44 = vld [vmem:[#allocation3 + $0x190] sm:$0xff]  ;;  %v6567_v63 = vpack.c.bf16 %v8429_v20, %v8430_v16 }
 0x371   :  { %5282 = vmatprep.subr.bf16.mxu0 %v6539_v26  ;;  %4962 = vmatprep.subr.bf16.mxu1 %v6539_v26  ;;  %v1757_v51 = vand.u32 4294901760, %v6557_v44  ;;  %v1580_v26 = vld [vmem:[#allocation3 + $0x1b8] sm:$0xff] }
 0x372   :  { %8862 = vst [vmem:[#allocation71_spill] sm:$0xff] %v6546_v18  ;;  %8863 = vst [vmem:[#allocation72_spill] sm:$0xff] %v6567_v63  ;;  %v1763_v52 = vand.u32 4294901760, %v1580_v26 }
 0x373   :  { %1402 = vbcast.lane.b32.xlu1 %v1400_v24, 256  ;;  %1391 = vbcast.lane.b32.xlu0 %v1381_v11, 272  ;;  %v6570_v29 = vpack.c.bf16 %v1757_v51, %v1753_v62 }
 0x374   :  { %5284 = vmatpush1.bf16.msra.mxu0 %v6546_v18  ;;  %4964 = vmatpush1.bf16.msra.mxu1 %v6546_v18  ;;  %v6575_v20 = vpack.c.bf16 %v1763_v52, %v1759_v35  ;;  %v8868_v18 = vand.u32 4294901760, %v6454_v36  ;;  %v6669_v15 = vsub.f32 %v1580_v26, %v1763_v52 }
 0x375   :  { %8864 = vst [vmem:[#allocation73_spill] sm:$0xff] %v6570_v29  ;;  %5286 = vmatprep.subr.bf16.mxu0 %v6567_v63  ;;  %4966 = vmatprep.subr.bf16.mxu1 %v6567_v63  ;;  %v8870_v63 = vand.u32 4294901760, %v6465_v10 }
 0x376   :  { %8865 = vst [vmem:[#allocation74_spill] sm:$0xff] %v6575_v20  ;;  %v6586_v32 = vsub.f32 %v6454_v36, %v8868_v18  ;;  %v8876_v36 = vand.u32 4294901760, %v6489_v27  ;;  %8900 = vst [vmem:[#allocation95_spill] sm:$0xff] %v6669_v15 }
 0x377   :  { %1406 = vbcast.lane.b32.xlu1 %v1400_v24, 264  ;;  %1395 = vbcast.lane.b32.xlu0 %v1381_v11, 280  ;;  %v8866_v11 = vand.u32 4294901760, %v6452_v33  ;;  %v6591_v31 = vsub.f32 %v6465_v10, %v8870_v63  ;;  %v8878_v63 = vand.u32 4294901760, %v6493_v40 }
 0x378   :  { %5288 = vmatpush1.bf16.msra.mxu0 %v6570_v29  ;;  %4968 = vmatpush1.bf16.msra.mxu1 %v6570_v29  ;;  %8869 = vst [vmem:[#allocation76_spill] sm:$0xff] %v6586_v32  ;;  %v6596_v29 = vsub.f32 %v6467_v45, %v8872_v23  ;;  %v6606_v18 = vsub.f32 %v6489_v27, %v8876_v36  ;;  %v8880_v45 = vand.u32 4294901760, %v6495_v38 }
 0x379   :  { %v6581_v16 = vsub.f32 %v6452_v33, %v8866_v11  ;;  %8871 = vst [vmem:[#allocation77_spill] sm:$0xff] %v6591_v31  ;;  %v8874_v33 = vand.u32 4294901760, %v6487_v53  ;;  %v6611_v10 = vsub.f32 %v6493_v40, %v8878_v63  ;;  %5290 = vmatprep.subr.bf16.mxu0 %v6575_v20  ;;  %v1771_v31 = vand.u32 4294901760, %v1584_v8  ;;  %4970 = vmatprep.subr.bf16.mxu1 %v6575_v20  ;;  %v1586_v63 = vld [vmem:[#allocation3 + $0x1e8] sm:$0xff] }
 0x37a   :  { %8873 = vst [vmem:[#allocation78_spill] sm:$0xff] %v6596_v29  ;;  %8877 = vst [vmem:[#allocation80_spill] sm:$0xff] %v6606_v18  ;;  %v6616_v23 = vsub.f32 %v6495_v38, %v8880_v45  ;;  %v1581_v29 = vld [vmem:[#allocation3 + $0x1c0] sm:$0xff]  ;;  %v1588_v38 = vld [vmem:[#allocation3 + $0x1f8] sm:$0xff]  ;;  %v1775_v18 = vand.u32 4294901760, %v1586_v63 }
 0x37b   :  { %1410 = vbcast.lane.b32.xlu1 %v1400_v24, 272  ;;  %8867 = vst [vmem:[#allocation75_spill] sm:$0xff] %v6581_v16  ;;  %v6601_v11 = vsub.f32 %v6487_v53, %v8874_v33  ;;  %8879 = vst [vmem:[#allocation81_spill] sm:$0xff] %v6611_v10  ;;  %v1583_v53 = vld [vmem:[#allocation3 + $0x1d0] sm:$0xff]  ;;  %v6619_v33 = vpack.c.bf16 %v1765_v34, %v1761_v56  ;;  %v1769_v27 = vand.u32 4294901760, %v1581_v29  ;;  %v1779_v32 = vand.u32 4294901760, %v1588_v38 }
 0x37c   :  { %8881 = vst [vmem:[#allocation82_spill] sm:$0xff] %v6616_v23  ;;  %v1773_v36 = vand.u32 4294901760, %v1583_v53  ;;  %v1585_v23 = vld [vmem:[#allocation3 + $0x1e0] sm:$0xff]  ;;  %v1587_v10 = vld [vmem:[#allocation3 + $0x1f0] sm:$0xff]  ;;  %v6678_v62 = vsub.f32 %v1584_v8, %v1771_v31  ;;  %v6686_v14 = vsub.f32 %v1586_v63, %v1775_v18 }
 0x37d   :  { %8875 = vst [vmem:[#allocation79_spill] sm:$0xff] %v6601_v11  ;;  %8882 = vst [vmem:[#allocation83_spill] sm:$0xff] %v6619_v33  ;;  %v1767_v11 = vand.u32 4294901760, %v1582_v6  ;;  %5292 = vmatpush1.bf16.msra.mxu0 %v6619_v33  ;;  %4972 = vmatpush1.bf16.msra.mxu1 %v6619_v33  ;;  %v1777_v16 = vand.u32 4294901760, %v1585_v23  ;;  %v1781_v20 = vand.u32 4294901760, %v1587_v10  ;;  %v8889_v33 = vand.u32 4294901760, %v6526_v19 }
 0x37e   :  { %v6625_v45 = vpack.c.bf16 %v1773_v36, %v1769_v27  ;;  %8904 = vst [vmem:[#allocation99_spill] sm:$0xff] %v6678_v62  ;;  %v6680_v50 = vsub.f32 %v1581_v29, %v1769_v27  ;;  %v6684_v35 = vpack.c.bf16 %v1779_v32, %v1775_v18  ;;  %8908 = vst [vmem:[#allocation103_spill] sm:$0xff] %v6686_v14  ;;  %v1596_v27 = vld [vmem:[#allocation3 + $0x238] sm:$0xff]  ;;  %v1602_v14 = vld [vmem:[#allocation3 + $0x268] sm:$0xff] }
 0x37f   :  { %1414 = vbcast.lane.b32.xlu1 %v1400_v24, 280  ;;  %v6623_v40 = vpack.c.bf16 %v1771_v31, %v1767_v11  ;;  %v8885_v24 = vand.u32 4294901760, %v6519_v55  ;;  %v6643_v59 = vsub.f32 %v6526_v19, %v8889_v33  ;;  %v6664_v19 = vsub.f32 %v6557_v44, %v1757_v51  ;;  %v1624_v62 = vld [vmem:[#allocation3 + $0x318] sm:$0xff] }
 0x380   :  { %8884 = vst [vmem:[#allocation85_spill] sm:$0xff] %v6625_v45  ;;  %v6671_v33 = vsub.f32 %v1577_v57, %v1761_v56  ;;  %8905 = vst [vmem:[#allocation100_spill] sm:$0xff] %v6680_v50  ;;  %v6682_v44 = vsub.f32 %v1583_v53, %v1773_v36  ;;  %v6688_v26 = vsub.f32 %v1588_v38, %v1779_v32  ;;  %v8458_v32 = vand.u32 4294901760, %v6320_v58  ;;  %v1594_v53 = vld [vmem:[#allocation3 + $0x228] sm:$0xff]  ;;  %v1593_v38 = vld [vmem:[#allocation3 + $0x220] sm:$0xff] }
 0x381   :  { %8883 = vst [vmem:[#allocation84_spill] sm:$0xff] %v6623_v40  ;;  %5294 = vmatprep.subr.bf16.mxu0 %v6623_v40  ;;  %4974 = vmatprep.subr.bf16.mxu1 %v6623_v40  ;;  %v6633_v39 = vsub.f32 %v6519_v55, %v8885_v24  ;;  %8890 = vst [vmem:[#allocation88_spill] sm:$0xff] %v6643_v59  ;;  %v8893_v40 = vand.u32 4294901760, %v6548_v12  ;;  %v8895_v24 = vand.u32 4294901760, %v6550_v9 }
 0x382   :  { %8898 = vst [vmem:[#allocation93_spill] sm:$0xff] %v6664_v19  ;;  %5296 = vmatpush1.bf16.msra.mxu0 %v6625_v45  ;;  %8901 = vst [vmem:[#allocation96_spill] sm:$0xff] %v6671_v33  ;;  %4976 = vmatpush1.bf16.msra.mxu1 %v6625_v45  ;;  %v6692_v56 = vsub.f32 %v1585_v23, %v1777_v16  ;;  %v1815_v51 = vsub.f32 %v6320_v58, %v8458_v32  ;;  %v1591_v23 = vld [vmem:[#allocation3 + $0x210] sm:$0xff]  ;;  %v2963_v58 = vand.u32 4294901760, %v1602_v14 }
 0x383   :  { %8886 = vst [vmem:[#allocation86_spill] sm:$0xff] %v6633_v39  ;;  %v6653_v55 = vsub.f32 %v6548_v12, %v8893_v40  ;;  %v6658_v4 = vsub.f32 %v6550_v9, %v8895_v24  ;;  %v6673_v12 = vsub.f32 %v1579_v49, %v1765_v34  ;;  %v1590_v40 = vld [vmem:[#allocation3 + $0x208] sm:$0xff]  ;;  %v6676_v9 = vsub.f32 %v1582_v6, %v1767_v11  ;;  %v1599_v45 = vld [vmem:[#allocation3 + $0x250] sm:$0xff] }
 0x384   :  { %8906 = vst [vmem:[#allocation101_spill] sm:$0xff] %v6682_v44  ;;  %8907 = vst [vmem:[#allocation102_spill] sm:$0xff] %v6684_v35  ;;  %v6690_v34 = vpack.c.bf16 %v1781_v20, %v1777_v16  ;;  %v6694_v49 = vsub.f32 %v1587_v10, %v1781_v20  ;;  %v2939_v6 = vand.u32 4294901760, %v1590_v40  ;;  %5298 = vmatprep.subr.bf16.mxu0 %v6684_v35  ;;  %4978 = vmatprep.subr.bf16.mxu1 %v6684_v35  ;;  %v1589_v10 = vld [vmem:[#allocation3 + $0x200] sm:$0xff] }
 0x385   :  { %8894 = vst [vmem:[#allocation90_spill] sm:$0xff] %v6653_v55  ;;  %8896 = vst [vmem:[#allocation91_spill] sm:$0xff] %v6658_v4  ;;  %v1592_v55 = vld [vmem:[#allocation3 + $0x218] sm:$0xff]  ;;  %v8457_v16 = vand.u32 4294901760, %v6318_v54  ;;  %v1816_v11 = vand.u32 4294901760, %v1815_v51  ;;  %v2941_v36 = vand.u32 4294901760, %v1589_v10 }
 0x386   :  { %8902 = vst [vmem:[#allocation97_spill] sm:$0xff] %v6673_v12  ;;  %8903 = vst [vmem:[#allocation98_spill] sm:$0xff] %v6676_v9  ;;  %v2943_v57 = vand.u32 4294901760, %v1592_v55  ;;  %5300 = vmatpush1.bf16.msra.mxu0 %v6690_v34  ;;  %v6701_v8 = vsub.f32 %v1590_v40, %v2939_v6  ;;  %4980 = vmatpush1.bf16.msra.mxu1 %v6690_v34  ;;  %v2945_v63 = vand.u32 4294901760, %v1591_v23  ;;  %v2947_v24 = vand.u32 4294901760, %v1594_v53  ;;  %v1597_v35 = vld [vmem:[#allocation3 + $0x240] sm:$0xff] }
 0x387   :  { %8909 = vst [vmem:[#allocation104_spill] sm:$0xff] %v6688_v26  ;;  %8910 = vst [vmem:[#allocation105_spill] sm:$0xff] %v6690_v34  ;;  %v1803_v52 = vsub.f32 %v6318_v54, %v8457_v16  ;;  %v2951_v40 = vand.u32 4294901760, %v1596_v27  ;;  %v8474_v16 = vand.u32 4294901760, %v6322_v60  ;;  %v6719_v51 = vsub.f32 %v1589_v10, %v2941_v36 }
 0x388   :  { %8911 = vst [vmem:[#allocation106_spill] sm:$0xff] %v6692_v56  ;;  %8912 = vst [vmem:[#allocation107_spill] sm:$0xff] %v6694_v49  ;;  %v6699_v29 = vpack.c.bf16 %v2943_v57, %v2939_v6  ;;  %v6703_v31 = vsub.f32 %v1592_v55, %v2943_v57  ;;  %v1595_v55 = vld [vmem:[#allocation3 + $0x230] sm:$0xff]  ;;  %v1598_v6 = vld [vmem:[#allocation3 + $0x248] sm:$0xff]  ;;  %v6723_v54 = vsub.f32 %v1591_v23, %v2945_v63  ;;  %v8920_v10 = vand.u32 4294901760, %v6326_v28 }
 0x389   :  { %8914 = vst [vmem:[#allocation109_spill] sm:$0xff] %v6701_v8  ;;  %v1804_v20 = vand.u32 4294901760, %v1803_v52  ;;  %v1600_v57 = vld [vmem:[#allocation3 + $0x258] sm:$0xff]  ;;  %v6717_v52 = vpack.c.bf16 %v2945_v63, %v2941_v36  ;;  %8917 = vst [vmem:[#allocation112_spill] sm:$0xff] %v6719_v51  ;;  %v6725_v49 = vpack.c.bf16 %v2951_v40, %v2947_v24  ;;  %v1809_v32 = vsub.f32 %v6322_v60, %v8474_v16  ;;  %v1622_v8 = vld [vmem:[#allocation3 + $0x308] sm:$0xff] }
 0x38a   :  { %8913 = vst [vmem:[#allocation108_spill] sm:$0xff] %v6699_v29  ;;  %8915 = vst [vmem:[#allocation110_spill] sm:$0xff] %v6703_v31  ;;  %5302 = vmatprep.subr.bf16.mxu0 %v6699_v29  ;;  %v2959_v34 = vand.u32 4294901760, %v1600_v57  ;;  %v1821_v36 = vsub.f32 %v6326_v28, %v8920_v10  ;;  %v6733_v56 = vsub.f32 %v1594_v53, %v2947_v24  ;;  %v1604_v29 = vld [vmem:[#allocation3 + $0x278] sm:$0xff]  ;;  %v2957_v51 = vand.u32 4294901760, %v1597_v35 }
 0x38b   :  { %v4981_v18 = vpack.c.bf16 %v1816_v11, %v1804_v20  ;;  %8916 = vst [vmem:[#allocation111_spill] sm:$0xff] %v6717_v52  ;;  %v2949_v20 = vand.u32 4294901760, %v1593_v38  ;;  %v2953_v11 = vand.u32 4294901760, %v1595_v55  ;;  %8918 = vst [vmem:[#allocation113_spill] sm:$0xff] %v6723_v54  ;;  %v6735_v26 = vsub.f32 %v1596_v27, %v2951_v40 }
 0x38c   :  { %8919 = vst [vmem:[#allocation114_spill] sm:$0xff] %v6725_v49  ;;  %8921 = vst [vmem:[#allocation115_spill] sm:$0xff] %v6733_v56  ;;  %v2961_v16 = vand.u32 4294901760, %v1599_v45  ;;  %v8927_v53 = vand.u32 4294901760, %v6330_v41  ;;  %v8928_v24 = vand.u32 4294901760, %v6333_v46  ;;  %v1810_v10 = vand.u32 4294901760, %v1809_v32 }
 0x38d   :  { %4982 = vmatprep.subr.bf16.mxu1 %v4981_v18  ;;  %v2955_v18 = vand.u32 4294901760, %v1598_v6  ;;  %8922 = vst [vmem:[#allocation116_spill] sm:$0xff] %v6735_v26  ;;  %v6739_v63 = vpack.c.bf16 %v2953_v11, %v2949_v20  ;;  %v6741_v54 = vsub.f32 %v1593_v38, %v2949_v20  ;;  %v6743_v60 = vsub.f32 %v1595_v55, %v2953_v11 }
 0x38e   :  { %v1827_v27 = vsub.f32 %v6330_v41, %v8927_v53  ;;  %v1839_v40 = vsub.f32 %v6333_v46, %v8928_v24  ;;  %v1822_v23 = vand.u32 4294901760, %v1821_v36  ;;  %v2967_v28 = vand.u32 4294901760, %v1604_v29  ;;  %v1601_v41 = vld [vmem:[#allocation3 + $0x260] sm:$0xff]  ;;  %v1607_v36 = vld [vmem:[#allocation3 + $0x290] sm:$0xff] }
 0x38f   :  { %8923 = vst [vmem:[#allocation117_spill] sm:$0xff] %v6739_v63  ;;  %8924 = vst [vmem:[#allocation118_spill] sm:$0xff] %v6741_v54  ;;  %v6745_v44 = vpack.c.bf16 %v2959_v34, %v2955_v18  ;;  %v6753_v38 = vsub.f32 %v1598_v6, %v2955_v18  ;;  %v6755_v20 = vsub.f32 %v1600_v57, %v2959_v34  ;;  %v8931_v55 = vand.u32 4294901760, %v6341_v0  ;;  %v1603_v54 = vld [vmem:[#allocation3 + $0x270] sm:$0xff] }
 0x390   :  { %8925 = vst [vmem:[#allocation119_spill] sm:$0xff] %v6743_v60  ;;  %v8932_v60 = vand.u32 4294901760, %v6343_v5  ;;  %v6763_v26 = vpack.c.bf16 %v2961_v16, %v2957_v51  ;;  %v6765_v32 = vsub.f32 %v1597_v35, %v2957_v51  ;;  %v6769_v34 = vsub.f32 %v1599_v45, %v2961_v16 }
 0x391   :  { %8926 = vst [vmem:[#allocation120_spill] sm:$0xff] %v6745_v44  ;;  %8929 = vst [vmem:[#allocation121_spill] sm:$0xff] %v6753_v38  ;;  %v1833_v11 = vsub.f32 %v6341_v0, %v8931_v55  ;;  %v1828_v57 = vand.u32 4294901760, %v1827_v27  ;;  %v1840_v18 = vand.u32 4294901760, %v1839_v40  ;;  %v6771_v24 = vsub.f32 %v1602_v14, %v2963_v58  ;;  %v1606_v55 = vld [vmem:[#allocation3 + $0x288] sm:$0xff]  ;;  %v1605_v40 = vld [vmem:[#allocation3 + $0x280] sm:$0xff] }
 0x392   :  { %8930 = vst [vmem:[#allocation122_spill] sm:$0xff] %v6755_v20  ;;  %v1845_v53 = vsub.f32 %v6343_v5, %v8932_v60  ;;  %8933 = vst [vmem:[#allocation123_spill] sm:$0xff] %v6763_v26  ;;  %v6773_v0 = vpack.c.bf16 %v1822_v23, %v1810_v10  ;;  %v6775_v60 = vpack.c.bf16 %v2967_v28, %v2963_v58  ;;  %v2965_v5 = vand.u32 4294901760, %v1601_v41  ;;  %v1608_v20 = vld [vmem:[#allocation3 + $0x298] sm:$0xff] }
 0x393   :  { %8934 = vst [vmem:[#allocation124_spill] sm:$0xff] %v6765_v32  ;;  %8935 = vst [vmem:[#allocation125_spill] sm:$0xff] %v6769_v34  ;;  %v2969_v46 = vand.u32 4294901760, %v1603_v54  ;;  %v1834_v35 = vand.u32 4294901760, %v1833_v11  ;;  %v6779_v45 = vsub.f32 %v1604_v29, %v2967_v28  ;;  %v8939_v16 = vand.u32 4294901760, %v6345_v7  ;;  %v1613_v34 = vld [vmem:[#allocation3 + $0x2c0] sm:$0xff] }
 0x394   :  { %8936 = vst [vmem:[#allocation126_spill] sm:$0xff] %v6771_v24  ;;  %8937 = vst [vmem:[#allocation127_spill] sm:$0xff] %v6775_v60  ;;  %v1846_v51 = vand.u32 4294901760, %v1845_v53  ;;  %v8940_v23 = vand.u32 4294901760, %v6349_v21  ;;  %v2971_v27 = vand.u32 4294901760, %v1606_v55  ;;  %v6787_v10 = vpack.c.bf16 %v1840_v18, %v1828_v57  ;;  %v1615_v32 = vld [vmem:[#allocation3 + $0x2d0] sm:$0xff] }
 0x395   :  { %8938 = vst [vmem:[#allocation128_spill] sm:$0xff] %v6779_v45  ;;  %v1851_v14 = vsub.f32 %v6345_v7, %v8939_v16  ;;  %v6789_v11 = vsub.f32 %v1601_v41, %v2965_v5  ;;  %v2975_v53 = vand.u32 4294901760, %v1608_v20  ;;  %v6792_v28 = vpack.c.bf16 %v2969_v46, %v2965_v5 }
 0x396   :  { %v1863_v58 = vsub.f32 %v6349_v21, %v8940_v23  ;;  %v6794_v29 = vsub.f32 %v1603_v54, %v2969_v46  ;;  %v6796_v45 = vsub.f32 %v1606_v55, %v2971_v27  ;;  %v6799_v7 = vpack.c.bf16 %v1846_v51, %v1834_v35  ;;  %v1610_v54 = vld [vmem:[#allocation3 + $0x2a8] sm:$0xff]  ;;  %v1612_v46 = vld [vmem:[#allocation3 + $0x2b8] sm:$0xff] }
 0x397   :  { %8941 = vst [vmem:[#allocation129_spill] sm:$0xff] %v6789_v11  ;;  %8942 = vst [vmem:[#allocation130_spill] sm:$0xff] %v6792_v28  ;;  %v8945_v23 = vand.u32 4294901760, %v6353_v43  ;;  %v8946_v41 = vand.u32 4294901760, %v6356_v47  ;;  %v2973_v21 = vand.u32 4294901760, %v1605_v40  ;;  %v1852_v6 = vand.u32 4294901760, %v1851_v14 }
 0x398   :  { %8943 = vst [vmem:[#allocation131_spill] sm:$0xff] %v6794_v29  ;;  %8944 = vst [vmem:[#allocation132_spill] sm:$0xff] %v6796_v45  ;;  %v1864_v5 = vand.u32 4294901760, %v1863_v58  ;;  %v2977_v11 = vand.u32 4294901760, %v1607_v36  ;;  %v6808_v45 = vpack.c.bf16 %v2975_v53, %v2971_v27  ;;  %v6810_v35 = vsub.f32 %v1608_v20, %v2975_v53  ;;  %v1611_v29 = vld [vmem:[#allocation3 + $0x2b0] sm:$0xff] }
 0x399   :  { %v1857_v57 = vsub.f32 %v6353_v43, %v8945_v23  ;;  %v1869_v18 = vsub.f32 %v6356_v47, %v8946_v41  ;;  %v8949_v51 = vand.u32 4294901760, %v6358_v3  ;;  %v6816_v43 = vsub.f32 %v1605_v40, %v2973_v21  ;;  %v1609_v41 = vld [vmem:[#allocation3 + $0x2a0] sm:$0xff]  ;;  %v1614_v47 = vld [vmem:[#allocation3 + $0x2c8] sm:$0xff] }
 0x39a   :  { %8947 = vst [vmem:[#allocation133_spill] sm:$0xff] %v6808_v45  ;;  %8948 = vst [vmem:[#allocation134_spill] sm:$0xff] %v6810_v35  ;;  %v8951_v14 = vand.u32 4294901760, %v6365_v25  ;;  %v2979_v53 = vand.u32 4294901760, %v1610_v54  ;;  %v2983_v35 = vand.u32 4294901760, %v1612_v46  ;;  %v6823_v24 = vpack.c.bf16 %v1864_v5, %v1852_v6 }
 0x39b   :  { %v1875_v23 = vsub.f32 %v6358_v3, %v8949_v51  ;;  %8950 = vst [vmem:[#allocation135_spill] sm:$0xff] %v6816_v43  ;;  %v1858_v55 = vand.u32 4294901760, %v1857_v57  ;;  %v1870_v20 = vand.u32 4294901760, %v1869_v18  ;;  %v6825_v51 = vpack.c.bf16 %v2977_v11, %v2973_v21 }
 0x39c   :  { %v1887_v58 = vsub.f32 %v6365_v25, %v8951_v14  ;;  %v6827_v40 = vsub.f32 %v1607_v36, %v2977_v11  ;;  %v8954_v16 = vand.u32 4294901760, %v6367_v30  ;;  %v6832_v3 = vsub.f32 %v1610_v54, %v2979_v53 }
 0x39d   :  { %8952 = vst [vmem:[#allocation136_spill] sm:$0xff] %v6825_v51  ;;  %v1876_v25 = vand.u32 4294901760, %v1875_v23  ;;  %v8956_v27 = vand.u32 4294901760, %v6370_v17  ;;  %v2981_v18 = vand.u32 4294901760, %v1609_v41  ;;  %v2985_v6 = vand.u32 4294901760, %v1611_v29 }
 0x39e   :  { %8953 = vst [vmem:[#allocation137_spill] sm:$0xff] %v6827_v40  ;;  %v1881_v14 = vsub.f32 %v6367_v30, %v8954_v16  ;;  %8955 = vst [vmem:[#allocation138_spill] sm:$0xff] %v6832_v3  ;;  %v1888_v43 = vand.u32 4294901760, %v1887_v58  ;;  %v8957_v21 = vand.u32 4294901760, %v6372_v22  ;;  %v8958_v11 = vand.u32 4294901760, %v6374_v37  ;;  %v1616_v16 = vld [vmem:[#allocation3 + $0x2d8] sm:$0xff] }
 0x39f   :  { %v1893_v57 = vsub.f32 %v6370_v17, %v8956_v27  ;;  %v6843_v23 = vpack.c.bf16 %v1870_v20, %v1858_v55  ;;  %v6845_v54 = vpack.c.bf16 %v2983_v35, %v2979_v53  ;;  %v6847_v30 = vsub.f32 %v1612_v46, %v2983_v35  ;;  %v8963_v55 = vld [vmem:[#allocation40_spill] sm:$0xff]  ;;  %v1618_v3 = vld [vmem:[#allocation3 + $0x2e8] sm:$0xff]  ;;  %v8968_v40 = vld [vmem:[#allocation41_spill] sm:$0xff] }
 0x3a0   :  { %v1899_v36 = vsub.f32 %v6372_v22, %v8957_v21  ;;  %v1911_v5 = vsub.f32 %v6374_v37, %v8958_v11  ;;  %v6849_v27 = vsub.f32 %v1609_v41, %v2981_v18  ;;  %v1882_v17 = vand.u32 4294901760, %v1881_v14  ;;  %v8962_v11 = vld [vmem:[#allocation39_spill] sm:$0xff] }
 0x3a1   :  { %8959 = vst [vmem:[#allocation139_spill] sm:$0xff] %v6845_v54  ;;  %8960 = vst [vmem:[#allocation140_spill] sm:$0xff] %v6847_v30  ;;  %v2987_v58 = vand.u32 4294901760, %v1614_v47  ;;  %v1894_v21 = vand.u32 4294901760, %v1893_v57  ;;  %v2991_v22 = vand.u32 4294901760, %v1616_v16  ;;  %v8534_v20 = vand.u32 4294901760, %v8963_v55 }
 0x3a2   :  { %8961 = vst [vmem:[#allocation141_spill] sm:$0xff] %v6849_v27  ;;  %v6855_v53 = vpack.c.bf16 %v1888_v43, %v1876_v25  ;;  %v6857_v46 = vpack.c.bf16 %v2985_v6, %v2981_v18  ;;  %v1900_v35 = vand.u32 4294901760, %v1899_v36  ;;  %v1912_v41 = vand.u32 4294901760, %v1911_v5  ;;  %v8969_v30 = vld [vmem:[#allocation42_spill] sm:$0xff]  ;;  %v1620_v57 = vld [vmem:[#allocation3 + $0x2f8] sm:$0xff] }
 0x3a3   :  { %v6859_v14 = vsub.f32 %v1611_v29, %v2985_v6  ;;  %v6861_v27 = vsub.f32 %v1614_v47, %v2987_v58  ;;  %v8970_v56 = vand.u32 4294901760, %v6376_v13  ;;  %v8971_v43 = vand.u32 4294901760, %v6378_v48 }
 0x3a4   :  { %8964 = vst [vmem:[#allocation142_spill] sm:$0xff] %v6855_v53  ;;  %8965 = vst [vmem:[#allocation143_spill] sm:$0xff] %v6857_v46  ;;  %v2989_v18 = vand.u32 4294901760, %v1613_v34  ;;  %v2993_v36 = vand.u32 4294901760, %v1615_v32  ;;  %v6871_v5 = vpack.c.bf16 %v1894_v21, %v1882_v17  ;;  %v6873_v29 = vpack.c.bf16 %v2991_v22, %v2987_v58  ;;  %v1617_v17 = vld [vmem:[#allocation3 + $0x2e0] sm:$0xff]  ;;  %v1619_v21 = vld [vmem:[#allocation3 + $0x2f0] sm:$0xff] }
 0x3a5   :  { %8966 = vst [vmem:[#allocation144_spill] sm:$0xff] %v6859_v14  ;;  %8967 = vst [vmem:[#allocation145_spill] sm:$0xff] %v6861_v27  ;;  %v1905_v37 = vsub.f32 %v6376_v13, %v8970_v56  ;;  %v1917_v25 = vsub.f32 %v6378_v48, %v8971_v43  ;;  %v8974_v47 = vand.u32 4294901760, %v8962_v11  ;;  %v1935_v38 = vsub.f32 %v8963_v55, %v8534_v20  ;;  %v8980_v14 = vld [vmem:[#allocation43_spill] sm:$0xff]  ;;  %v8981_v55 = vld [vmem:[#allocation45_spill] sm:$0xff] }
 0x3a6   :  { %8972 = vst [vmem:[#allocation146_spill] sm:$0xff] %v6871_v5  ;;  %8973 = vst [vmem:[#allocation147_spill] sm:$0xff] %v6873_v29  ;;  %v6881_v56 = vpack.c.bf16 %v1912_v41, %v1900_v35  ;;  %v6883_v13 = vsub.f32 %v1616_v16, %v2991_v22  ;;  %v6885_v43 = vsub.f32 %v1613_v34, %v2989_v18  ;;  %v2995_v48 = vand.u32 4294901760, %v1618_v3  ;;  %v8986_v20 = vld [vmem:[#allocation48_spill] sm:$0xff] }
 0x3a7   :  { %v1923_v6 = vsub.f32 %v8962_v11, %v8974_v47  ;;  %v8978_v58 = vand.u32 4294901760, %v8968_v40  ;;  %v8979_v47 = vand.u32 4294901760, %v8969_v30  ;;  %v1906_v41 = vand.u32 4294901760, %v1905_v37  ;;  %v1632_v5 = vld [vmem:[#allocation3 + $0x358] sm:$0xff] }
 0x3a8   :  { %8975 = vst [vmem:[#allocation148_spill] sm:$0xff] %v6881_v56  ;;  %8976 = vst [vmem:[#allocation149_spill] sm:$0xff] %v6883_v13  ;;  %v1918_v22 = vand.u32 4294901760, %v1917_v25  ;;  %v6895_v16 = vpack.c.bf16 %v2993_v36, %v2989_v18  ;;  %v2999_v34 = vand.u32 4294901760, %v1620_v57  ;;  %v1936_v13 = vand.u32 4294901760, %v1935_v38 }
 0x3a9   :  { %8977 = vst [vmem:[#allocation150_spill] sm:$0xff] %v6885_v43  ;;  %v1929_v27 = vsub.f32 %v8968_v40, %v8978_v58  ;;  %v1941_v11 = vsub.f32 %v8969_v30, %v8979_v47  ;;  %v1924_v43 = vand.u32 4294901760, %v1923_v6  ;;  %v2997_v50 = vand.u32 4294901760, %v1617_v17  ;;  %v8985_v47 = vld [vmem:[#allocation46_spill] sm:$0xff] }
 0x3aa   :  { %8982 = vst [vmem:[#allocation151_spill] sm:$0xff] %v6895_v16  ;;  %v3001_v31 = vand.u32 4294901760, %v1619_v21  ;;  %v6897_v58 = vsub.f32 %v1615_v32, %v2993_v36  ;;  %v6899_v40 = vsub.f32 %v1618_v3, %v2995_v48  ;;  %v8987_v25 = vand.u32 4294901760, %v8980_v14 }
 0x3ab   :  { %v1930_v35 = vand.u32 4294901760, %v1929_v27  ;;  %v1942_v37 = vand.u32 4294901760, %v1941_v11  ;;  %v8988_v38 = vand.u32 4294901760, %v8981_v55  ;;  %v6909_v12 = vpack.c.bf16 %v1918_v22, %v1906_v41 }
 0x3ac   :  { %8983 = vst [vmem:[#allocation152_spill] sm:$0xff] %v6897_v58  ;;  %8984 = vst [vmem:[#allocation153_spill] sm:$0xff] %v6899_v40  ;;  %v1947_v18 = vsub.f32 %v8980_v14, %v8987_v25  ;;  %v6911_v32 = vpack.c.bf16 %v2999_v34, %v2995_v48  ;;  %v3003_v3 = vand.u32 4294901760, %v1622_v8  ;;  %v3007_v36 = vand.u32 4294901760, %v1624_v62  ;;  %v1621_v40 = vld [vmem:[#allocation3 + $0x300] sm:$0xff]  ;;  %v1623_v14 = vld [vmem:[#allocation3 + $0x310] sm:$0xff] }
 0x3ad   :  { %v1959_v6 = vsub.f32 %v8981_v55, %v8988_v38  ;;  %8989 = vst [vmem:[#allocation154_spill] sm:$0xff] %v6909_v12  ;;  %v6913_v9 = vpack.c.bf16 %v1936_v13, %v1924_v43  ;;  %v6915_v27 = vsub.f32 %v1620_v57, %v2999_v34  ;;  %v6917_v11 = vpack.c.bf16 %v3001_v31, %v2997_v50 }
 0x3ae   :  { %8990 = vst [vmem:[#allocation155_spill] sm:$0xff] %v6911_v32  ;;  %v6919_v25 = vsub.f32 %v1617_v17, %v2997_v50  ;;  %v6921_v33 = vsub.f32 %v1619_v21, %v3001_v31  ;;  %v6923_v41 = vsub.f32 %v1622_v8, %v3003_v3  ;;  %v8997_v48 = vand.u32 4294901760, %v8985_v47  ;;  %v9001_v31 = vld [vmem:[#allocation54_spill] sm:$0xff]  ;;  %v9002_v8 = vld [vmem:[#allocation55_spill] sm:$0xff] }
 0x3af   :  { %8991 = vst [vmem:[#allocation156_spill] sm:$0xff] %v6913_v9  ;;  %8992 = vst [vmem:[#allocation157_spill] sm:$0xff] %v6915_v27  ;;  %v8998_v38 = vand.u32 4294901760, %v8986_v20  ;;  %v6931_v43 = vpack.c.bf16 %v1942_v37, %v1930_v35  ;;  %v1948_v57 = vand.u32 4294901760, %v1947_v18  ;;  %v1960_v34 = vand.u32 4294901760, %v1959_v6  ;;  %v5750_v35 = vld [vmem:[%s8375_s0 + $0x18] sm:$0xff] }
 0x3b0   :  { %8993 = vst [vmem:[#allocation158_spill] sm:$0xff] %v6917_v11  ;;  %8994 = vst [vmem:[#allocation159_spill] sm:$0xff] %v6919_v25  ;;  %v1953_v22 = vsub.f32 %v8985_v47, %v8997_v48  ;;  %v3005_v55 = vand.u32 4294901760, %v1621_v40  ;;  %v6933_v50 = vpack.c.bf16 %v3007_v36, %v3003_v3  ;;  %v3009_v17 = vand.u32 4294901760, %v1623_v14  ;;  %v5749_v48 = vld [vmem:[%s8375_s0 + $0x10] sm:$0xff]  ;;  %v5751_v18 = vld [vmem:[%s8375_s0] sm:$0xff] }
 0x3b1   :  { %8995 = vst [vmem:[#allocation160_spill] sm:$0xff] %v6921_v33  ;;  %8996 = vst [vmem:[#allocation161_spill] sm:$0xff] %v6923_v41  ;;  %v1965_v13 = vsub.f32 %v8986_v20, %v8998_v38  ;;  %v6937_v33 = vld [vmem:[#allocation3 + $0x328] sm:$0xff]  ;;  %v6959_v21 = vsub.f32 %v1624_v62, %v3007_v36  ;;  %v6975_v62 = vpack.c.bf16 %v1960_v34, %v1948_v57 }
 0x3b2   :  { %8999 = vst [vmem:[#allocation162_spill] sm:$0xff] %v6931_v43  ;;  %9000 = vst [vmem:[#allocation163_spill] sm:$0xff] %v6933_v50  ;;  %v5752_v3 = vld [vmem:[%s8375_s0 + $0x8] sm:$0xff]  ;;  %v1954_v20 = vand.u32 4294901760, %v1953_v22  ;;  %v3011_v36 = vand.u32 4294901760, %v6937_v33  ;;  %v6980_v22 = vsub.f32 %v1623_v14, %v3009_v17 }
 0x3b3   :  { %9007 = vst [vmem:[#allocation168_spill] sm:$0xff] %v6959_v21  ;;  %v1966_v25 = vand.u32 4294901760, %v1965_v13  ;;  %9011 = vst [vmem:[#allocation172_spill] sm:$0xff] %v6975_v62  ;;  %v9014_v13 = vand.u32 4294901760, %v9001_v31 }
 0x3b4   :  { %9013 = vst [vmem:[#allocation174_spill] sm:$0xff] %v6980_v22 }
 0x3b5   :  { %v7011_v22 = vpack.c.bf16 %v1966_v25, %v1954_v20  ;;  %v5758_v20 = vld [vmem:[%s8375_s0 + $0x58] sm:$0xff] }
 0x3b7   :  { %9018 = vst [vmem:[#allocation177_spill] sm:$0xff] %v7011_v22 }
 0x3e1   :  { %v1388_v30 = vpop.permute.xlu1 %1387  ;;  %v1384_v58 = vpop.permute.xlu0 %1383 }
 0x3e2   :  { %v6942_v47 = vmul.f32 %v5749_v48, %v1388_v30  ;;  %v6947_v37 = vmul.f32 %v5750_v35, %v1388_v30  ;;  %v6952_v6 = vmul.f32 %v5751_v18, %v1384_v58  ;;  %v6957_v38 = vmul.f32 %v5752_v3, %v1384_v58  ;;  %v6963_v35 = vld [vmem:[#allocation3 + $0x338] sm:$0xff]  ;;  %v5753_v18 = vld [vmem:[%s8375_s0 + $0x20] sm:$0xff]  ;;  %v5754_v58 = vld [vmem:[%s8375_s0 + $0x28] sm:$0xff] }
 0x3e3   :  { %v6961_v30 = vsub.f32 %v1621_v40, %v3005_v55  ;;  %v6978_v40 = vpack.c.bf16 %v3009_v17, %v3005_v55  ;;  %v3015_v17 = vand.u32 4294901760, %v6963_v35 }
 0x3e4   :  { %9003 = vst [vmem:[#allocation164_spill] sm:$0xff] %v6942_v47  ;;  %9004 = vst [vmem:[#allocation165_spill] sm:$0xff] %v6947_v37  ;;  %v1441_v57 = vadd.f32 %v6947_v37, %v6957_v38  ;;  %v1482_v55 = vmax.f32 %v6957_v38, %v6947_v37  ;;  %v7014_v37 = vsub.f32 %v6937_v33, %v3011_v36  ;;  %v9022_v33 = vld [vmem:[#allocation56_spill] sm:$0xff] }
 0x3e5   :  { %9005 = vst [vmem:[#allocation166_spill] sm:$0xff] %v6952_v6  ;;  %9006 = vst [vmem:[#allocation167_spill] sm:$0xff] %v6957_v38  ;;  %v1403_v48 = vpop.permute.xlu1 %1402  ;;  %v1392_v41 = vpop.permute.xlu0 %1391  ;;  %v7063_v32 = vpack.c.bf16 %v3015_v17, %v3011_v36 }
 0x3e6   :  { %9008 = vst [vmem:[#allocation169_spill] sm:$0xff] %v6961_v30  ;;  %v6968_v27 = vmul.f32 %v5753_v18, %v1392_v41  ;;  %v6973_v3 = vmul.f32 %v5754_v58, %v1392_v41  ;;  %9012 = vst [vmem:[#allocation173_spill] sm:$0xff] %v6978_v40  ;;  %v6985_v30 = vsub.f32 %v9001_v31, %v9014_v13  ;;  %v9015_v18 = vand.u32 4294901760, %v9002_v8  ;;  %v6999_v58 = vld [vmem:[#allocation3 + $0x320] sm:$0xff]  ;;  %v5755_v13 = vld [vmem:[%s8375_s0 + $0x30] sm:$0xff] }
 0x3e7   :  { %v1432_v41 = vadd.f32 %v6942_v47, %v6952_v6  ;;  %9019 = vst [vmem:[#allocation178_spill] sm:$0xff] %v7014_v37  ;;  %9028 = vst [vmem:[#allocation185_spill] sm:$0xff] %v7063_v32 }
 0x3e8   :  { %9009 = vst [vmem:[#allocation170_spill] sm:$0xff] %v6968_v27  ;;  %9010 = vst [vmem:[#allocation171_spill] sm:$0xff] %v6973_v3  ;;  %v6990_v21 = vsub.f32 %v9002_v8, %v9015_v18  ;;  %v5756_v8 = vld [vmem:[%s8375_s0 + $0x38] sm:$0xff]  ;;  %v1442_v40 = vadd.f32 %v1441_v57, %v6973_v3  ;;  %v1483_v50 = vmax.f32 %v1482_v55, %v6973_v3  ;;  %v5759_v55 = vld [vmem:[%s8375_s0 + $0x40] sm:$0xff] }
 0x3e9   :  { %v1407_v14 = vpop.permute.xlu1 %1406  ;;  %v1396_v34 = vpop.permute.xlu0 %1395  ;;  %v1433_v38 = vadd.f32 %v1432_v41, %v6968_v27  ;;  %v7035_v3 = vmul.f32 %v5759_v55, %v1403_v48  ;;  %v5761_v57 = vld [vmem:[%s8375_s0 + $0x60] sm:$0xff] }
 0x3ea   :  { %v7004_v18 = vmul.f32 %v5755_v13, %v1396_v34  ;;  %v7009_v31 = vmul.f32 %v5756_v8, %v1396_v34  ;;  %v5757_v13 = vld [vmem:[%s8375_s0 + $0x50] sm:$0xff]  ;;  %v7027_v25 = vmul.f32 %v5758_v20, %v1407_v14  ;;  %v9023_v34 = vld [vmem:[#allocation57_spill] sm:$0xff]  ;;  %v5760_v20 = vld [vmem:[%s8375_s0 + $0x48] sm:$0xff]  ;;  %v1984_v43 = vand.u32 4294901760, %v6990_v21 }
 0x3eb   :  { %v7022_v62 = vmul.f32 %v5757_v13, %v1407_v14  ;;  %9024 = vst [vmem:[#allocation181_spill] sm:$0xff] %v7035_v3  ;;  %v7043_v41 = vmul.f32 %v5760_v20, %v1403_v48  ;;  %v5764_v21 = vld [vmem:[%s8375_s0 + $0x78] sm:$0xff] }
 0x3ec   :  { %9016 = vst [vmem:[#allocation175_spill] sm:$0xff] %v7004_v18  ;;  %9017 = vst [vmem:[#allocation176_spill] sm:$0xff] %v7009_v31  ;;  %v1434_v13 = vadd.f32 %v1433_v38, %v7004_v18  ;;  %v1443_v37 = vadd.f32 %v1442_v40, %v7009_v31  ;;  %v1484_v22 = vmax.f32 %v1483_v50, %v7009_v31  ;;  %v5762_v38 = vld [vmem:[%s8375_s0 + $0x68] sm:$0xff]  ;;  %v1972_v50 = vand.u32 4294901760, %v6985_v30 }
 0x3ed   :  { %9020 = vst [vmem:[#allocation179_spill] sm:$0xff] %v7022_v62  ;;  %9021 = vst [vmem:[#allocation180_spill] sm:$0xff] %v7027_v25  ;;  %v1411_v14 = vpop.permute.xlu1 %1410  ;;  %v1450_v55 = vadd.f32 %v7022_v62, %v7035_v3  ;;  %v1459_v11 = vadd.f32 %v7027_v25, %v7043_v41 }
 0x3ee   :  { %9025 = vst [vmem:[#allocation182_spill] sm:$0xff] %v7043_v41  ;;  %v7048_v8 = vmul.f32 %v5761_v57, %v1411_v14  ;;  %v7053_v40 = vmul.f32 %v5762_v38, %v1411_v14  ;;  %v1435_v31 = vrot.slane %v1434_v13, 4  ;;  %v1444_v48 = vrot.slane %v1443_v37, 4 }
 0x3ef   :  { %v1485_v20 = vrot.slane %v1484_v22, 4  ;;  %v1500_v57 = vmax.f32 %v7043_v41, %v7027_v25  ;;  %v7095_v32 = vpack.c.bf16 %v1984_v43, %v1972_v50 }
 0x3f0   :  { %9026 = vst [vmem:[#allocation183_spill] sm:$0xff] %v7048_v8  ;;  %9027 = vst [vmem:[#allocation184_spill] sm:$0xff] %v7053_v40  ;;  %v1436_v14 = vadd.f32 %v1435_v31, %v1434_v13  ;;  %v1445_v38 = vadd.f32 %v1444_v48, %v1443_v37  ;;  %v1451_v30 = vadd.f32 %v1450_v55, %v7048_v8  ;;  %v1627_v37 = vld [vmem:[#allocation3 + $0x330] sm:$0xff] }
 0x3f1   :  { %v1486_v9 = vmax.f32 %v1484_v22, %v1485_v20  ;;  %v1415_v16 = vpop.permute.xlu1 %1414  ;;  %v1460_v12 = vadd.f32 %v1459_v11, %v7053_v40  ;;  %v1501_v15 = vmax.f32 %v1500_v57, %v7053_v40  ;;  %v7079_v13 = vsub.f32 %v6963_v35, %v3015_v17  ;;  %v1630_v40 = vld [vmem:[#allocation3 + $0x348] sm:$0xff]  ;;  %9036 = vst [vmem:[#allocation190_spill] sm:$0xff] %v7095_v32 }
 0x3f2   :  { %v7071_v29 = vmul.f32 %v5763_v1, %v1415_v16  ;;  %v7076_v31 = vmul.f32 %v5764_v21, %v1415_v16  ;;  %v1437_v36 = vrot.slane %v1436_v14, 2  ;;  %v1446_v22 = vrot.slane %v1445_v38, 2 }
 0x3f3   :  { %9031 = vst [vmem:[#allocation188_spill] sm:$0xff] %v7079_v13  ;;  %v9032_v11 = vand.u32 4294901760, %v9022_v33  ;;  %v1487_v48 = vrot.slane %v1486_v9, 2  ;;  %v9033_v21 = vand.u32 4294901760, %v9023_v34  ;;  %v3017_v41 = vand.u32 4294901760, %v1627_v37 }
 0x3f4   :  { %9029 = vst [vmem:[#allocation186_spill] sm:$0xff] %v7071_v29  ;;  %9030 = vst [vmem:[#allocation187_spill] sm:$0xff] %v7076_v31  ;;  %v1452_v1 = vadd.f32 %v1451_v30, %v7071_v29  ;;  %v1461_v20 = vadd.f32 %v1460_v12, %v7076_v31  ;;  %v1502_v57 = vmax.f32 %v1501_v15, %v7076_v31  ;;  %v9034_v35 = vand.u32 4294901760, %v6999_v58  ;;  %v9037_v12 = vld [vmem:[#allocation61_spill] sm:$0xff]  ;;  %v9038_v31 = vld [vmem:[#allocation62_spill] sm:$0xff] }
 0x3f5   :  { %v1977_v55 = vsub.f32 %v9022_v33, %v9032_v11  ;;  %v1438_v16 = vadd.f32 %v1437_v36, %v1436_v14  ;;  %v1989_v25 = vsub.f32 %v9023_v34, %v9033_v21  ;;  %v1447_v11 = vadd.f32 %v1446_v22, %v1445_v38 }
 0x3f6   :  { %v7093_v17 = vsub.f32 %v6999_v58, %v9034_v35  ;;  %v1453_v33 = vrot.slane %v1452_v1, 4  ;;  %v1462_v13 = vrot.slane %v1461_v20, 4  ;;  %v1503_v30 = vrot.slane %v1502_v57, 4 }
 0x3f7   :  { %v3019_v36 = vand.u32 4294901760, %v1630_v40  ;;  %v1488_v56 = vmax.f32 %v1486_v9, %v1487_v48  ;;  %v1439_v19 = vrot.slane %v1438_v16, 1  ;;  %v1978_v61 = vand.u32 4294901760, %v1977_v55 }
 0x3f8   :  { %9035 = vst [vmem:[#allocation189_spill] sm:$0xff] %v7093_v17  ;;  %v1454_v46 = vadd.f32 %v1453_v33, %v1452_v1  ;;  %v1463_v21 = vadd.f32 %v1462_v13, %v1461_v20  ;;  %v1504_v34 = vmax.f32 %v1502_v57, %v1503_v30  ;;  %v1990_v35 = vand.u32 4294901760, %v1989_v25  ;;  %v1629_v20 = vld [vmem:[#allocation3 + $0x340] sm:$0xff] }
 0x3f9   :  { %v9039_v38 = vand.u32 4294901760, %v6999_v58  ;;  %v1448_v17 = vrot.slane %v1447_v11, 1  ;;  %v7103_v15 = vsub.f32 %v1627_v37, %v3017_v41  ;;  %v9042_v14 = vand.u32 4294901760, %v9037_v12 }
 0x3fa   :  { %v1455_v43 = vrot.slane %v1454_v46, 2  ;;  %v1464_v50 = vrot.slane %v1463_v21, 2  ;;  %v1505_v32 = vrot.slane %v1504_v34, 2  ;;  %v9043_v33 = vand.u32 4294901760, %v9038_v31 }
 0x3fb   :  { %v7101_v22 = vpack.c.bf16 %v3017_v41, %v9039_v38  ;;  %9041 = vst [vmem:[#allocation192_spill] sm:$0xff] %v7103_v15  ;;  %v1995_v9 = vsub.f32 %v9037_v12, %v9042_v14  ;;  %v3023_v55 = vand.u32 4294901760, %v1632_v5  ;;  %v1489_v25 = vrot.slane %v1488_v56, 1  ;;  %v9045_v41 = vld [vmem:[#allocation63_spill] sm:$0xff] }
 0x3fc   :  { %v2007_v13 = vsub.f32 %v9038_v31, %v9043_v33  ;;  %v1456_v48 = vadd.f32 %v1455_v43, %v1454_v46  ;;  %v1465_v58 = vadd.f32 %v1464_v50, %v1463_v21  ;;  %v1506_v1 = vmax.f32 %v1504_v34, %v1505_v32  ;;  %v9046_v33 = vld [vmem:[#allocation64_spill] sm:$0xff] }
 0x3fd   :  { %9040 = vst [vmem:[#allocation191_spill] sm:$0xff] %v7101_v22  ;;  %v1440_v57 = vadd.f32 %v1439_v19, %v1438_v16  ;;  %v7111_v30 = vpack.c.bf16 %v1990_v35, %v1978_v61  ;;  %v7113_v38 = vsub.f32 %v1630_v40, %v3019_v36  ;;  %v1449_v15 = vadd.f32 %v1448_v17, %v1447_v11  ;;  %v1631_v40 = vld [vmem:[#allocation3 + $0x350] sm:$0xff]  ;;  %v9049_v43 = vld [vmem:[#allocation76_spill] sm:$0xff] }
 0x3fe   :  { %v1457_v22 = vrot.slane %v1456_v48, 1  ;;  %v1466_v14 = vrot.slane %v1465_v58, 1  ;;  %v1507_v12 = vrot.slane %v1506_v1, 1  ;;  %v1996_v4 = vand.u32 4294901760, %v1995_v9  ;;  %v9048_v16 = vld [vmem:[#allocation75_spill] sm:$0xff] }
 0x3ff   :  { %9044 = vst [vmem:[#allocation193_spill] sm:$0xff] %v7113_v38  ;;  %v2008_v54 = vand.u32 4294901760, %v2007_v13  ;;  %v3021_v53 = vand.u32 4294901760, %v1629_v20  ;;  %v1490_v46 = vmax.f32 %v1488_v56, %v1489_v25  ;;  %v1469_v19 = vmul.f32 0.03125, %v1440_v57  ;;  %v1634_v25 = vld [vmem:[#allocation3 + $0x368] sm:$0xff] }
 0x400   :  { %v1458_v21 = vadd.f32 %v1457_v22, %v1456_v48  ;;  %v1467_v32 = vadd.f32 %v1466_v14, %v1465_v58  ;;  %v1508_v34 = vmax.f32 %v1506_v1, %v1507_v12  ;;  %v7117_v61 = vpack.c.bf16 %v3023_v55, %v3019_v36 }
 0x401   :  { %v8594_v35 = vand.u32 4294901760, %v9048_v16  ;;  %v8593_v17 = vand.u32 4294901760, %v9049_v43  ;;  %v1470_v11 = vmul.f32 0.03125, %v1449_v15  ;;  %v7124_v31 = vsub.f32 %v1632_v5, %v3023_v55 }
 0x402   :  { %9047 = vst [vmem:[#allocation194_spill] sm:$0xff] %v7117_v61  ;;  %v1471_v50 = vmul.f32 0.03125, %v1458_v21  ;;  %v1472_v37 = vmul.f32 0.03125, %v1467_v32  ;;  %v1522_v9 = vsel %vm163_vm4, %v1508_v34, %v1490_v46  ;;  %v9052_v56 = vand.u32 4294901760, %v9045_v41  ;;  %v1636_v46 = vld [vmem:[#allocation3 + $0x378] sm:$0xff]  ;;  %v9058_v32 = vld [vmem:[#allocation77_spill] sm:$0xff] }
 0x403   :  { %v7122_v13 = vand.u32 4294901760, %v1522_v9  ;;  %9051 = vst [vmem:[#allocation196_spill] sm:$0xff] %v7124_v31  ;;  %v9053_v36 = vand.u32 4294901760, %v9046_v33  ;;  %v3025_v58 = vand.u32 4294901760, %v1631_v40  ;;  %v7134_v1 = vsub.f32 %v1629_v20, %v3021_v53  ;;  %v1633_v34 = vld [vmem:[#allocation3 + $0x360] sm:$0xff] }
 0x404   :  { %v2001_v12 = vsub.f32 %v9045_v41, %v9052_v56  ;;  %v1514_v48 = vsel %vm163_vm4, %v1472_v37, %v1470_v11  ;;  %v1513_v15 = vsel %vm163_vm4, %v1471_v50, %v1469_v19  ;;  %v7143_v14 = vpack.c.bf16 %v2008_v54, %v1996_v4 }
 0x405   :  { %9050 = vst [vmem:[#allocation195_spill] sm:$0xff] %v7122_v13  ;;  %v2013_v22 = vsub.f32 %v9046_v33, %v9053_v36  ;;  %9054 = vst [vmem:[#allocation197_spill] sm:$0xff] %v7134_v1  ;;  %v7136_v57 = vand.u32 4294901760, %v1514_v48  ;;  %v7138_v5 = vand.u32 4294901760, %v1513_v15  ;;  %v7141_v55 = vsub.f32 %v1522_v9, %v7122_v13 }
 0x406   :  { %v2019_v21 = vsub.f32 %v9048_v16, %v8594_v35  ;;  %v2031_v37 = vsub.f32 %v9049_v43, %v8593_v17  ;;  %v3027_v20 = vand.u32 4294901760, %v1634_v25  ;;  %v2002_v11 = vand.u32 4294901760, %v2001_v12  ;;  %v9063_v35 = vld [vmem:[#allocation78_spill] sm:$0xff]  ;;  %v9065_v43 = vld [vmem:[#allocation79_spill] sm:$0xff] }
 0x407   :  { %9055 = vst [vmem:[#allocation198_spill] sm:$0xff] %v7136_v57  ;;  %9056 = vst [vmem:[#allocation199_spill] sm:$0xff] %v7138_v5  ;;  %2931 = vmatprep.mubr.f32.mxu0 %v7136_v57  ;;  %v7154_v19 = vsub.f32 %v1513_v15, %v7138_v5  ;;  %v8600_v4 = vand.u32 4294901760, %v7141_v55  ;;  %v7158_v54 = vsub.f32 %v1514_v48, %v7136_v57  ;;  %v2014_v50 = vand.u32 4294901760, %v2013_v22 }
 0x408   :  { %9057 = vst [vmem:[#allocation200_spill] sm:$0xff] %v7141_v55  ;;  %2933 = vmatmul.mubr.f32.vlgmr.msra.gmra.mrb[2].mxu0 %v7138_v5  ;;  %v7161_v9 = vpack.c.bf16 %v3025_v58, %v3021_v53  ;;  %v7163_v56 = vsub.f32 %v1631_v40, %v3025_v58  ;;  %v3031_v36 = vand.u32 4294901760, %v1636_v46  ;;  %v2020_v53 = vand.u32 4294901760, %v2019_v21 }
 0x409   :  { %9059 = vst [vmem:[#allocation201_spill] sm:$0xff] %v7154_v19  ;;  %9060 = vst [vmem:[#allocation202_spill] sm:$0xff] %v7158_v54  ;;  %5304 = vmatpush1.bf16.msra.mxu0 %v6717_v52  ;;  %v3070_v15 = vsub.f32 %v7141_v55, %v8600_v4  ;;  %v8607_v17 = vand.u32 4294901760, %v7158_v54  ;;  %v8610_v48 = vand.u32 4294901760, %v7154_v19  ;;  %v2032_v22 = vand.u32 4294901760, %v2031_v37  ;;  %v1635_v52 = vld [vmem:[#allocation3 + $0x370] sm:$0xff] }
 0x40a   :  { %9061 = vst [vmem:[#allocation203_spill] sm:$0xff] %v7161_v9  ;;  %9062 = vst [vmem:[#allocation204_spill] sm:$0xff] %v7163_v56  ;;  %5306 = vmatprep.subr.bf16.mxu0 %v6725_v49  ;;  %v9064_v40 = vand.u32 4294901760, %v9058_v32  ;;  %v9066_v55 = vld [vmem:[#allocation80_spill] sm:$0xff]  ;;  %v7184_v21 = vpack.c.bf16 %v2014_v50, %v2002_v11  ;;  %v7186_v37 = vpack.c.bf16 %v3031_v36, %v3027_v20 }
 0x40b   :  { %v3071_v33 = vand.u32 4294901760, %v3070_v15  ;;  %v1786_v4 = vsub.f32 %v7158_v54, %v8607_v17  ;;  %v1792_v12 = vsub.f32 %v7154_v19, %v8610_v48  ;;  %v7188_v41 = vsub.f32 %v1634_v25, %v3027_v20  ;;  %v1640_v49 = vld [vmem:[#allocation3 + $0x398] sm:$0xff] }
 0x40c   :  { %v2025_v58 = vsub.f32 %v9058_v32, %v9064_v40  ;;  %9067 = vst [vmem:[#allocation205_spill] sm:$0xff] %v7186_v37  ;;  %v3029_v40 = vand.u32 4294901760, %v1633_v34  ;;  %v1638_v32 = vld [vmem:[#allocation3 + $0x388] sm:$0xff]  ;;  %v9068_v17 = vand.u32 4294901760, %v9063_v35  ;;  %v3033_v48 = vand.u32 4294901760, %v1635_v52  ;;  %v9090_v19 = vld [vmem:[#allocation92_spill] sm:$0xff] }
 0x40d   :  { %5308 = vmatpush1.bf16.msra.mxu0 %v6739_v63  ;;  %3072 = vmatprep.mubr.f32.mxu0 %v3071_v33  ;;  %v1787_v15 = vand.u32 4294901760, %v1786_v4  ;;  %v1793_v16 = vand.u32 4294901760, %v1792_v12  ;;  %v1491_v11 = vmax.f32 %v7035_v3, %v7022_v62  ;;  %v7197_v50 = vpack.c.bf16 %v2032_v22, %v2020_v53  ;;  %v9073_v22 = vld [vmem:[#allocation82_spill] sm:$0xff] }
 0x40e   :  { %v2037_v54 = vsub.f32 %v9063_v35, %v9068_v17  ;;  %5310 = vmatprep.subr.bf16.mxu0 %v6745_v44  ;;  %v7199_v25 = vsub.f32 %v1636_v46, %v3031_v36  ;;  %v7201_v20 = vsub.f32 %v1633_v34, %v3029_v40  ;;  %v2026_v33 = vand.u32 4294901760, %v2025_v58  ;;  %v9072_v34 = vld [vmem:[#allocation81_spill] sm:$0xff] }
 0x40f   :  { %1788 = vmatprep.mubr.f32.mxu1 %v1787_v15  ;;  %v9070_v4 = vand.u32 4294901760, %v9065_v43  ;;  %v9071_v17 = vand.u32 4294901760, %v9066_v55  ;;  %v3035_v62 = vand.u32 4294901760, %v1638_v32  ;;  %v1473_v53 = vmax.f32 %v6952_v6, %v6942_v47  ;;  %v1637_v44 = vld [vmem:[#allocation3 + $0x380] sm:$0xff] }
 0x410   :  { %9069 = vst [vmem:[#allocation206_spill] sm:$0xff] %v7199_v25  ;;  %v1492_v46 = vmax.f32 %v1491_v11, %v7048_v8  ;;  %1794 = vmatmul.mubr.f32.vlgmr.msra.gmra.mrb[2].mxu1 %v1793_v16  ;;  %v8620_v36 = vand.u32 4294901760, %v9072_v34  ;;  %v2038_v58 = vand.u32 4294901760, %v2037_v54  ;;  %v7218_v3 = vsub.f32 %v1635_v52, %v3033_v48 }
 0x411   :  { %v2043_v12 = vsub.f32 %v9065_v43, %v9070_v4  ;;  %v2055_v63 = vsub.f32 %v9066_v55, %v9071_v17  ;;  %4984 = vmatpush1.bf16.msra.mxu1 %v6773_v0  ;;  %5312 = vmatpush1.bf16.msra.mxu0 %v6763_v26  ;;  %v7216_v4 = vpack.c.bf16 %v3033_v48, %v3029_v40  ;;  %v3039_v17 = vand.u32 4294901760, %v1640_v49  ;;  %v1639_v0 = vld [vmem:[#allocation3 + $0x390] sm:$0xff]  ;;  %v1650_v43 = vld [vmem:[#allocation3 + $0x3e8] sm:$0xff] }
 0x412   :  { %9075 = vst [vmem:[#allocation208_spill] sm:$0xff] %v7218_v3  ;;  %v1474_v47 = vmax.f32 %v1473_v53, %v6968_v27  ;;  %v1493_v11 = vmax.f32 %v1492_v46, %v7071_v29  ;;  %2185 = vmatprep.mubr.f32.mxu1 %v7136_v57  ;;  %4986 = vmatprep.subr.bf16.mxu1 %v6787_v10  ;;  %v9076_v46 = vand.u32 4294901760, %v9073_v22  ;;  %v1642_v29 = vld [vmem:[#allocation3 + $0x3a8] sm:$0xff]  ;;  %v3041_v48 = vand.u32 4294901760, %v1639_v0  ;;  %v9089_v26 = vld [vmem:[#allocation91_spill] sm:$0xff] }
 0x413   :  { %9074 = vst [vmem:[#allocation207_spill] sm:$0xff] %v7216_v4  ;;  %v7224_v16 = vsub.f32 %v1638_v32, %v3035_v62  ;;  %5314 = vmatprep.subr.bf16.mxu0 %v6775_v60  ;;  %v2044_v54 = vand.u32 4294901760, %v2043_v12  ;;  %v2056_v40 = vand.u32 4294901760, %v2055_v63  ;;  %v2049_v53 = vsub.f32 %v9072_v34, %v8620_v36  ;;  %v9086_v60 = vld [vmem:[#allocation139_spill] sm:$0xff] }
 0x414   :  { %v1475_v15 = vmax.f32 %v1474_v47, %v7004_v18  ;;  %v2061_v10 = vsub.f32 %v9073_v22, %v9076_v46  ;;  %v3037_v32 = vand.u32 4294901760, %v1637_v44  ;;  %v7238_v63 = vpack.c.bf16 %v2038_v58, %v2026_v33  ;;  %v1644_v47 = vld [vmem:[#allocation3 + $0x3b8] sm:$0xff]  ;;  %v1641_v18 = vld [vmem:[#allocation3 + $0x3a0] sm:$0xff]  ;;  %v1647_v34 = vld [vmem:[#allocation3 + $0x3d0] sm:$0xff] }
 0x415   :  { %4988 = vmatpush1.bf16.msra.mxu1 %v6799_v7  ;;  %5316 = vmatpush1.bf16.msra.mxu0 %v6792_v28  ;;  %v7240_v12 = vpack.c.bf16 %v3039_v17, %v3035_v62  ;;  %v1494_v8 = vrot.slane %v1493_v11, 4  ;;  %v7245_v46 = vsub.f32 %v1640_v49, %v3039_v17  ;;  %v7250_v33 = vpack.c.bf16 %v2056_v40, %v2044_v54  ;;  %v1645_v22 = vld [vmem:[#allocation3 + $0x3c0] sm:$0xff]  ;;  %v9105_v55 = vld [vmem:[#allocation95_spill] sm:$0xff] }
 0x416   :  { %4990 = vmatprep.subr.bf16.mxu1 %v6823_v24  ;;  %5318 = vmatprep.subr.bf16.mxu0 %v6808_v45  ;;  %v7247_v36 = vsub.f32 %v1637_v44, %v3037_v32  ;;  %v9080_v62 = vand.u32 4294901760, %v6633_v39  ;;  %v9081_v52 = vand.u32 4294901760, %v6638_v2  ;;  %v3043_v24 = vand.u32 4294901760, %v1642_v29 }
 0x417   :  { %9077 = vst [vmem:[#allocation209_spill] sm:$0xff] %v7240_v12  ;;  %9078 = vst [vmem:[#allocation210_spill] sm:$0xff] %v7245_v46  ;;  %v1476_v6 = vrot.slane %v1475_v15, 4  ;;  %v2050_v45 = vand.u32 4294901760, %v2049_v53  ;;  %v2062_v49 = vand.u32 4294901760, %v2061_v10  ;;  %v3047_v17 = vand.u32 4294901760, %v1644_v47 }
 0x418   :  { %9079 = vst [vmem:[#allocation211_spill] sm:$0xff] %v7247_v36  ;;  %v2067_v58 = vsub.f32 %v6633_v39, %v9080_v62  ;;  %v2079_v27 = vsub.f32 %v6638_v2, %v9081_v52  ;;  %v7260_v44 = vpack.c.bf16 %v3041_v48, %v3037_v32  ;;  %v7262_v54 = vsub.f32 %v1639_v0, %v3041_v48  ;;  %v9085_v52 = vld [vmem:[#allocation142_spill] sm:$0xff]  ;;  %v1643_v10 = vld [vmem:[#allocation3 + $0x3b0] sm:$0xff]  ;;  %v1648_v2 = vld [vmem:[#allocation3 + $0x3d8] sm:$0xff] }
 0x419   :  { %4992 = vmatpush1.bf16.msra.mxu1 %v6843_v23  ;;  %5320 = vmatpush1.bf16.msra.mxu0 %v6825_v51  ;;  %v9084_v40 = vand.u32 4294901760, %v6643_v59  ;;  %v3045_v7 = vand.u32 4294901760, %v1641_v18  ;;  %v1495_v28 = vmax.f32 %v1493_v11, %v1494_v8  ;;  %v9087_v53 = vand.u32 4294901760, %v6648_v42  ;;  %v9088_v51 = vld [vmem:[#allocation90_spill] sm:$0xff]  ;;  %v9143_v46 = vld [vmem:[#allocation103_spill] sm:$0xff] }
 0x41a   :  { %9082 = vst [vmem:[#allocation212_spill] sm:$0xff] %v7260_v44  ;;  %9083 = vst [vmem:[#allocation213_spill] sm:$0xff] %v7262_v54  ;;  %4994 = vmatprep.subr.bf16.mxu1 %v9085_v52  ;;  %5322 = vmatprep.subr.bf16.mxu0 %v9086_v60  ;;  %v2068_v48 = vand.u32 4294901760, %v2067_v58  ;;  %v2080_v57 = vand.u32 4294901760, %v2079_v27  ;;  %v1477_v8 = vmax.f32 %v1475_v15, %v1476_v6  ;;  %v1646_v39 = vld [vmem:[#allocation3 + $0x3c8] sm:$0xff]  ;;  %v3049_v27 = vand.u32 4294901760, %v1643_v10 }
 0x41b   :  { %v2073_v62 = vsub.f32 %v6643_v59, %v9084_v40  ;;  %v2085_v23 = vsub.f32 %v6648_v42, %v9087_v53  ;;  %v9091_v40 = vld [vmem:[#allocation93_spill] sm:$0xff]  ;;  %v7276_v11 = vpack.c.bf16 %v2062_v49, %v2050_v45  ;;  %v7278_v52 = vpack.c.bf16 %v3047_v17, %v3043_v24  ;;  %v9094_v53 = vld [vmem:[#allocation146_spill] sm:$0xff]  ;;  %v9095_v42 = vld [vmem:[#allocation143_spill] sm:$0xff] }
 0x41c   :  { %v7280_v60 = vsub.f32 %v1642_v29, %v3043_v24  ;;  %v7284_v32 = vsub.f32 %v1644_v47, %v3047_v17  ;;  %v7286_v0 = vsub.f32 %v1641_v18, %v3045_v7  ;;  %v1496_v59 = vrot.slane %v1495_v28, 2  ;;  %v9098_v6 = vld [vmem:[#allocation148_spill] sm:$0xff]  ;;  %v9099_v45 = vld [vmem:[#allocation147_spill] sm:$0xff] }
 0x41d   :  { %9092 = vst [vmem:[#allocation142_spill] sm:$0xff] %v7278_v52  ;;  %4996 = vmatpush1.bf16.msra.mxu1 %v9094_v53  ;;  %5324 = vmatpush1.bf16.msra.mxu0 %v9095_v42  ;;  %v2074_v58 = vand.u32 4294901760, %v2073_v62  ;;  %v2086_v15 = vand.u32 4294901760, %v2085_v23  ;;  %v9100_v29 = vand.u32 4294901760, %v9088_v51  ;;  %v9101_v49 = vand.u32 4294901760, %v9089_v26 }
 0x41e   :  { %9093 = vst [vmem:[#allocation214_spill] sm:$0xff] %v7280_v60  ;;  %9096 = vst [vmem:[#allocation146_spill] sm:$0xff] %v7284_v32  ;;  %4998 = vmatprep.subr.bf16.mxu1 %v9098_v6  ;;  %5326 = vmatprep.subr.bf16.mxu0 %v9099_v45  ;;  %v7296_v17 = vpack.c.bf16 %v2080_v57, %v2068_v48  ;;  %v3051_v62 = vand.u32 4294901760, %v1646_v39  ;;  %v9102_v18 = vand.u32 4294901760, %v9090_v19  ;;  %v9103_v6 = vand.u32 4294901760, %v9091_v40  ;;  %v9107_v57 = vld [vmem:[#allocation151_spill] sm:$0xff] }
 0x41f   :  { %9097 = vst [vmem:[#allocation215_spill] sm:$0xff] %v7286_v0  ;;  %v2091_v24 = vsub.f32 %v9088_v51, %v9100_v29  ;;  %v2103_v47 = vsub.f32 %v9089_v26, %v9101_v49  ;;  %v1478_v23 = vrot.slane %v1477_v8, 2  ;;  %v3055_v42 = vand.u32 4294901760, %v1648_v2  ;;  %v9104_v29 = vld [vmem:[#allocation94_spill] sm:$0xff]  ;;  %v1652_v0 = vld [vmem:[#allocation3 + $0x3f8] sm:$0xff] }
 0x420   :  { %v2097_v53 = vsub.f32 %v9090_v19, %v9102_v18  ;;  %v2109_v45 = vsub.f32 %v9091_v40, %v9103_v6  ;;  %v9106_v49 = vld [vmem:[#allocation154_spill] sm:$0xff]  ;;  %v7308_v48 = vpack.c.bf16 %v3049_v27, %v3045_v7  ;;  %v7310_v26 = vsub.f32 %v1643_v10, %v3049_v27  ;;  %v9111_v6 = vld [vmem:[#allocation156_spill] sm:$0xff]  ;;  %v9112_v40 = vld [vmem:[#allocation155_spill] sm:$0xff] }
 0x421   :  { %5000 = vmatpush1.bf16.msra.mxu1 %v9106_v49  ;;  %5328 = vmatpush1.bf16.msra.mxu0 %v9107_v57  ;;  %v7312_v18 = vsub.f32 %v1646_v39, %v3051_v62  ;;  %v1497_v19 = vmax.f32 %v1495_v28, %v1496_v59  ;;  %v7316_v35 = vpack.c.bf16 %v2086_v15, %v2074_v58  ;;  %v2092_v51 = vand.u32 4294901760, %v2091_v24  ;;  %v9116_v27 = vld [vmem:[#allocation162_spill] sm:$0xff] }
 0x422   :  { %9108 = vst [vmem:[#allocation148_spill] sm:$0xff] %v7308_v48  ;;  %9109 = vst [vmem:[#allocation154_spill] sm:$0xff] %v7310_v26  ;;  %5002 = vmatprep.subr.bf16.mxu1 %v9111_v6  ;;  %5330 = vmatprep.subr.bf16.mxu0 %v9112_v40  ;;  %v2104_v5 = vand.u32 4294901760, %v2103_v47  ;;  %v2098_v49 = vand.u32 4294901760, %v2097_v53  ;;  %v2110_v32 = vand.u32 4294901760, %v2109_v45  ;;  %v3053_v57 = vand.u32 4294901760, %v1645_v22 }
 0x423   :  { %9110 = vst [vmem:[#allocation216_spill] sm:$0xff] %v7312_v18  ;;  %v3057_v7 = vand.u32 4294901760, %v1647_v34  ;;  %v1479_v60 = vmax.f32 %v1477_v8, %v1478_v23  ;;  %v7318_v10 = vpack.c.bf16 %v3055_v42, %v3051_v62  ;;  %v9114_v39 = vand.u32 4294901760, %v9104_v29  ;;  %v9117_v15 = vld [vmem:[#allocation158_spill] sm:$0xff]  ;;  %v9118_v45 = vld [vmem:[#allocation96_spill] sm:$0xff]  ;;  %v9119_v6 = vld [vmem:[#allocation97_spill] sm:$0xff] }
 0x424   :  { %v9115_v28 = vand.u32 4294901760, %v9105_v55  ;;  %v3059_v24 = vand.u32 4294901760, %v1650_v43  ;;  %v3063_v47 = vand.u32 4294901760, %v1652_v0  ;;  %v1649_v62 = vld [vmem:[#allocation3 + $0x3e0] sm:$0xff]  ;;  %v1498_v23 = vrot.slane %v1497_v19, 1  ;;  %v9120_v40 = vld [vmem:[#allocation172_spill] sm:$0xff] }
 0x425   :  { %9113 = vst [vmem:[#allocation156_spill] sm:$0xff] %v7318_v10  ;;  %v2115_v59 = vsub.f32 %v9104_v29, %v9114_v39  ;;  %5004 = vmatpush1.bf16.msra.mxu1 %v9116_v27  ;;  %5332 = vmatpush1.bf16.msra.mxu0 %v9117_v15  ;;  %v9121_v18 = vld [vmem:[#allocation163_spill] sm:$0xff]  ;;  %v7332_v39 = vpack.c.bf16 %v2104_v5, %v2092_v51  ;;  %v1480_v26 = vrot.slane %v1479_v60, 1  ;;  %v3061_v36 = vand.u32 4294901760, %v1649_v62  ;;  %v9128_v51 = vld [vmem:[#allocation173_spill] sm:$0xff] }
 0x426   :  { %v2127_v58 = vsub.f32 %v9105_v55, %v9115_v28  ;;  %5006 = vmatprep.subr.bf16.mxu1 %v9120_v40  ;;  %5334 = vmatprep.subr.bf16.mxu0 %v9121_v18  ;;  %v7334_v29 = vsub.f32 %v1648_v2, %v3055_v42  ;;  %v7336_v28 = vsub.f32 %v1645_v22, %v3053_v57  ;;  %v1651_v8 = vld [vmem:[#allocation3 + $0x3f0] sm:$0xff]  ;;  %v9127_v18 = vld [vmem:[#allocation177_spill] sm:$0xff]  ;;  %v9130_v2 = vand.u32 4294901760, %v9118_v45  ;;  %v9132_v22 = vld [vmem:[#allocation98_spill] sm:$0xff] }
 0x427   :  { %v7338_v27 = vpack.c.bf16 %v2110_v32, %v2098_v49  ;;  %v7340_v15 = vpack.c.bf16 %v3057_v7, %v3053_v57  ;;  %v7342_v55 = vsub.f32 %v1647_v34, %v3057_v7  ;;  %v7344_v53 = vsub.f32 %v1650_v43, %v3059_v24  ;;  %v9133_v49 = vld [vmem:[#allocation190_spill] sm:$0xff]  ;;  %v9134_v7 = vld [vmem:[#allocation185_spill] sm:$0xff]  ;;  %v9141_v32 = vld [vmem:[#allocation112_spill] sm:$0xff] }
 0x428   :  { %9122 = vst [vmem:[#allocation162_spill] sm:$0xff] %v7334_v29  ;;  %9123 = vst [vmem:[#allocation172_spill] sm:$0xff] %v7336_v28  ;;  %v2116_v54 = vand.u32 4294901760, %v2115_v59  ;;  %v2128_v40 = vand.u32 4294901760, %v2127_v58  ;;  %v7348_v42 = vpack.c.bf16 %v3063_v47, %v3059_v24  ;;  %v2121_v5 = vsub.f32 %v9118_v45, %v9130_v2  ;;  %v9136_v58 = vld [vmem:[#allocation99_spill] sm:$0xff]  ;;  %v9139_v45 = vld [vmem:[#allocation100_spill] sm:$0xff] }
 0x429   :  { %9124 = vst [vmem:[#allocation217_spill] sm:$0xff] %v7340_v15  ;;  %9125 = vst [vmem:[#allocation218_spill] sm:$0xff] %v7342_v55  ;;  %5008 = vmatpush1.bf16.msra.mxu1 %v9127_v18  ;;  %5336 = vmatpush1.bf16.msra.mxu0 %v9128_v51  ;;  %v9131_v34 = vand.u32 4294901760, %v9119_v6  ;;  %v1499_v57 = vmax.f32 %v1497_v19, %v1498_v23  ;;  %v7359_v18 = vsub.f32 %v1652_v0, %v3063_v47  ;;  %v9137_v51 = vld [vmem:[#allocation109_spill] sm:$0xff]  ;;  %v9138_v55 = vld [vmem:[#allocation110_spill] sm:$0xff] }
 0x42a   :  { %9126 = vst [vmem:[#allocation219_spill] sm:$0xff] %v7344_v53  ;;  %9129 = vst [vmem:[#allocation177_spill] sm:$0xff] %v7348_v42  ;;  %5010 = vmatprep.subr.bf16.mxu1 %v9133_v49  ;;  %5338 = vmatprep.subr.bf16.mxu0 %v9134_v7  ;;  %v3065_v59 = vand.u32 4294901760, %v1651_v8  ;;  %v9140_v29 = vld [vmem:[#allocation101_spill] sm:$0xff]  ;;  %v9144_v0 = vld [vmem:[#allocation191_spill] sm:$0xff]  ;;  %v2122_v47 = vand.u32 4294901760, %v2121_v5  ;;  %v7371_v53 = vsub.f32 %v1649_v62, %v3061_v36 }
 0x42b   :  { %v2133_v43 = vsub.f32 %v9119_v6, %v9131_v34  ;;  %9135 = vst [vmem:[#allocation190_spill] sm:$0xff] %v7359_v18  ;;  %v8674_v34 = vand.u32 4294901760, %v9140_v29  ;;  %v1481_v6 = vmax.f32 %v1479_v60, %v1480_v26  ;;  %v9142_v23 = vld [vmem:[#allocation113_spill] sm:$0xff]  ;;  %v9146_v2 = vand.u32 4294901760, %v9132_v22  ;;  %v9148_v5 = vld [vmem:[#allocation104_spill] sm:$0xff]  ;;  %v9227_v31 = vld [vmem:[#allocation215_spill] sm:$0xff] }
 0x42c   :  { %9145 = vst [vmem:[#allocation220_spill] sm:$0xff] %v7371_v53  ;;  %v7378_v26 = vpack.c.bf16 %v2128_v40, %v2116_v54  ;;  %v9147_v60 = vand.u32 4294901760, %v9136_v58  ;;  %v9149_v62 = vand.u32 4294901760, %v9137_v51  ;;  %v9151_v19 = vand.u32 4294901760, %v9139_v45  ;;  %v9228_v38 = vld [vmem:[#allocation154_spill] sm:$0xff]  ;;  %v9229_v56 = vld [vmem:[#allocation216_spill] sm:$0xff] }
 0x42d   :  { %5012 = vmatpush1.bf16.msra.mxu1 %v7111_v30  ;;  %5340 = vmatpush1.bf16.msra.mxu0 %v9144_v0  ;;  %v2134_v24 = vand.u32 4294901760, %v2133_v43  ;;  %v2139_v28 = vsub.f32 %v9132_v22, %v9146_v2  ;;  %v1521_v7 = vsel %vm163_vm4, %v1499_v57, %v1481_v6  ;;  %v9150_v2 = vand.u32 4294901760, %v9138_v55  ;;  %v9238_v18 = vld [vmem:[#allocation26_spill] sm:$0xff] }
 0x42e   :  { %5014 = vmatprep.subr.bf16.mxu1 %v7143_v14  ;;  %5342 = vmatprep.subr.bf16.mxu0 %v7117_v61  ;;  %v2151_v30 = vsub.f32 %v9136_v58, %v9147_v60  ;;  %v3087_v49 = vsub.f32 %v9137_v51, %v9149_v62  ;;  %v2145_v54 = vsub.f32 %v9139_v45, %v9151_v19  ;;  %v9153_v6 = vand.u32 4294901760, %v9141_v32  ;;  %v9161_v45 = vld [vmem:[#allocation106_spill] sm:$0xff]  ;;  %v9195_v51 = vld [vmem:[#allocation21_spill] sm:$0xff] }
 0x42f   :  { %v3099_v14 = vsub.f32 %v9138_v55, %v9150_v2  ;;  %v2157_v40 = vsub.f32 %v9140_v29, %v8674_v34  ;;  %v7397_v60 = vpack.c.bf16 %v3065_v59, %v3061_v36  ;;  %v9154_v62 = vand.u32 4294901760, %v9142_v23  ;;  %v9194_v55 = vld [vmem:[#allocation20_spill] sm:$0xff] }
 0x430   :  { %v3093_v57 = vsub.f32 %v9141_v32, %v9153_v6  ;;  %v9155_v2 = vand.u32 4294901760, %v9143_v46  ;;  %v7410_v19 = vpack.c.bf16 %v2134_v24, %v2122_v47  ;;  %v7412_v36 = vsub.f32 %v1651_v8, %v3065_v59 }
 0x431   :  { %9152 = vst [vmem:[#allocation221_spill] sm:$0xff] %v7397_v60  ;;  %v3105_v43 = vsub.f32 %v9142_v23, %v9154_v62  ;;  %5016 = vmatpush1.bf16.msra.mxu1 %v7184_v21  ;;  %5344 = vmatpush1.bf16.msra.mxu0 %v7161_v9  ;;  %v2140_v34 = vand.u32 4294901760, %v2139_v28  ;;  %v7414_v0 = vand.u32 4294901760, %v1521_v7  ;;  %v2152_v6 = vand.u32 4294901760, %v2151_v30  ;;  %v9160_v23 = vld [vmem:[#allocation116_spill] sm:$0xff] }
 0x432   :  { %v2163_v61 = vsub.f32 %v9143_v46, %v9155_v2  ;;  %9156 = vst [vmem:[#allocation222_spill] sm:$0xff] %v7412_v36  ;;  %5018 = vmatprep.subr.bf16.mxu1 %v7197_v50  ;;  %5346 = vmatprep.subr.bf16.mxu0 %v7186_v37  ;;  %v9158_v62 = vand.u32 4294901760, %v9148_v5  ;;  %v9159_v46 = vld [vmem:[#allocation115_spill] sm:$0xff]  ;;  %v3088_v24 = vand.u32 4294901760, %v3087_v49  ;;  %v3100_v47 = vand.u32 4294901760, %v3099_v14  ;;  %v9164_v37 = vld [vmem:[#allocation118_spill] sm:$0xff] }
 0x433   :  { %9157 = vst [vmem:[#allocation223_spill] sm:$0xff] %v7414_v0  ;;  %v2146_v8 = vand.u32 4294901760, %v2145_v54  ;;  %v2158_v59 = vand.u32 4294901760, %v2157_v40  ;;  %v3094_v28 = vand.u32 4294901760, %v3093_v57  ;;  %v3106_v32 = vand.u32 4294901760, %v3105_v43  ;;  %v9165_v49 = vld [vmem:[#allocation119_spill] sm:$0xff] }
 0x434   :  { %v2175_v2 = vsub.f32 %v9148_v5, %v9158_v62  ;;  %v2164_v29 = vand.u32 4294901760, %v2163_v61  ;;  %v7427_v30 = vsub.f32 %v1521_v7, %v7414_v0  ;;  %v9163_v62 = vld [vmem:[#allocation107_spill] sm:$0xff]  ;;  %v9166_v43 = vand.u32 4294901760, %v9159_v46  ;;  %v9168_v40 = vld [vmem:[#allocation121_spill] sm:$0xff]  ;;  %v9169_v14 = vld [vmem:[#allocation122_spill] sm:$0xff] }
 0x435   :  { %5020 = vmatpush1.bf16.msra.mxu1 %v7238_v63  ;;  %5348 = vmatpush1.bf16.msra.mxu0 %v7216_v4  ;;  %v9167_v54 = vand.u32 4294901760, %v9160_v23  ;;  %v8695_v57 = vand.u32 4294901760, %v9168_v40  ;;  %v7441_v21 = vpack.c.bf16 %v2152_v6, %v2140_v34  ;;  %v7443_v9 = vpack.c.bf16 %v3100_v47, %v3088_v24  ;;  %v9176_v34 = vld [vmem:[#allocation126_spill] sm:$0xff] }
 0x436   :  { %9162 = vst [vmem:[#allocation224_spill] sm:$0xff] %v7427_v30  ;;  %5022 = vmatprep.subr.bf16.mxu1 %v7250_v33  ;;  %5350 = vmatprep.subr.bf16.mxu0 %v7240_v12  ;;  %v2176_v61 = vand.u32 4294901760, %v2175_v2  ;;  %v3111_v63 = vsub.f32 %v9159_v46, %v9166_v43  ;;  %v8697_v50 = vand.u32 4294901760, %v9169_v14  ;;  %v9170_v33 = vld [vmem:[#allocation124_spill] sm:$0xff]  ;;  %v7447_v12 = vpack.c.bf16 %v2158_v59, %v2146_v8  ;;  %v9172_v46 = vld [vmem:[#allocation125_spill] sm:$0xff] }
 0x437   :  { %v3123_v7 = vsub.f32 %v9160_v23, %v9167_v54  ;;  %v8698_v4 = vand.u32 4294901760, %v9170_v33  ;;  %v7449_v2 = vpack.c.bf16 %v3106_v32, %v3094_v28  ;;  %v9171_v43 = vand.u32 4294901760, %v9161_v45  ;;  %v9177_v54 = vld [vmem:[#allocation128_spill] sm:$0xff] }
 0x438   :  { %v9173_v6 = vand.u32 4294901760, %v9163_v62  ;;  %v9174_v47 = vand.u32 4294901760, %v9164_v37  ;;  %v9175_v8 = vand.u32 4294901760, %v9165_v49  ;;  %v3112_v28 = vand.u32 4294901760, %v3111_v63 }
 0x439   :  { %v2169_v0 = vsub.f32 %v9161_v45, %v9171_v43  ;;  %5024 = vmatpush1.bf16.msra.mxu1 %v7276_v11  ;;  %5352 = vmatpush1.bf16.msra.mxu0 %v7260_v44  ;;  %v7469_v11 = vpack.c.bf16 %v2176_v61, %v2164_v29  ;;  %v3124_v43 = vand.u32 4294901760, %v3123_v7  ;;  %v9178_v61 = vand.u32 4294901760, %v9172_v46  ;;  %v9179_v7 = vld [vmem:[#allocation129_spill] sm:$0xff]  ;;  %v9183_v44 = vld [vmem:[#allocation12_spill] sm:$0xff]  ;;  %v9191_v45 = vld [vmem:[#allocation15_spill] sm:$0xff] }
 0x43a   :  { %v2181_v24 = vsub.f32 %v9163_v62, %v9173_v6  ;;  %v3117_v32 = vsub.f32 %v9164_v37, %v9174_v47  ;;  %v3129_v59 = vsub.f32 %v9165_v49, %v9175_v8  ;;  %5026 = vmatprep.subr.bf16.mxu1 %v7296_v17  ;;  %5354 = vmatprep.subr.bf16.mxu0 %v7278_v52  ;;  %v9185_v5 = vand.u32 4294901760, %v9176_v34 }
 0x43b   :  { %v3135_v6 = vsub.f32 %v9168_v40, %v8695_v57  ;;  %v3147_v47 = vsub.f32 %v9169_v14, %v8697_v50  ;;  %v3141_v8 = vsub.f32 %v9170_v33, %v8698_v4  ;;  %v2170_v29 = vand.u32 4294901760, %v2169_v0  ;;  %v9180_v57 = vld [vmem:[#allocation131_spill] sm:$0xff]  ;;  %v9224_v14 = vld [vmem:[#allocation213_spill] sm:$0xff]  ;;  %v9232_v40 = vld [vmem:[#allocation218_spill] sm:$0xff] }
 0x43c   :  { %v3153_v63 = vsub.f32 %v9172_v46, %v9178_v61  ;;  %v9181_v50 = vand.u32 4294901760, %v7427_v30  ;;  %v2182_v17 = vand.u32 4294901760, %v2181_v24  ;;  %v3118_v37 = vand.u32 4294901760, %v3117_v32  ;;  %v9182_v61 = vld [vmem:[#allocation11_spill] sm:$0xff]  ;;  %v9218_v46 = vld [vmem:[#allocation178_spill] sm:$0xff] }
 0x43d   :  { %5028 = vmatpush1.bf16.msra.mxu1 %v7316_v35  ;;  %5356 = vmatpush1.bf16.msra.mxu0 %v7308_v48  ;;  %v3130_v52 = vand.u32 4294901760, %v3129_v59  ;;  %v7494_v0 = vpack.c.bf16 %v3124_v43, %v3112_v28  ;;  %v3136_v62 = vand.u32 4294901760, %v3135_v6  ;;  %v9184_v35 = vld [vmem:[#allocation132_spill] sm:$0xff]  ;;  %v3148_v48 = vand.u32 4294901760, %v3147_v47  ;;  %v9189_v47 = vld [vmem:[#allocation134_spill] sm:$0xff] }
 0x43e   :  { %v3076_v4 = vsub.f32 %v7427_v30, %v9181_v50  ;;  %5030 = vmatprep.subr.bf16.mxu1 %v7332_v39  ;;  %5358 = vmatprep.subr.bf16.mxu0 %v7318_v10  ;;  %v3142_v23 = vand.u32 4294901760, %v3141_v8  ;;  %v7502_v50 = vsub.f32 %v9176_v34, %v9185_v5  ;;  %v9186_v24 = vand.u32 4294901760, %v9177_v54  ;;  %v9193_v30 = vld [vmem:[#allocation18_spill] sm:$0xff]  ;;  %v9199_v10 = vld [vmem:[#allocation24_spill] sm:$0xff] }
 0x43f   :  { %v3154_v32 = vand.u32 4294901760, %v3153_v63  ;;  %v9187_v59 = vand.u32 4294901760, %v9179_v7  ;;  %v9188_v43 = vand.u32 4294901760, %v9180_v57  ;;  %v5371_v49 = vpack.c.bf16 %v3130_v52, %v3118_v37  ;;  %v9190_v63 = vld [vmem:[#allocation13_spill] sm:$0xff]  ;;  %v9209_v34 = vld [vmem:[#allocation152_spill] sm:$0xff] }
 0x440   :  { %v7507_v39 = vsub.f32 %v9177_v54, %v9186_v24  ;;  %v3077_v5 = vand.u32 4294901760, %v3076_v4  ;;  %v5043_v24 = vpack.c.bf16 %v2182_v17, %v2170_v29  ;;  %v9197_v4 = vld [vmem:[#allocation135_spill] sm:$0xff]  ;;  %v5373_v52 = vpack.c.bf16 %v3148_v48, %v3136_v62  ;;  %v9198_v29 = vld [vmem:[#allocation22_spill] sm:$0xff]  ;;  %v9201_v48 = vld [vmem:[#allocation137_spill] sm:$0xff] }
 0x441   :  { %v7512_v28 = vsub.f32 %v9179_v7, %v9187_v59  ;;  %v7517_v6 = vsub.f32 %v9180_v57, %v9188_v43  ;;  %5032 = vmatpush1.bf16.msra.mxu1 %v7338_v27  ;;  %5360 = vmatpush1.bf16.msra.mxu0 %v7340_v15  ;;  %v9192_v59 = vld [vmem:[#allocation17_spill] sm:$0xff]  ;;  %v9196_v27 = vand.u32 4294901760, %v9184_v35  ;;  %v8718_v37 = vand.u32 4294901760, %v9197_v4  ;;  %v9225_v57 = vld [vmem:[#allocation214_spill] sm:$0xff]  ;;  %v9231_v54 = vld [vmem:[#allocation172_spill] sm:$0xff] }
 0x442   :  { %5034 = vmatprep.subr.bf16.mxu1 %v7378_v26  ;;  %5362 = vmatprep.subr.bf16.mxu0 %v7348_v42  ;;  %v3160_v17 = vand.u32 4294901760, %v7502_v50  ;;  %v3172_v26 = vand.u32 4294901760, %v7507_v39  ;;  %v7540_v58 = vpack.c.bf16 %v3154_v32, %v3142_v23  ;;  %v9200_v22 = vand.u32 4294901760, %v9189_v47  ;;  %v9202_v50 = vld [vmem:[#allocation138_spill] sm:$0xff]  ;;  %v9204_v23 = vld [vmem:[#allocation141_spill] sm:$0xff]  ;;  %v9205_v42 = vld [vmem:[#allocation144_spill] sm:$0xff] }
 0x443   :  { %v7533_v15 = vsub.f32 %v9184_v35, %v9196_v27  ;;  %v3166_v43 = vand.u32 4294901760, %v7512_v28  ;;  %v3178_v8 = vand.u32 4294901760, %v7517_v6  ;;  %v9207_v62 = vld [vmem:[#allocation149_spill] sm:$0xff]  ;;  %v9208_v28 = vld [vmem:[#allocation150_spill] sm:$0xff]  ;;  %v9212_v32 = vld [vmem:[#allocation159_spill] sm:$0xff]  ;;  %v9235_v1 = vand.u32 4294901760, %v9201_v48 }
 0x444   :  { %v7547_v27 = vsub.f32 %v9189_v47, %v9200_v22  ;;  %v9210_v6 = vld [vmem:[#allocation153_spill] sm:$0xff]  ;;  %v9213_v35 = vld [vmem:[#allocation160_spill] sm:$0xff]  ;;  %v5377_v33 = vpack.c.bf16 %v3172_v26, %v3160_v17  ;;  %v9244_v17 = vld [vmem:[#allocation202_spill] sm:$0xff] }
 0x445   :  { %5036 = vmatpush1.bf16.msra.mxu1 %v7410_v19  ;;  %5364 = vmatpush1.bf16.msra.mxu0 %v7397_v60  ;;  %v3184_v22 = vand.u32 4294901760, %v7533_v15  ;;  %v7563_v19 = vsub.f32 %v9197_v4, %v8718_v37  ;;  %v9206_v37 = vld [vmem:[#allocation145_spill] sm:$0xff]  ;;  %v9217_v60 = vld [vmem:[#allocation174_spill] sm:$0xff] }
 0x446   :  { %5038 = vmatprep.subr.bf16.mxu1 %v7441_v21  ;;  %5366 = vmatprep.subr.bf16.mxu0 %v7443_v9  ;;  %v9203_v9 = vld [vmem:[#allocation140_spill] sm:$0xff]  ;;  %v9211_v7 = vld [vmem:[#allocation157_spill] sm:$0xff]  ;;  %v3196_v15 = vand.u32 4294901760, %v7547_v27  ;;  %v9234_v21 = vpack.c.bf16 %v9183_v44, %v9182_v61  ;;  %v9239_v27 = vld [vmem:[#allocation27_spill] sm:$0xff]  ;;  %v5379_v61 = vpack.c.bf16 %v3178_v8, %v3166_v43  ;;  %v9245_v44 = vand.u32 4294901760, %v9204_v23 }
 0x447   :  { %v9214_v39 = vld [vmem:[#allocation161_spill] sm:$0xff]  ;;  %v9237_v47 = vand.u32 4294901760, %v9203_v9  ;;  %v5055_v36 = vpack.c.bf16 %v9239_v27, %v9238_v18  ;;  %v9246_v8 = vand.u32 4294901760, %v9205_v42 }
 0x448   :  { %3078 = vmatmul.mubr.f32.vlgmr.msra.gmra.mrb[2].mxu0 %v3077_v5  ;;  %v9215_v5 = vld [vmem:[#allocation168_spill] sm:$0xff]  ;;  %v9216_v4 = vld [vmem:[#allocation169_spill] sm:$0xff]  ;;  %v5381_v26 = vpack.c.bf16 %v3196_v15, %v3184_v22  ;;  %v9248_v22 = vand.u32 4294901760, %v9206_v37  ;;  %v9249_v15 = vand.u32 4294901760, %v9207_v62 }
 0x449   :  { %5040 = vmatpush1.bf16.msra.mxu1 %v7447_v12  ;;  %5368 = vmatpush1.bf16.msra.mxu0 %v7449_v2  ;;  %v9226_v12 = vld [vmem:[#allocation146_spill] sm:$0xff]  ;;  %v3219_v2 = vsub.f32 %v9203_v9, %v9237_v47  ;;  %v9243_v47 = vpack.c.bf16 %v9191_v45, %v9190_v63  ;;  %v3225_v43 = vsub.f32 %v9205_v42, %v9246_v8 }
 0x44a   :  { %3469 = vmatprep.mubr.f32.mxu0 %v7122_v13  ;;  %5042 = vmatprep.subr.bf16.mxu1 %v7469_v11  ;;  %v9223_v13 = vld [vmem:[#allocation211_spill] sm:$0xff]  ;;  %v3243_v8 = vsub.f32 %v9207_v62, %v9249_v15  ;;  %v9282_v63 = vld [vmem:[#allocation54_spill] sm:$0xff] }
 0x44b   :  { %5370 = vmatprep.subr.bf16.mxu0 %v7494_v0  ;;  %v9230_v0 = vld [vmem:[#allocation162_spill] sm:$0xff]  ;;  %v9233_v11 = vld [vmem:[#allocation219_spill] sm:$0xff]  ;;  %v3226_v18 = vand.u32 4294901760, %v3225_v43 }
 0x44c   :  { %v9253_v15 = vld [vmem:[#allocation31_spill] sm:$0xff] }
 0x44d   :  { %5044 = vmatpush1.bf16.msra.mxu1 %v5043_v24  ;;  %5372 = vmatpush1.bf16.msra.mxu0 %v5371_v49  ;;  %v3201_v24 = vsub.f32 %v9201_v48, %v9235_v1  ;;  %v9236_v49 = vand.u32 4294901760, %v9202_v50  ;;  %v9241_v1 = vld [vmem:[#allocation28_spill] sm:$0xff]  ;;  %v9242_v48 = vld [vmem:[#allocation30_spill] sm:$0xff] }
 0x44e   :  { %5046 = vmatprep.subr.bf16.mxu1 %v9234_v21  ;;  %5374 = vmatprep.subr.bf16.mxu0 %v5373_v52  ;;  %v9240_v21 = vld [vmem:[#allocation199_spill] sm:$0xff]  ;;  %v5057_v53 = vpack.c.bf16 %v9242_v48, %v9241_v1  ;;  %v3213_v52 = vsub.f32 %v9204_v23, %v9245_v44  ;;  %v3220_v48 = vand.u32 4294901760, %v3219_v2  ;;  %v3231_v44 = vsub.f32 %v9206_v37, %v9248_v22 }
 0x44f   :  { %v3207_v25 = vsub.f32 %v9202_v50, %v9236_v49  ;;  %v9247_v50 = vpack.c.bf16 %v9193_v30, %v9192_v59  ;;  %v3190_v49 = vand.u32 4294901760, %v7563_v19  ;;  %v9252_v22 = vpack.c.bf16 %v9195_v51, %v9194_v55  ;;  %v9255_v30 = vld [vmem:[#allocation33_spill] sm:$0xff]  ;;  %v9256_v59 = vld [vmem:[#allocation34_spill] sm:$0xff] }
 0x450   :  { %2187 = vmatmul.mubr.f32.vlgmr.msra.gmra.mrb[2].mxu1 %v9240_v21  ;;  %v3214_v1 = vand.u32 4294901760, %v3213_v52  ;;  %v3244_v55 = vand.u32 4294901760, %v3243_v8  ;;  %v9258_v52 = vand.u32 4294901760, %v9210_v6  ;;  %v9263_v8 = vld [vmem:[#allocation36_spill] sm:$0xff] }
 0x451   :  { %5048 = vmatpush1.bf16.msra.mxu1 %v9243_v47  ;;  %2387 = vmatprep.mubr.f32.mxu1 %v9244_v17  ;;  %v3202_v47 = vand.u32 4294901760, %v3201_v24  ;;  %v3208_v21 = vand.u32 4294901760, %v3207_v25  ;;  %v9251_v25 = vand.u32 4294901760, %v9209_v34  ;;  %v8760_v24 = vand.u32 4294901760, %v9214_v39 }
 0x452   :  { %5376 = vmatpush1.bf16.msra.mxu0 %v7540_v58  ;;  %5050 = vmatprep.subr.bf16.mxu1 %v9247_v50  ;;  %v9250_v50 = vand.u32 4294901760, %v9208_v28  ;;  %v9254_v58 = vld [vmem:[#allocation32_spill] sm:$0xff]  ;;  %v3255_v43 = vsub.f32 %v9210_v6, %v9258_v52 }
 0x453   :  { %5378 = vmatprep.subr.bf16.mxu0 %v5377_v33  ;;  %v3249_v33 = vsub.f32 %v9209_v34, %v9251_v25  ;;  %v5059_v27 = vpack.c.bf16 %v9254_v58, %v9253_v15  ;;  %v9257_v25 = vpack.c.bf16 %v9199_v10, %v9198_v29  ;;  %v5383_v2 = vpack.c.bf16 %v3202_v47, %v3190_v49  ;;  %v9267_v52 = vld [vmem:[#allocation40_spill] sm:$0xff]  ;;  %v9269_v15 = vld [vmem:[#allocation42_spill] sm:$0xff] }
 0x454   :  { %v3237_v19 = vsub.f32 %v9208_v28, %v9250_v50  ;;  %v5061_v50 = vpack.c.bf16 %v9256_v59, %v9255_v30  ;;  %v5385_v45 = vpack.c.bf16 %v3220_v48, %v3208_v21  ;;  %v9259_v59 = vand.u32 4294901760, %v9211_v7 }
 0x455   :  { %5052 = vmatpush1.bf16.msra.mxu1 %v9252_v22  ;;  %v3232_v22 = vand.u32 4294901760, %v3231_v44  ;;  %v3250_v58 = vand.u32 4294901760, %v3249_v33  ;;  %v9260_v49 = vand.u32 4294901760, %v9212_v32  ;;  %v9261_v21 = vand.u32 4294901760, %v9213_v35  ;;  %v9262_v44 = vld [vmem:[#allocation35_spill] sm:$0xff] }
 0x456   :  { %5380 = vmatpush1.bf16.msra.mxu0 %v5379_v61  ;;  %5054 = vmatprep.subr.bf16.mxu1 %v9257_v25  ;;  %v3267_v61 = vsub.f32 %v9211_v7, %v9259_v59  ;;  %v3238_v30 = vand.u32 4294901760, %v3237_v19  ;;  %v5387_v47 = vpack.c.bf16 %v3226_v18, %v3214_v1  ;;  %v5063_v25 = vpack.c.bf16 %v9263_v8, %v9262_v44  ;;  %v9265_v18 = vld [vmem:[#allocation188_spill] sm:$0xff]  ;;  %v9268_v44 = vld [vmem:[#allocation41_spill] sm:$0xff] }
 0x457   :  { %5382 = vmatprep.subr.bf16.mxu0 %v5381_v26  ;;  %v3261_v48 = vsub.f32 %v9212_v32, %v9260_v49  ;;  %v3273_v26 = vsub.f32 %v9213_v35, %v9261_v21  ;;  %v3279_v59 = vsub.f32 %v9214_v39, %v8760_v24  ;;  %v9264_v19 = vand.u32 4294901760, %v9215_v5  ;;  %v9266_v21 = vld [vmem:[#allocation39_spill] sm:$0xff]  ;;  %v9285_v39 = vld [vmem:[#allocation204_spill] sm:$0xff] }
 0x458   :  { %v5389_v49 = vpack.c.bf16 %v3244_v55, %v3232_v22  ;;  %v5065_v8 = vpack.c.bf16 %v9267_v52, %v9266_v21  ;;  %v3256_v51 = vand.u32 4294901760, %v3255_v43  ;;  %v5067_v10 = vpack.c.bf16 %v9269_v15, %v9268_v44  ;;  %v9273_v52 = vld [vmem:[#allocation192_spill] sm:$0xff]  ;;  %v9276_v15 = vld [vmem:[#allocation43_spill] sm:$0xff]  ;;  %v9278_v22 = vld [vmem:[#allocation193_spill] sm:$0xff] }
 0x459   :  { %5056 = vmatpush1.bf16.msra.mxu1 %v5055_v36  ;;  %v3291_v33 = vsub.f32 %v9215_v5, %v9264_v19  ;;  %v3262_v24 = vand.u32 4294901760, %v3261_v48  ;;  %v3274_v29 = vand.u32 4294901760, %v3273_v26  ;;  %v9270_v19 = vand.u32 4294901760, %v9216_v4  ;;  %v9279_v43 = vld [vmem:[#allocation196_spill] sm:$0xff] }
 0x45a   :  { %5384 = vmatpush1.bf16.msra.mxu0 %v5383_v2  ;;  %5058 = vmatprep.subr.bf16.mxu1 %v5057_v53  ;;  %v3268_v2 = vand.u32 4294901760, %v3267_v61  ;;  %v5391_v53 = vpack.c.bf16 %v3250_v58, %v3238_v30  ;;  %v9271_v1 = vand.u32 4294901760, %v9217_v60  ;;  %v3280_v30 = vand.u32 4294901760, %v3279_v59  ;;  %v9281_v59 = vld [vmem:[#allocation48_spill] sm:$0xff] }
 0x45b   :  { %5386 = vmatprep.subr.bf16.mxu0 %v5385_v45  ;;  %v3285_v36 = vsub.f32 %v9216_v4, %v9270_v19  ;;  %v9272_v45 = vld [vmem:[#allocation189_spill] sm:$0xff]  ;;  %v3292_v58 = vand.u32 4294901760, %v3291_v33  ;;  %v9274_v61 = vand.u32 4294901760, %v9218_v46  ;;  %v9275_v48 = vand.u32 4294901760, %v9265_v18  ;;  %v9283_v4 = vld [vmem:[#allocation55_spill] sm:$0xff] }
 0x45c   :  { %v3297_v55 = vsub.f32 %v9217_v60, %v9271_v1  ;;  %v5393_v19 = vpack.c.bf16 %v3268_v2, %v3256_v51  ;;  %v9277_v1 = vld [vmem:[#allocation45_spill] sm:$0xff]  ;;  %v5073_v60 = vpack.c.bf16 %v9283_v4, %v9282_v63  ;;  %v9286_v2 = vand.u32 4294901760, %v9272_v45 }
 0x45d   :  { %5060 = vmatpush1.bf16.msra.mxu1 %v5059_v27  ;;  %v3303_v27 = vsub.f32 %v9218_v46, %v9274_v61  ;;  %v3315_v26 = vsub.f32 %v9265_v18, %v9275_v48  ;;  %v5069_v44 = vpack.c.bf16 %v9277_v1, %v9276_v15  ;;  %v9284_v61 = vld [vmem:[#allocation197_spill] sm:$0xff]  ;;  %v9287_v21 = vand.u32 4294901760, %v9273_v52  ;;  %v9290_v46 = vld [vmem:[#allocation206_spill] sm:$0xff] }
 0x45e   :  { %5388 = vmatpush1.bf16.msra.mxu0 %v5387_v47  ;;  %5062 = vmatprep.subr.bf16.mxu1 %v5061_v50  ;;  %v9280_v50 = vld [vmem:[#allocation46_spill] sm:$0xff]  ;;  %v3298_v51 = vand.u32 4294901760, %v3297_v55  ;;  %v3309_v48 = vsub.f32 %v9272_v45, %v9286_v2  ;;  %v9288_v5 = vand.u32 4294901760, %v9278_v22  ;;  %v8769_v1 = vand.u32 4294901760, %v7201_v20 }
 0x45f   :  { %5390 = vmatprep.subr.bf16.mxu0 %v5389_v49  ;;  %v5071_v33 = vpack.c.bf16 %v9281_v59, %v9280_v50  ;;  %v3286_v49 = vand.u32 4294901760, %v3285_v36  ;;  %v3321_v47 = vsub.f32 %v9273_v52, %v9287_v21  ;;  %v5395_v59 = vpack.c.bf16 %v3274_v29, %v3262_v24  ;;  %v9291_v21 = vld [vmem:[#allocation56_spill] sm:$0xff]  ;;  %v9293_v29 = vld [vmem:[#allocation61_spill] sm:$0xff]  ;;  %v9294_v24 = vld [vmem:[#allocation62_spill] sm:$0xff] }
 0x460   :  { %v5397_v50 = vpack.c.bf16 %v3292_v58, %v3280_v30  ;;  %v3304_v4 = vand.u32 4294901760, %v3303_v27  ;;  %v3316_v63 = vand.u32 4294901760, %v3315_v26  ;;  %v9289_v36 = vand.u32 4294901760, %v9279_v43 }
 0x461   :  { %5064 = vmatpush1.bf16.msra.mxu1 %v5063_v25  ;;  %v3327_v25 = vsub.f32 %v9278_v22, %v9288_v5  ;;  %v5077_v30 = vpack.c.bf16 %v9294_v24, %v9293_v29  ;;  %v9295_v58 = vand.u32 4294901760, %v9284_v61  ;;  %v9296_v5 = vand.u32 4294901760, %v9285_v39  ;;  %v9297_v29 = vld [vmem:[#allocation210_spill] sm:$0xff] }
 0x462   :  { %5392 = vmatpush1.bf16.msra.mxu0 %v5391_v53  ;;  %5066 = vmatprep.subr.bf16.mxu1 %v5065_v8  ;;  %v3339_v55 = vsub.f32 %v9279_v43, %v9289_v36  ;;  %v9292_v53 = vld [vmem:[#allocation57_spill] sm:$0xff]  ;;  %v3310_v36 = vand.u32 4294901760, %v3309_v48  ;;  %v3322_v2 = vand.u32 4294901760, %v3321_v47  ;;  %v8771_v24 = vand.u32 4294901760, %v7224_v16 }
 0x463   :  { %5394 = vmatprep.subr.bf16.mxu0 %v5393_v19  ;;  %v5075_v8 = vpack.c.bf16 %v9292_v53, %v9291_v21  ;;  %v3333_v27 = vsub.f32 %v9284_v61, %v9295_v58  ;;  %v3345_v26 = vsub.f32 %v9285_v39, %v9296_v5  ;;  %v5399_v19 = vpack.c.bf16 %v3298_v51, %v3286_v49 }
 0x464   :  { %v5401_v53 = vpack.c.bf16 %v3316_v63, %v3304_v4  ;;  %v8770_v21 = vand.u32 4294901760, %v7218_v3  ;;  %v8773_v15 = vand.u32 4294901760, %v9297_v29  ;;  %v3328_v58 = vand.u32 4294901760, %v3327_v25  ;;  %v9303_v25 = vld [vmem:[#allocation76_spill] sm:$0xff] }
 0x465   :  { %5068 = vmatpush1.bf16.msra.mxu1 %v5067_v10  ;;  %v3340_v61 = vand.u32 4294901760, %v3339_v55  ;;  %v9298_v5 = vand.u32 4294901760, %v7188_v41  ;;  %v9299_v47 = vand.u32 4294901760, %v9290_v46  ;;  %v8772_v63 = vand.u32 4294901760, %v9223_v13 }
 0x466   :  { %5396 = vmatpush1.bf16.msra.mxu0 %v5395_v59  ;;  %5070 = vmatprep.subr.bf16.mxu1 %v5069_v44  ;;  %v3334_v59 = vand.u32 4294901760, %v3333_v27  ;;  %v3346_v44 = vand.u32 4294901760, %v3345_v26  ;;  %v8774_v4 = vand.u32 4294901760, %v9224_v14  ;;  %v5403_v51 = vpack.c.bf16 %v3322_v2, %v3310_v36  ;;  %v9300_v26 = vld [vmem:[#allocation63_spill] sm:$0xff]  ;;  %v9301_v36 = vld [vmem:[#allocation64_spill] sm:$0xff] }
 0x467   :  { %5398 = vmatprep.subr.bf16.mxu0 %v5397_v50  ;;  %v3351_v10 = vsub.f32 %v7188_v41, %v9298_v5  ;;  %v3363_v49 = vsub.f32 %v9290_v46, %v9299_v47  ;;  %v3357_v50 = vsub.f32 %v7201_v20, %v8769_v1  ;;  %v3369_v55 = vsub.f32 %v7218_v3, %v8770_v21  ;;  %v9302_v1 = vld [vmem:[#allocation75_spill] sm:$0xff] }
 0x468   :  { %v3375_v27 = vsub.f32 %v7224_v16, %v8771_v24  ;;  %v5405_v2 = vpack.c.bf16 %v3340_v61, %v3328_v58  ;;  %v5079_v5 = vpack.c.bf16 %v9301_v36, %v9300_v26  ;;  %v5081_v48 = vpack.c.bf16 %v9303_v25, %v9302_v1  ;;  %v9306_v1 = vld [vmem:[#allocation77_spill] sm:$0xff]  ;;  %v9307_v36 = vld [vmem:[#allocation78_spill] sm:$0xff] }
 0x469   :  { %5072 = vmatpush1.bf16.msra.mxu1 %v5071_v33  ;;  %v3387_v33 = vsub.f32 %v9297_v29, %v8773_v15  ;;  %v3352_v47 = vand.u32 4294901760, %v3351_v10  ;;  %v3381_v21 = vsub.f32 %v9223_v13, %v8772_v63  ;;  %v3393_v24 = vsub.f32 %v9224_v14, %v8774_v4 }
 0x46a   :  { %5400 = vmatpush1.bf16.msra.mxu0 %v5399_v19  ;;  %5074 = vmatprep.subr.bf16.mxu1 %v5073_v60  ;;  %v3364_v19 = vand.u32 4294901760, %v3363_v49  ;;  %v5407_v60 = vpack.c.bf16 %v3346_v44, %v3334_v59  ;;  %v9304_v61 = vand.u32 4294901760, %v9225_v57  ;;  %v9305_v58 = vand.u32 4294901760, %v9226_v12 }
 0x46b   :  { %5402 = vmatprep.subr.bf16.mxu0 %v5401_v53  ;;  %v3358_v44 = vand.u32 4294901760, %v3357_v50  ;;  %v3370_v63 = vand.u32 4294901760, %v3369_v55  ;;  %v3376_v15 = vand.u32 4294901760, %v3375_v27  ;;  %v3388_v25 = vand.u32 4294901760, %v3387_v33 }
 0x46c   :  { %v3399_v53 = vsub.f32 %v9225_v57, %v9304_v61  ;;  %v3411_v10 = vsub.f32 %v9226_v12, %v9305_v58  ;;  %v8777_v4 = vand.u32 4294901760, %v9229_v56  ;;  %v8778_v61 = vand.u32 4294901760, %v9230_v0  ;;  %v9308_v58 = vld [vmem:[#allocation79_spill] sm:$0xff]  ;;  %v9309_v57 = vld [vmem:[#allocation80_spill] sm:$0xff] }
 0x46d   :  { %5076 = vmatpush1.bf16.msra.mxu1 %v5075_v8  ;;  %v5409_v8 = vpack.c.bf16 %v3364_v19, %v3352_v47  ;;  %v5083_v26 = vpack.c.bf16 %v9307_v36, %v9306_v1  ;;  %v5085_v49 = vpack.c.bf16 %v9309_v57, %v9308_v58  ;;  %v3382_v12 = vand.u32 4294901760, %v3381_v21  ;;  %v9319_v57 = vld [vmem:[#allocation220_spill] sm:$0xff] }
 0x46e   :  { %5404 = vmatpush1.bf16.msra.mxu0 %v5403_v51  ;;  %5078 = vmatprep.subr.bf16.mxu1 %v5077_v30  ;;  %v3394_v59 = vand.u32 4294901760, %v3393_v24  ;;  %v3400_v30 = vand.u32 4294901760, %v3399_v53  ;;  %v3412_v51 = vand.u32 4294901760, %v3411_v10  ;;  %v9310_v50 = vand.u32 4294901760, %v9227_v31  ;;  %v9312_v10 = vld [vmem:[#allocation190_spill] sm:$0xff] }
 0x46f   :  { %5406 = vmatprep.subr.bf16.mxu0 %v5405_v2  ;;  %v9311_v27 = vand.u32 4294901760, %v9228_v38  ;;  %v5411_v2 = vpack.c.bf16 %v3370_v63, %v3358_v44  ;;  %v5413_v47 = vpack.c.bf16 %v3388_v25, %v3376_v15  ;;  %v3423_v24 = vsub.f32 %v9229_v56, %v8777_v4  ;;  %v9314_v63 = vld [vmem:[#allocation82_spill] sm:$0xff]  ;;  %v9316_v44 = vld [vmem:[#allocation87_spill] sm:$0xff] }
 0x470   :  { %v3405_v55 = vsub.f32 %v9227_v31, %v9310_v50  ;;  %v9315_v25 = vld [vmem:[#allocation86_spill] sm:$0xff]  ;;  %v9317_v4 = vand.u32 4294901760, %v9231_v54  ;;  %v9318_v53 = vand.u32 4294901760, %v9232_v40 }
 0x471   :  { %5080 = vmatpush1.bf16.msra.mxu1 %v5079_v5  ;;  %v3417_v33 = vsub.f32 %v9228_v38, %v9311_v27  ;;  %v3435_v5 = vsub.f32 %v9230_v0, %v8778_v61  ;;  %v5089_v50 = vpack.c.bf16 %v9316_v44, %v9315_v25  ;;  %v5417_v27 = vpack.c.bf16 %v3412_v51, %v3400_v30 }
 0x472   :  { %5408 = vmatpush1.bf16.msra.mxu0 %v5407_v60  ;;  %5082 = vmatprep.subr.bf16.mxu1 %v5081_v48  ;;  %v9313_v48 = vld [vmem:[#allocation81_spill] sm:$0xff]  ;;  %v3406_v21 = vand.u32 4294901760, %v3405_v55  ;;  %v3429_v61 = vsub.f32 %v9231_v54, %v9317_v4  ;;  %v3441_v60 = vsub.f32 %v9232_v40, %v9318_v53  ;;  %v9323_v4 = vld [vmem:[#allocation88_spill] sm:$0xff]  ;;  %v9325_v53 = vld [vmem:[#allocation90_spill] sm:$0xff] }
 0x473   :  { %5410 = vmatprep.subr.bf16.mxu0 %v5409_v8  ;;  %v5087_v15 = vpack.c.bf16 %v9314_v63, %v9313_v48  ;;  %v5415_v8 = vpack.c.bf16 %v3394_v59, %v3382_v12  ;;  %v3418_v19 = vand.u32 4294901760, %v3417_v33  ;;  %v9320_v48 = vld [vmem:[#allocation222_spill] sm:$0xff]  ;;  %v3436_v12 = vand.u32 4294901760, %v3435_v5  ;;  %v9324_v55 = vld [vmem:[#allocation89_spill] sm:$0xff]  ;;  %v9326_v63 = vld [vmem:[#allocation91_spill] sm:$0xff] }
 0x474   :  { %v8779_v58 = vand.u32 4294901760, %v9320_v48  ;;  %v9321_v59 = vand.u32 4294901760, %v9233_v11  ;;  %v5091_v33 = vpack.c.bf16 %v9324_v55, %v9323_v4  ;;  %v5093_v44 = vpack.c.bf16 %v9326_v63, %v9325_v53 }
 0x475   :  { %5084 = vmatpush1.bf16.msra.mxu1 %v5083_v26  ;;  %v3424_v26 = vand.u32 4294901760, %v3423_v24  ;;  %v3442_v24 = vand.u32 4294901760, %v3441_v60  ;;  %v9327_v5 = vand.u32 4294901760, %v9319_v57  ;;  %v9330_v60 = vld [vmem:[#allocation94_spill] sm:$0xff] }
 0x476   :  { %5412 = vmatpush1.bf16.msra.mxu0 %v5411_v2  ;;  %5086 = vmatprep.subr.bf16.mxu1 %v5085_v49  ;;  %v3447_v30 = vsub.f32 %v9233_v11, %v9321_v59  ;;  %v9322_v49 = vand.u32 4294901760, %v9312_v10  ;;  %v5419_v2 = vpack.c.bf16 %v3418_v19, %v3406_v21  ;;  %v9328_v19 = vld [vmem:[#allocation92_spill] sm:$0xff]  ;;  %v9329_v21 = vld [vmem:[#allocation93_spill] sm:$0xff] }
 0x477   :  { %5414 = vmatprep.subr.bf16.mxu0 %v5413_v47  ;;  %v3430_v47 = vand.u32 4294901760, %v3429_v61  ;;  %v3453_v59 = vsub.f32 %v9319_v57, %v9327_v5  ;;  %v5095_v63 = vpack.c.bf16 %v9329_v21, %v9328_v19 }
 0x478   :  { %v3459_v51 = vsub.f32 %v9312_v10, %v9322_v49  ;;  %v3465_v49 = vsub.f32 %v9320_v48, %v8779_v58  ;;  %v3448_v25 = vand.u32 4294901760, %v3447_v30  ;;  %v9332_v58 = vld [vmem:[#allocation96_spill] sm:$0xff]  ;;  %v9334_v30 = vld [vmem:[#allocation98_spill] sm:$0xff] }
 0x479   :  { %5088 = vmatpush1.bf16.msra.mxu1 %v5087_v15  ;;  %v5421_v15 = vpack.c.bf16 %v3436_v12, %v3424_v26  ;;  %v5423_v61 = vpack.c.bf16 %v3442_v24, %v3430_v47  ;;  %v3454_v53 = vand.u32 4294901760, %v3453_v59  ;;  %v9338_v24 = vld [vmem:[#allocation100_spill] sm:$0xff]  ;;  %v9339_v59 = vld [vmem:[#allocation101_spill] sm:$0xff] }
 0x47a   :  { %5416 = vmatpush1.bf16.msra.mxu0 %v5415_v8  ;;  %5090 = vmatprep.subr.bf16.mxu1 %v5089_v50  ;;  %v3460_v55 = vand.u32 4294901760, %v3459_v51  ;;  %v9331_v50 = vld [vmem:[#allocation95_spill] sm:$0xff]  ;;  %v3466_v5 = vand.u32 4294901760, %v3465_v49  ;;  %v5103_v49 = vpack.c.bf16 %v9339_v59, %v9338_v24  ;;  %v9349_v59 = vld [vmem:[#allocation200_spill] sm:$0xff] }
 0x47b   :  { %5418 = vmatprep.subr.bf16.mxu0 %v5417_v27  ;;  %v5097_v8 = vpack.c.bf16 %v9331_v50, %v9330_v60  ;;  %v9333_v27 = vld [vmem:[#allocation97_spill] sm:$0xff]  ;;  %v9335_v51 = vld [vmem:[#allocation99_spill] sm:$0xff] }
 0x47c   :  { %v5425_v4 = vpack.c.bf16 %v3460_v55, %v3448_v25  ;;  %v5099_v26 = vpack.c.bf16 %v9333_v27, %v9332_v58  ;;  %v5427_v12 = vpack.c.bf16 %v3466_v5, %v3454_v53  ;;  %v9341_v25 = vld [vmem:[#allocation113_spill] sm:$0xff]  ;;  %v9345_v5 = vld [vmem:[#allocation116_spill] sm:$0xff] }
 0x47d   :  { %5092 = vmatpush1.bf16.msra.mxu1 %v5091_v33  ;;  %v5101_v33 = vpack.c.bf16 %v9335_v51, %v9334_v30 }
 0x47e   :  { %5420 = vmatpush1.bf16.msra.mxu0 %v5419_v2  ;;  %5094 = vmatprep.subr.bf16.mxu1 %v5093_v44  ;;  %v9336_v44 = vld [vmem:[#allocation109_spill] sm:$0xff]  ;;  %v9337_v2 = vld [vmem:[#allocation110_spill] sm:$0xff] }
 0x47f   :  { %5422 = vmatprep.subr.bf16.mxu0 %v5421_v15  ;;  %v5429_v47 = vpack.c.bf16 %v9337_v2, %v9336_v44  ;;  %v9342_v15 = vld [vmem:[#allocation103_spill] sm:$0xff]  ;;  %v9347_v2 = vld [vmem:[#allocation106_spill] sm:$0xff] }
 0x481   :  { %5096 = vmatpush1.bf16.msra.mxu1 %v5095_v63  ;;  %v9340_v63 = vld [vmem:[#allocation112_spill] sm:$0xff] }
 0x482   :  { %5424 = vmatpush1.bf16.msra.mxu0 %v5423_v61  ;;  %5098 = vmatprep.subr.bf16.mxu1 %v5097_v8  ;;  %v5431_v55 = vpack.c.bf16 %v9341_v25, %v9340_v63  ;;  %v9343_v61 = vld [vmem:[#allocation104_spill] sm:$0xff]  ;;  %v9344_v8 = vld [vmem:[#allocation115_spill] sm:$0xff] }
 0x483   :  { %5426 = vmatprep.subr.bf16.mxu0 %v5425_v4  ;;  %v5105_v53 = vpack.c.bf16 %v9343_v61, %v9342_v15  ;;  %v5433_v51 = vpack.c.bf16 %v9345_v5, %v9344_v8  ;;  %v9346_v4 = vld [vmem:[#allocation223_spill] sm:$0xff]  ;;  %v9353_v61 = vld [vmem:[#allocation122_spill] sm:$0xff]  ;;  %v9354_v5 = vld [vmem:[#allocation121_spill] sm:$0xff] }
 0x484   :  { %v9355_v8 = vpack.c.bf16 %v9353_v61, %v9354_v5  ;;  %v9368_v61 = vld [vmem:[#allocation129_spill] sm:$0xff] }
 0x485   :  { %5100 = vmatpush1.bf16.msra.mxu1 %v5099_v26  ;;  %v9348_v26 = vld [vmem:[#allocation107_spill] sm:$0xff] }
 0x486   :  { %5428 = vmatpush1.bf16.msra.mxu0 %v5427_v12  ;;  %5102 = vmatprep.subr.bf16.mxu1 %v5101_v33  ;;  %v5107_v44 = vpack.c.bf16 %v9348_v26, %v9347_v2  ;;  %v9350_v12 = vld [vmem:[#allocation118_spill] sm:$0xff]  ;;  %v9351_v33 = vld [vmem:[#allocation119_spill] sm:$0xff]  ;;  %v9359_v26 = vld [vmem:[#allocation125_spill] sm:$0xff] }
 0x487   :  { %5430 = vmatprep.subr.bf16.mxu0 %v5429_v47  ;;  %v5435_v24 = vpack.c.bf16 %v9351_v33, %v9350_v12  ;;  %v9352_v47 = vld [vmem:[#allocation10_spill] sm:$0xff]  ;;  %v9360_v2 = vld [vmem:[#allocation124_spill] sm:$0xff] }
 0x488   :  { %v9361_v33 = vpack.c.bf16 %v9359_v26, %v9360_v2  ;;  %v9374_v26 = vld [vmem:[#allocation25_spill] sm:$0xff] }
 0x489   :  { %3471 = vmatmul.mubr.f32.vlgmr.msra.gmra.mrb[2].mxu0 %v9346_v4  ;;  %5104 = vmatpush1.bf16.msra.mxu1 %v5103_v49  ;;  %v9356_v49 = vld [vmem:[#allocation201_spill] sm:$0xff]  ;;  %v9357_v4 = vld [vmem:[#allocation14_spill] sm:$0xff] }
 0x48a   :  { %5432 = vmatpush1.bf16.msra.mxu0 %v5431_v55  ;;  %3671 = vmatprep.mubr.f32.mxu0 %v9349_v59  ;;  %v9358_v55 = vand.u32 4294901760, %v9244_v17  ;;  %v9371_v17 = vld [vmem:[#allocation134_spill] sm:$0xff] }
 0x48b   :  { %5106 = vmatprep.subr.bf16.mxu1 %v5105_v53  ;;  %5434 = vmatprep.subr.bf16.mxu0 %v5433_v51  ;;  %v9362_v51 = vld [vmem:[#allocation16_spill] sm:$0xff] }
 0x48d   :  { %5108 = vmatpush1.bf16.msra.mxu1 %v5107_v44  ;;  %v9363_v44 = vld [vmem:[#allocation128_spill] sm:$0xff] }
 0x48e   :  { %5436 = vmatpush1.bf16.msra.mxu0 %v5435_v24  ;;  %5110 = vmatprep.subr.bf16.mxu1 %v9352_v47  ;;  %v9364_v24 = vld [vmem:[#allocation126_spill] sm:$0xff]  ;;  %v9366_v47 = vld [vmem:[#allocation19_spill] sm:$0xff] }
 0x48f   :  { %5438 = vmatprep.subr.bf16.mxu0 %v9355_v8  ;;  %v9365_v53 = vpack.c.bf16 %v9363_v44, %v9364_v24  ;;  %v9367_v8 = vld [vmem:[#allocation131_spill] sm:$0xff]  ;;  %v9378_v44 = vld [vmem:[#allocation29_spill] sm:$0xff] }
 0x490   :  { %2390 = vmatmul.mubr.f32.vlgmr.msra.gmra.mrb[2].mxu1 %v9356_v49  ;;  %v9369_v5 = vpack.c.bf16 %v9367_v8, %v9368_v61  ;;  %v9381_v8 = vld [vmem:[#allocation37_spill] sm:$0xff] }
 0x491   :  { %5112 = vmatpush1.bf16.msra.mxu1 %v9357_v4  ;;  %2527 = vmatprep.mubr.f32.mxu1 %v9358_v55  ;;  %v9370_v4 = vld [vmem:[#allocation23_spill] sm:$0xff]  ;;  %v9372_v55 = vld [vmem:[#allocation132_spill] sm:$0xff] }
 0x492   :  { %5440 = vmatpush1.bf16.msra.mxu0 %v9361_v33  ;;  %5114 = vmatprep.subr.bf16.mxu1 %v9362_v51  ;;  %v9373_v12 = vpack.c.bf16 %v9371_v17, %v9372_v55  ;;  %v9375_v33 = vld [vmem:[#allocation137_spill] sm:$0xff]  ;;  %v9376_v51 = vld [vmem:[#allocation135_spill] sm:$0xff] }
 0x493   :  { %5442 = vmatprep.subr.bf16.mxu0 %v9365_v53  ;;  %v9377_v2 = vpack.c.bf16 %v9375_v33, %v9376_v51  ;;  %v9379_v53 = vld [vmem:[#allocation138_spill] sm:$0xff] }
 0x495   :  { %5116 = vmatpush1.bf16.msra.mxu1 %v9366_v47  ;;  %v9380_v47 = vpack.c.bf16 %v9203_v9, %v9379_v53 }
 0x496   :  { %5444 = vmatpush1.bf16.msra.mxu0 %v9369_v5  ;;  %5118 = vmatprep.subr.bf16.mxu1 %v9370_v4  ;;  %v9382_v5 = vpack.c.bf16 %v9205_v42, %v9204_v23  ;;  %v9383_v4 = vld [vmem:[#allocation38_spill] sm:$0xff] }
 0x497   :  { %5446 = vmatprep.subr.bf16.mxu0 %v9373_v12  ;;  %v9385_v12 = vld [vmem:[#allocation44_spill] sm:$0xff] }
 0x499   :  { %5120 = vmatpush1.bf16.msra.mxu1 %v9374_v26  ;;  %v9384_v26 = vpack.c.bf16 %v9207_v62, %v9206_v37 }
 0x49a   :  { %5448 = vmatpush1.bf16.msra.mxu0 %v9377_v2  ;;  %5122 = vmatprep.subr.bf16.mxu1 %v9378_v44  ;;  %v9386_v2 = vpack.c.bf16 %v9209_v34, %v9208_v28  ;;  %v9387_v44 = vld [vmem:[#allocation47_spill] sm:$0xff] }
 0x49b   :  { %5450 = vmatprep.subr.bf16.mxu0 %v9380_v47  ;;  %v9389_v47 = vld [vmem:[#allocation49_spill] sm:$0xff]  ;;  %v9395_v34 = vld [vmem:[#allocation51_spill] sm:$0xff] }
 0x49d   :  { %5124 = vmatpush1.bf16.msra.mxu1 %v9381_v8  ;;  %v9388_v8 = vpack.c.bf16 %v9211_v7, %v9210_v6  ;;  %v9399_v7 = vld [vmem:[#allocation52_spill] sm:$0xff] }
 0x49e   :  { %5452 = vmatpush1.bf16.msra.mxu0 %v9382_v5  ;;  %5126 = vmatprep.subr.bf16.mxu1 %v9383_v4  ;;  %v9390_v5 = vpack.c.bf16 %v9213_v35, %v9212_v32  ;;  %v9391_v4 = vld [vmem:[#allocation50_spill] sm:$0xff]  ;;  %v9402_v35 = vld [vmem:[#allocation53_spill] sm:$0xff] }
 0x49f   :  { %5454 = vmatprep.subr.bf16.mxu0 %v9384_v26  ;;  %v9392_v26 = vld [vmem:[#allocation168_spill] sm:$0xff] }
 0x4a1   :  { %5128 = vmatpush1.bf16.msra.mxu1 %v9385_v12  ;;  %v9393_v12 = vld [vmem:[#allocation161_spill] sm:$0xff] }
 0x4a2   :  { %5456 = vmatpush1.bf16.msra.mxu0 %v9386_v2  ;;  %5130 = vmatprep.subr.bf16.mxu1 %v9387_v44  ;;  %v9394_v62 = vpack.c.bf16 %v9392_v26, %v9393_v12  ;;  %v9396_v2 = vld [vmem:[#allocation174_spill] sm:$0xff]  ;;  %v9397_v44 = vld [vmem:[#allocation169_spill] sm:$0xff] }
 0x4a3   :  { %5458 = vmatprep.subr.bf16.mxu0 %v9388_v8  ;;  %v9398_v28 = vpack.c.bf16 %v9396_v2, %v9397_v44  ;;  %v9400_v8 = vld [vmem:[#allocation178_spill] sm:$0xff] }
 0x4a5   :  { %5132 = vmatpush1.bf16.msra.mxu1 %v9389_v47  ;;  %v9401_v47 = vpack.c.bf16 %v9265_v18, %v9400_v8  ;;  %v9409_v18 = vld [vmem:[#allocation65_spill] sm:$0xff] }
 0x4a6   :  { %5460 = vmatpush1.bf16.msra.mxu0 %v9390_v5  ;;  %5134 = vmatprep.subr.bf16.mxu1 %v9391_v4  ;;  %v9403_v5 = vpack.c.bf16 %v9273_v52, %v9272_v45  ;;  %v9404_v4 = vld [vmem:[#allocation58_spill] sm:$0xff] }
 0x4a7   :  { %5462 = vmatprep.subr.bf16.mxu0 %v9394_v62  ;;  %v9406_v62 = vld [vmem:[#allocation60_spill] sm:$0xff] }
 0x4a9   :  { %5136 = vmatpush1.bf16.msra.mxu1 %v9395_v34  ;;  %v9405_v34 = vpack.c.bf16 %v9279_v43, %v9278_v22 }
 0x4aa   :  { %5464 = vmatpush1.bf16.msra.mxu0 %v9398_v28  ;;  %5138 = vmatprep.subr.bf16.mxu1 %v9399_v7  ;;  %v9407_v7 = vld [vmem:[#allocation197_spill] sm:$0xff] }
 0x4ab   :  { %5466 = vmatprep.subr.bf16.mxu0 %v9401_v47  ;;  %v9408_v28 = vpack.c.bf16 %v9285_v39, %v9407_v7  ;;  %v9411_v47 = vld [vmem:[#allocation66_spill] sm:$0xff] }
 0x4ad   :  { %5140 = vmatpush1.bf16.msra.mxu1 %v9402_v35  ;;  %v9410_v35 = vpack.c.bf16 %v9290_v46, %v7188_v41 }
 0x4ae   :  { %5468 = vmatpush1.bf16.msra.mxu0 %v9403_v5  ;;  %5142 = vmatprep.subr.bf16.mxu1 %v9404_v4  ;;  %v9412_v5 = vpack.c.bf16 %v7218_v3, %v7201_v20  ;;  %v9413_v4 = vld [vmem:[#allocation68_spill] sm:$0xff]  ;;  %v9421_v3 = vld [vmem:[#allocation71_spill] sm:$0xff] }
 0x4af   :  { %5470 = vmatprep.subr.bf16.mxu0 %v9405_v34  ;;  %v9414_v34 = vpack.c.bf16 %v9297_v29, %v7224_v16 }
 0x4b1   :  { %5144 = vmatpush1.bf16.msra.mxu1 %v9406_v62  ;;  %v9415_v62 = vld [vmem:[#allocation69_spill] sm:$0xff] }
 0x4b2   :  { %5472 = vmatpush1.bf16.msra.mxu0 %v9408_v28  ;;  %5146 = vmatprep.subr.bf16.mxu1 %v9409_v18  ;;  %v9416_v18 = vpack.c.bf16 %v9224_v14, %v9223_v13  ;;  %v9417_v28 = vld [vmem:[#allocation70_spill] sm:$0xff] }
 0x4b3   :  { %5474 = vmatprep.subr.bf16.mxu0 %v9410_v35  ;;  %v9418_v35 = vld [vmem:[#allocation146_spill] sm:$0xff] }
 0x4b5   :  { %5148 = vmatpush1.bf16.msra.mxu1 %v9411_v47  ;;  %v9419_v47 = vld [vmem:[#allocation214_spill] sm:$0xff] }
 0x4b6   :  { %5476 = vmatpush1.bf16.msra.mxu0 %v9412_v5  ;;  %5150 = vmatprep.subr.bf16.mxu1 %v9413_v4  ;;  %v9420_v46 = vpack.c.bf16 %v9418_v35, %v9419_v47  ;;  %v9422_v5 = vpack.c.bf16 %v9228_v38, %v9227_v31  ;;  %v9423_v4 = vld [vmem:[#allocation72_spill] sm:$0xff] }
 0x4b7   :  { %5478 = vmatprep.subr.bf16.mxu0 %v9414_v34  ;;  %v9424_v34 = vpack.c.bf16 %v9230_v0, %v9229_v56  ;;  %v9446_v0 = vld [vmem:[#allocation15_spill] sm:$0xff] }
 0x4b9   :  { %5152 = vmatpush1.bf16.msra.mxu1 %v9415_v62  ;;  %v9425_v62 = vld [vmem:[#allocation73_spill] sm:$0xff] }
 0x4ba   :  { %5480 = vmatpush1.bf16.msra.mxu0 %v9416_v18  ;;  %5154 = vmatprep.subr.bf16.mxu1 %v9417_v28  ;;  %v9426_v18 = vpack.c.bf16 %v9232_v40, %v9231_v54  ;;  %v9427_v28 = vld [vmem:[#allocation74_spill] sm:$0xff]  ;;  %v9434_v40 = vld [vmem:[#allocation85_spill] sm:$0xff] }
 0x4bb   :  { %5482 = vmatprep.subr.bf16.mxu0 %v9420_v46  ;;  %v9429_v46 = vld [vmem:[#allocation83_spill] sm:$0xff] }
 0x4bd   :  { %5156 = vmatpush1.bf16.msra.mxu1 %v9421_v3  ;;  %v9428_v3 = vpack.c.bf16 %v9312_v10, %v9233_v11 }
 0x4be   :  { %5484 = vmatpush1.bf16.msra.mxu0 %v9422_v5  ;;  %5158 = vmatprep.subr.bf16.mxu1 %v9423_v4  ;;  %v9430_v5 = vpack.c.bf16 %v9320_v48, %v9319_v57  ;;  %v9431_v4 = vld [vmem:[#allocation84_spill] sm:$0xff]  ;;  %v9441_v48 = vld [vmem:[#allocation102_spill] sm:$0xff] }
 0x4bf   :  { %5486 = vmatprep.subr.bf16.mxu0 %v9424_v34  ;;  %v9432_v34 = vld [vmem:[#allocation108_spill] sm:$0xff] }
 0x4c1   :  { %5160 = vmatpush1.bf16.msra.mxu1 %v9425_v62  ;;  %v9433_v62 = vld [vmem:[#allocation224_spill] sm:$0xff] }
 0x4c2   :  { %5488 = vmatpush1.bf16.msra.mxu0 %v9426_v18  ;;  %5162 = vmatprep.subr.bf16.mxu1 %v9427_v28  ;;  %v9435_v18 = vld [vmem:[#allocation111_spill] sm:$0xff]  ;;  %v9436_v28 = vand.u32 4294901760, %v9349_v59  ;;  %v9449_v59 = vld [vmem:[#allocation17_spill] sm:$0xff] }
 0x4c3   :  { %5490 = vmatprep.subr.bf16.mxu0 %v9428_v3  ;;  %v9437_v3 = vld [vmem:[#allocation11_spill] sm:$0xff] }
 0x4c4   :  { %v9438_v10 = vand.u32 4294901760, %v9437_v3  ;;  %v9451_v3 = vld [vmem:[#allocation18_spill] sm:$0xff] }
 0x4c5   :  { %5164 = vmatpush1.bf16.msra.mxu1 %v9429_v46  ;;  %v9439_v46 = vld [vmem:[#allocation12_spill] sm:$0xff]  ;;  %v9452_v38 = vand.u32 4294901760, %v9451_v3 }
 0x4c6   :  { %5492 = vmatpush1.bf16.msra.mxu0 %v9430_v5  ;;  %5166 = vmatprep.subr.bf16.mxu1 %v9431_v4  ;;  %v9440_v11 = vand.u32 4294901760, %v9439_v46  ;;  %v9442_v5 = vld [vmem:[#allocation114_spill] sm:$0xff]  ;;  %v9443_v4 = vld [vmem:[#allocation105_spill] sm:$0xff]  ;;  %v9463_v3 = vld [vmem:[#allocation24_spill] sm:$0xff] }
 0x4c7   :  { %5494 = vmatprep.subr.bf16.mxu0 %v9432_v34  ;;  %v9444_v34 = vld [vmem:[#allocation13_spill] sm:$0xff] }
 0x4c8   :  { %v5173_v54 = vpack.c.bf16 %v9440_v11, %v9438_v10  ;;  %v9445_v57 = vand.u32 4294901760, %v9444_v34  ;;  %v9453_v11 = vld [vmem:[#allocation120_spill] sm:$0xff]  ;;  %v9454_v10 = vand.u32 4294901760, %v9356_v49  ;;  %v9466_v49 = vld [vmem:[#allocation26_spill] sm:$0xff] }
 0x4c9   :  { %3674 = vmatmul.mubr.f32.vlgmr.msra.gmra.mrb[2].mxu0 %v9433_v62  ;;  %5168 = vmatpush1.bf16.msra.mxu1 %v9434_v40  ;;  %v9447_v40 = vand.u32 4294901760, %v9446_v0  ;;  %v9456_v34 = vld [vmem:[#allocation20_spill] sm:$0xff]  ;;  %v9458_v0 = vld [vmem:[#allocation21_spill] sm:$0xff] }
 0x4ca   :  { %5496 = vmatpush1.bf16.msra.mxu0 %v9435_v18  ;;  %3811 = vmatprep.mubr.f32.mxu0 %v9436_v28  ;;  %v9448_v18 = vld [vmem:[#allocation117_spill] sm:$0xff]  ;;  %v9450_v28 = vand.u32 4294901760, %v9449_v59 }
 0x4cb   :  { %5170 = vmatprep.subr.bf16.mxu1 %v9441_v48  ;;  %5498 = vmatprep.subr.bf16.mxu0 %v9442_v5  ;;  %v5175_v56 = vpack.c.bf16 %v9447_v40, %v9445_v57  ;;  %v9455_v48 = vld [vmem:[#allocation198_spill] sm:$0xff]  ;;  %v9459_v57 = vand.u32 4294901760, %v9458_v0 }
 0x4cc   :  { %v5177_v46 = vpack.c.bf16 %v9452_v38, %v9450_v28  ;;  %v9464_v38 = vand.u32 4294901760, %v9463_v3 }
 0x4cd   :  { %5172 = vmatpush1.bf16.msra.mxu1 %v9443_v4  ;;  %v9457_v4 = vand.u32 4294901760, %v9456_v34  ;;  %v9470_v34 = vld [vmem:[#allocation130_spill] sm:$0xff] }
 0x4ce   :  { %5500 = vmatpush1.bf16.msra.mxu0 %v9448_v18  ;;  %5174 = vmatprep.subr.bf16.mxu1 %v5173_v54  ;;  %v9460_v18 = vld [vmem:[#allocation123_spill] sm:$0xff]  ;;  %v9461_v54 = vld [vmem:[#allocation22_spill] sm:$0xff] }
 0x4cf   :  { %5502 = vmatprep.subr.bf16.mxu0 %v9453_v11  ;;  %v5179_v40 = vpack.c.bf16 %v9459_v57, %v9457_v4  ;;  %v9462_v59 = vand.u32 4294901760, %v9461_v54  ;;  %v9465_v11 = vld [vmem:[#allocation127_spill] sm:$0xff]  ;;  %v9471_v4 = vld [vmem:[#allocation28_spill] sm:$0xff]  ;;  %v9473_v57 = vld [vmem:[#allocation30_spill] sm:$0xff] }
 0x4d0   :  { %2531 = vmatmul.mubr.f32.vlgmr.msra.gmra.mrb[2].mxu1 %v9454_v10  ;;  %v9468_v10 = vld [vmem:[#allocation27_spill] sm:$0xff]  ;;  %v9472_v0 = vand.u32 4294901760, %v9471_v4  ;;  %v9475_v54 = vld [vmem:[#allocation133_spill] sm:$0xff] }
 0x4d1   :  { %5176 = vmatpush1.bf16.msra.mxu1 %v5175_v56  ;;  %2794 = vmatprep.mubr.f32.mxu1 %v9455_v48  ;;  %v5181_v28 = vpack.c.bf16 %v9464_v38, %v9462_v59  ;;  %v9467_v56 = vand.u32 4294901760, %v9466_v49  ;;  %v9469_v48 = vand.u32 4294901760, %v9468_v10  ;;  %v9476_v59 = vld [vmem:[#allocation31_spill] sm:$0xff]  ;;  %v9478_v38 = vld [vmem:[#allocation32_spill] sm:$0xff] }
 0x4d2   :  { %5504 = vmatpush1.bf16.msra.mxu0 %v9460_v18  ;;  %5178 = vmatprep.subr.bf16.mxu1 %v5177_v46  ;;  %v9474_v46 = vand.u32 4294901760, %v9473_v57  ;;  %v9477_v3 = vand.u32 4294901760, %v9476_v59  ;;  %v9480_v49 = vld [vmem:[#allocation136_spill] sm:$0xff]  ;;  %v9485_v4 = vld [vmem:[#allocation139_spill] sm:$0xff] }
 0x4d3   :  { %5506 = vmatprep.subr.bf16.mxu0 %v9465_v11  ;;  %v5183_v5 = vpack.c.bf16 %v9469_v48, %v9467_v56  ;;  %v9481_v56 = vld [vmem:[#allocation33_spill] sm:$0xff]  ;;  %v9483_v48 = vld [vmem:[#allocation34_spill] sm:$0xff]  ;;  %v9490_v59 = vld [vmem:[#allocation143_spill] sm:$0xff] }
 0x4d4   :  { %v5185_v18 = vpack.c.bf16 %v9474_v46, %v9472_v0  ;;  %v9482_v10 = vand.u32 4294901760, %v9481_v56  ;;  %v9486_v0 = vld [vmem:[#allocation35_spill] sm:$0xff]  ;;  %v9488_v46 = vld [vmem:[#allocation36_spill] sm:$0xff] }
 0x4d5   :  { %5180 = vmatpush1.bf16.msra.mxu1 %v5179_v40  ;;  %v9479_v40 = vand.u32 4294901760, %v9478_v38  ;;  %v9487_v57 = vand.u32 4294901760, %v9486_v0  ;;  %v9495_v56 = vld [vmem:[#allocation147_spill] sm:$0xff] }
 0x4d6   :  { %5508 = vmatpush1.bf16.msra.mxu0 %v9470_v34  ;;  %5182 = vmatprep.subr.bf16.mxu1 %v5181_v28  ;;  %v9484_v28 = vand.u32 4294901760, %v9483_v48  ;;  %v9500_v0 = vld [vmem:[#allocation151_spill] sm:$0xff] }
 0x4d7   :  { %5510 = vmatprep.subr.bf16.mxu0 %v9475_v54  ;;  %v5187_v11 = vpack.c.bf16 %v9479_v40, %v9477_v3  ;;  %v9491_v3 = vld [vmem:[#allocation39_spill] sm:$0xff]  ;;  %v9493_v40 = vld [vmem:[#allocation40_spill] sm:$0xff] }
 0x4d8   :  { %v5189_v34 = vpack.c.bf16 %v9484_v28, %v9482_v10  ;;  %v9492_v38 = vand.u32 4294901760, %v9491_v3  ;;  %v9496_v10 = vld [vmem:[#allocation41_spill] sm:$0xff]  ;;  %v9498_v28 = vld [vmem:[#allocation42_spill] sm:$0xff]  ;;  %v9505_v3 = vld [vmem:[#allocation155_spill] sm:$0xff] }
 0x4d9   :  { %5184 = vmatpush1.bf16.msra.mxu1 %v5183_v5  ;;  %v9489_v5 = vand.u32 4294901760, %v9488_v46  ;;  %v9497_v48 = vand.u32 4294901760, %v9496_v10  ;;  %v9510_v10 = vld [vmem:[#allocation158_spill] sm:$0xff] }
 0x4da   :  { %5512 = vmatpush1.bf16.msra.mxu0 %v9480_v49  ;;  %5186 = vmatprep.subr.bf16.mxu1 %v5185_v18  ;;  %v9494_v18 = vand.u32 4294901760, %v9493_v40 }
 0x4db   :  { %5514 = vmatprep.subr.bf16.mxu0 %v9485_v4  ;;  %v5191_v54 = vpack.c.bf16 %v9489_v5, %v9487_v57  ;;  %v9501_v57 = vld [vmem:[#allocation43_spill] sm:$0xff]  ;;  %v9503_v5 = vld [vmem:[#allocation45_spill] sm:$0xff] }
 0x4dc   :  { %v5193_v49 = vpack.c.bf16 %v9494_v18, %v9492_v38  ;;  %v9502_v46 = vand.u32 4294901760, %v9501_v57  ;;  %v9506_v38 = vld [vmem:[#allocation46_spill] sm:$0xff]  ;;  %v9508_v18 = vld [vmem:[#allocation48_spill] sm:$0xff]  ;;  %v9515_v57 = vld [vmem:[#allocation163_spill] sm:$0xff] }
 0x4dd   :  { %5188 = vmatpush1.bf16.msra.mxu1 %v5187_v11  ;;  %v9499_v11 = vand.u32 4294901760, %v9498_v28  ;;  %v9507_v40 = vand.u32 4294901760, %v9506_v38  ;;  %v9520_v38 = vld [vmem:[#allocation173_spill] sm:$0xff] }
 0x4de   :  { %5516 = vmatpush1.bf16.msra.mxu0 %v9490_v59  ;;  %5190 = vmatprep.subr.bf16.mxu1 %v5189_v34  ;;  %v9504_v34 = vand.u32 4294901760, %v9503_v5 }
 0x4df   :  { %5518 = vmatprep.subr.bf16.mxu0 %v9495_v56  ;;  %v5195_v4 = vpack.c.bf16 %v9499_v11, %v9497_v48  ;;  %v9511_v48 = vld [vmem:[#allocation54_spill] sm:$0xff]  ;;  %v9513_v11 = vld [vmem:[#allocation55_spill] sm:$0xff] }
 0x4e0   :  { %v5197_v59 = vpack.c.bf16 %v9504_v34, %v9502_v46  ;;  %v9512_v28 = vand.u32 4294901760, %v9511_v48  ;;  %v9516_v46 = vld [vmem:[#allocation56_spill] sm:$0xff]  ;;  %v9518_v34 = vld [vmem:[#allocation57_spill] sm:$0xff] }
 0x4e1   :  { %5192 = vmatpush1.bf16.msra.mxu1 %v5191_v54  ;;  %v9509_v54 = vand.u32 4294901760, %v9508_v18  ;;  %v9517_v5 = vand.u32 4294901760, %v9516_v46  ;;  %v9525_v48 = vld [vmem:[#allocation185_spill] sm:$0xff]  ;;  %v9530_v46 = vld [vmem:[#allocation191_spill] sm:$0xff] }
 0x4e2   :  { %5520 = vmatpush1.bf16.msra.mxu0 %v9500_v0  ;;  %5194 = vmatprep.subr.bf16.mxu1 %v5193_v49  ;;  %v9514_v49 = vand.u32 4294901760, %v9513_v11 }
 0x4e3   :  { %5522 = vmatprep.subr.bf16.mxu0 %v9505_v3  ;;  %v5199_v56 = vpack.c.bf16 %v9509_v54, %v9507_v40  ;;  %v9521_v40 = vld [vmem:[#allocation61_spill] sm:$0xff]  ;;  %v9523_v54 = vld [vmem:[#allocation62_spill] sm:$0xff] }
 0x4e4   :  { %v5201_v0 = vpack.c.bf16 %v9514_v49, %v9512_v28  ;;  %v9522_v18 = vand.u32 4294901760, %v9521_v40  ;;  %v9526_v28 = vld [vmem:[#allocation63_spill] sm:$0xff]  ;;  %v9528_v49 = vld [vmem:[#allocation64_spill] sm:$0xff]  ;;  %v9535_v40 = vld [vmem:[#allocation194_spill] sm:$0xff] }
 0x4e5   :  { %5196 = vmatpush1.bf16.msra.mxu1 %v5195_v4  ;;  %v9519_v4 = vand.u32 4294901760, %v9518_v34  ;;  %v9527_v11 = vand.u32 4294901760, %v9526_v28  ;;  %v9539_v28 = vld [vmem:[#allocation79_spill] sm:$0xff] }
 0x4e6   :  { %5524 = vmatpush1.bf16.msra.mxu0 %v9510_v10  ;;  %5198 = vmatprep.subr.bf16.mxu1 %v5197_v59  ;;  %v9524_v59 = vand.u32 4294901760, %v9523_v54 }
 0x4e7   :  { %5526 = vmatprep.subr.bf16.mxu0 %v9515_v57  ;;  %v5203_v3 = vpack.c.bf16 %v9519_v4, %v9517_v5  ;;  %v9531_v5 = vld [vmem:[#allocation75_spill] sm:$0xff]  ;;  %v9533_v4 = vld [vmem:[#allocation76_spill] sm:$0xff] }
 0x4e8   :  { %v5205_v10 = vpack.c.bf16 %v9524_v59, %v9522_v18  ;;  %v9532_v34 = vand.u32 4294901760, %v9531_v5  ;;  %v9536_v18 = vand.u32 4294901760, %v9306_v1  ;;  %v9538_v59 = vld [vmem:[#allocation203_spill] sm:$0xff]  ;;  %v9543_v5 = vld [vmem:[#allocation205_spill] sm:$0xff] }
 0x4e9   :  { %5200 = vmatpush1.bf16.msra.mxu1 %v5199_v56  ;;  %v9529_v56 = vand.u32 4294901760, %v9528_v49  ;;  %v9541_v49 = vld [vmem:[#allocation80_spill] sm:$0xff]  ;;  %v9548_v1 = vld [vmem:[#allocation207_spill] sm:$0xff] }
 0x4ea   :  { %5528 = vmatpush1.bf16.msra.mxu0 %v9520_v38  ;;  %5202 = vmatprep.subr.bf16.mxu1 %v5201_v0  ;;  %v9534_v0 = vand.u32 4294901760, %v9533_v4 }
 0x4eb   :  { %5530 = vmatprep.subr.bf16.mxu0 %v9525_v48  ;;  %v5207_v57 = vpack.c.bf16 %v9529_v56, %v9527_v11  ;;  %v9540_v11 = vand.u32 4294901760, %v9539_v28  ;;  %v9553_v28 = vld [vmem:[#allocation209_spill] sm:$0xff] }
 0x4ec   :  { %v5209_v38 = vpack.c.bf16 %v9534_v0, %v9532_v34  ;;  %v9544_v34 = vld [vmem:[#allocation81_spill] sm:$0xff]  ;;  %v9546_v0 = vld [vmem:[#allocation82_spill] sm:$0xff] }
 0x4ed   :  { %5204 = vmatpush1.bf16.msra.mxu1 %v5203_v3  ;;  %v9537_v3 = vand.u32 4294901760, %v9307_v36  ;;  %v9545_v4 = vand.u32 4294901760, %v9544_v34  ;;  %v9549_v36 = vld [vmem:[#allocation86_spill] sm:$0xff]  ;;  %v9558_v34 = vld [vmem:[#allocation212_spill] sm:$0xff] }
 0x4ee   :  { %5532 = vmatpush1.bf16.msra.mxu0 %v9530_v46  ;;  %5206 = vmatprep.subr.bf16.mxu1 %v5205_v10  ;;  %v9542_v10 = vand.u32 4294901760, %v9541_v49 }
 0x4ef   :  { %5534 = vmatprep.subr.bf16.mxu0 %v9535_v40  ;;  %v5211_v54 = vpack.c.bf16 %v9537_v3, %v9536_v18  ;;  %v9550_v18 = vand.u32 4294901760, %v9549_v36  ;;  %v9551_v3 = vld [vmem:[#allocation87_spill] sm:$0xff]  ;;  %v9563_v36 = vld [vmem:[#allocation142_spill] sm:$0xff] }
 0x4f0   :  { %v5213_v56 = vpack.c.bf16 %v9542_v10, %v9540_v11  ;;  %v9554_v11 = vld [vmem:[#allocation88_spill] sm:$0xff]  ;;  %v9556_v10 = vld [vmem:[#allocation89_spill] sm:$0xff] }
 0x4f1   :  { %5208 = vmatpush1.bf16.msra.mxu1 %v5207_v57  ;;  %v9547_v57 = vand.u32 4294901760, %v9546_v0  ;;  %v9555_v49 = vand.u32 4294901760, %v9554_v11  ;;  %v9567_v11 = vand.u32 4294901760, %v9330_v60  ;;  %v9576_v60 = vld [vmem:[#allocation177_spill] sm:$0xff] }
 0x4f2   :  { %5536 = vmatpush1.bf16.msra.mxu0 %v9538_v59  ;;  %5210 = vmatprep.subr.bf16.mxu1 %v5209_v38  ;;  %v9552_v38 = vand.u32 4294901760, %v9551_v3 }
 0x4f3   :  { %5538 = vmatprep.subr.bf16.mxu0 %v9543_v5  ;;  %v5215_v40 = vpack.c.bf16 %v9547_v57, %v9545_v4  ;;  %v9559_v4 = vld [vmem:[#allocation90_spill] sm:$0xff]  ;;  %v9561_v57 = vld [vmem:[#allocation91_spill] sm:$0xff] }
 0x4f4   :  { %v5217_v59 = vpack.c.bf16 %v9552_v38, %v9550_v18  ;;  %v9560_v0 = vand.u32 4294901760, %v9559_v4  ;;  %v9564_v18 = vand.u32 4294901760, %v9328_v19  ;;  %v9566_v38 = vld [vmem:[#allocation148_spill] sm:$0xff]  ;;  %v9572_v19 = vld [vmem:[#allocation217_spill] sm:$0xff] }
 0x4f5   :  { %5212 = vmatpush1.bf16.msra.mxu1 %v5211_v54  ;;  %v9557_v54 = vand.u32 4294901760, %v9556_v10  ;;  %v9569_v10 = vld [vmem:[#allocation156_spill] sm:$0xff] }
 0x4f6   :  { %5540 = vmatpush1.bf16.msra.mxu0 %v9548_v1  ;;  %5214 = vmatprep.subr.bf16.mxu1 %v5213_v56  ;;  %v9562_v56 = vand.u32 4294901760, %v9561_v57 }
 0x4f7   :  { %5542 = vmatprep.subr.bf16.mxu0 %v9553_v28  ;;  %v5219_v5 = vpack.c.bf16 %v9557_v54, %v9555_v49  ;;  %v9570_v54 = vand.u32 4294901760, %v9332_v58  ;;  %v9581_v58 = vld [vmem:[#allocation100_spill] sm:$0xff] }
 0x4f8   :  { %v5221_v1 = vpack.c.bf16 %v9562_v56, %v9560_v0  ;;  %v9574_v0 = vld [vmem:[#allocation99_spill] sm:$0xff] }
 0x4f9   :  { %5216 = vmatpush1.bf16.msra.mxu1 %v5215_v40  ;;  %v9565_v40 = vand.u32 4294901760, %v9329_v21  ;;  %v9573_v21 = vand.u32 4294901760, %v9334_v30  ;;  %v9586_v30 = vand.u32 4294901760, %v9340_v63 }
 0x4fa   :  { %5544 = vmatpush1.bf16.msra.mxu0 %v9558_v34  ;;  %5218 = vmatprep.subr.bf16.mxu1 %v5217_v59  ;;  %v9568_v59 = vand.u32 4294901760, %v9331_v50  ;;  %v9577_v50 = vld [vmem:[#allocation109_spill] sm:$0xff] }
 0x4fb   :  { %5546 = vmatprep.subr.bf16.mxu0 %v9563_v36  ;;  %v5223_v3 = vpack.c.bf16 %v9565_v40, %v9564_v18  ;;  %v9578_v56 = vand.u32 4294901760, %v9577_v50  ;;  %v9579_v18 = vld [vmem:[#allocation110_spill] sm:$0xff] }
 0x4fc   :  { %v5225_v49 = vpack.c.bf16 %v9568_v59, %v9567_v11  ;;  %v9580_v40 = vand.u32 4294901760, %v9579_v18  ;;  %v9582_v11 = vand.u32 4294901760, %v9581_v58 }
 0x4fd   :  { %5220 = vmatpush1.bf16.msra.mxu1 %v5219_v5  ;;  %v9571_v5 = vand.u32 4294901760, %v9333_v27  ;;  %v9583_v27 = vld [vmem:[#allocation101_spill] sm:$0xff] }
 0x4fe   :  { %5548 = vmatpush1.bf16.msra.mxu0 %v9566_v38  ;;  %5222 = vmatprep.subr.bf16.mxu1 %v5221_v1  ;;  %v9575_v1 = vand.u32 4294901760, %v9574_v0  ;;  %v9584_v59 = vand.u32 4294901760, %v9583_v27  ;;  %v9588_v0 = vand.u32 4294901760, %v9342_v15  ;;  %v9601_v15 = vld [vmem:[#allocation118_spill] sm:$0xff] }
 0x4ff   :  { %5550 = vmatprep.subr.bf16.mxu0 %v9569_v10  ;;  %v5227_v4 = vpack.c.bf16 %v9571_v5, %v9570_v54  ;;  %v9585_v5 = vld [vmem:[#allocation221_spill] sm:$0xff] }
 0x500   :  { %v5229_v57 = vpack.c.bf16 %v9575_v1, %v9573_v21  ;;  %v5231_v54 = vpack.c.bf16 %v9584_v59, %v9582_v11  ;;  %v9589_v1 = vld [vmem:[#allocation104_spill] sm:$0xff]  ;;  %v9595_v11 = vand.u32 4294901760, %v9433_v62  ;;  %v9598_v59 = vld [vmem:[#allocation107_spill] sm:$0xff]  ;;  %v9607_v62 = vld [vmem:[#allocation122_spill] sm:$0xff] }
 0x501   :  { %5224 = vmatpush1.bf16.msra.mxu1 %v5223_v3  ;;  %v5557_v3 = vpack.c.bf16 %v9580_v40, %v9578_v56  ;;  %v9590_v50 = vand.u32 4294901760, %v9589_v1  ;;  %v9593_v40 = vld [vmem:[#allocation116_spill] sm:$0xff] }
 0x502   :  { %5552 = vmatpush1.bf16.msra.mxu0 %v9572_v19  ;;  %5226 = vmatprep.subr.bf16.mxu1 %v5225_v49  ;;  %v9587_v49 = vand.u32 4294901760, %v9341_v25  ;;  %v9594_v58 = vand.u32 4294901760, %v9593_v40  ;;  %v9599_v25 = vand.u32 4294901760, %v9598_v59  ;;  %v9608_v40 = vand.u32 4294901760, %v9607_v62 }
 0x503   :  { %5554 = vmatprep.subr.bf16.mxu0 %v9576_v60  ;;  %v5233_v56 = vpack.c.bf16 %v9590_v50, %v9588_v0  ;;  %v9603_v0 = vld [vmem:[#allocation119_spill] sm:$0xff]  ;;  %v9613_v59 = vand.u32 4294901760, %v9364_v24  ;;  %v9622_v24 = vand.u32 4294901760, %v9376_v51  ;;  %v9623_v62 = vand.u32 4294901760, %v9375_v33  ;;  %v9631_v33 = vld [vmem:[#allocation150_spill] sm:$0xff] }
 0x504   :  { %v5559_v21 = vpack.c.bf16 %v9587_v49, %v9586_v30  ;;  %v9602_v49 = vand.u32 4294901760, %v9601_v15  ;;  %v9604_v1 = vand.u32 4294901760, %v9603_v0  ;;  %v9618_v0 = vld [vmem:[#allocation131_spill] sm:$0xff] }
 0x505   :  { %5228 = vmatpush1.bf16.msra.mxu1 %v5227_v4  ;;  %v9591_v4 = vld [vmem:[#allocation115_spill] sm:$0xff] }
 0x506   :  { %5556 = vmatpush1.bf16.msra.mxu0 %v9585_v5  ;;  %5230 = vmatprep.subr.bf16.mxu1 %v5229_v57  ;;  %v9592_v18 = vand.u32 4294901760, %v9591_v4  ;;  %v9596_v57 = vld [vmem:[#allocation106_spill] sm:$0xff]  ;;  %v5563_v50 = vpack.c.bf16 %v9604_v1, %v9602_v49  ;;  %v9605_v4 = vld [vmem:[#allocation121_spill] sm:$0xff]  ;;  %v9619_v1 = vand.u32 4294901760, %v9618_v0 }
 0x507   :  { %5558 = vmatprep.subr.bf16.mxu0 %v5557_v3  ;;  %v9597_v63 = vand.u32 4294901760, %v9596_v57  ;;  %v9600_v3 = vld [vmem:[#allocation195_spill] sm:$0xff]  ;;  %v9611_v57 = vld [vmem:[#allocation125_spill] sm:$0xff] }
 0x508   :  { %v5561_v27 = vpack.c.bf16 %v9594_v58, %v9592_v18  ;;  %v9606_v18 = vand.u32 4294901760, %v9605_v4  ;;  %v9609_v58 = vld [vmem:[#allocation124_spill] sm:$0xff]  ;;  %v9621_v4 = vand.u32 4294901760, %v9371_v17  ;;  %v9628_v17 = vand.u32 4294901760, %v9206_v37 }
 0x509   :  { %3815 = vmatmul.mubr.f32.vlgmr.msra.gmra.mrb[2].mxu0 %v9595_v11  ;;  %5232 = vmatpush1.bf16.msra.mxu1 %v5231_v54  ;;  %v5235_v30 = vpack.c.bf16 %v9599_v25, %v9597_v63  ;;  %v9610_v11 = vand.u32 4294901760, %v9609_v58  ;;  %v9614_v25 = vld [vmem:[#allocation128_spill] sm:$0xff] }
 0x50a   :  { %5560 = vmatpush1.bf16.msra.mxu0 %v5559_v21  ;;  %4078 = vmatprep.mubr.f32.mxu0 %v9600_v3  ;;  %v5565_v54 = vpack.c.bf16 %v9608_v40, %v9606_v18  ;;  %v9612_v21 = vand.u32 4294901760, %v9611_v57  ;;  %v9615_v15 = vand.u32 4294901760, %v9614_v25  ;;  %v5575_v40 = vpack.c.bf16 %v9623_v62, %v9622_v24  ;;  %v9633_v25 = vld [vmem:[#allocation152_spill] sm:$0xff] }
 0x50b   :  { %5234 = vmatprep.subr.bf16.mxu1 %v5233_v56  ;;  %5562 = vmatprep.subr.bf16.mxu0 %v5561_v27  ;;  %v9616_v56 = vld [vmem:[#allocation199_spill] sm:$0xff]  ;;  %v9617_v27 = vand.u32 4294901760, %v9368_v61  ;;  %v9625_v61 = vand.u32 4294901760, %v9203_v9  ;;  %v9635_v9 = vand.u32 4294901760, %v9210_v6  ;;  %v9644_v6 = vand.u32 4294901760, %v9396_v2  ;;  %v9646_v62 = vld [vmem:[#allocation188_spill] sm:$0xff] }
 0x50c   :  { %v5567_v63 = vpack.c.bf16 %v9612_v21, %v9610_v11  ;;  %v5569_v49 = vpack.c.bf16 %v9615_v15, %v9613_v59  ;;  %v9626_v11 = vand.u32 4294901760, %v9204_v23  ;;  %v9629_v21 = vld [vmem:[#allocation149_spill] sm:$0xff]  ;;  %v9632_v59 = vand.u32 4294901760, %v9631_v33 }
 0x50d   :  { %5236 = vmatpush1.bf16.msra.mxu1 %v5235_v30  ;;  %v5571_v30 = vpack.c.bf16 %v9619_v1, %v9617_v27  ;;  %v9630_v51 = vand.u32 4294901760, %v9629_v21  ;;  %v9639_v27 = vld [vmem:[#allocation160_spill] sm:$0xff]  ;;  %v9641_v1 = vand.u32 4294901760, %v9393_v12  ;;  %v9645_v24 = vand.u32 4294901760, %v9400_v8 }
 0x50e   :  { %5564 = vmatpush1.bf16.msra.mxu0 %v5563_v50  ;;  %v9620_v50 = vand.u32 4294901760, %v9372_v55  ;;  %v9627_v55 = vand.u32 4294901760, %v9205_v42  ;;  %v9638_v42 = vand.u32 4294901760, %v9212_v32  ;;  %v9640_v37 = vand.u32 4294901760, %v9639_v27  ;;  %v9658_v21 = vld [vmem:[#allocation208_spill] sm:$0xff]  ;;  %v9675_v27 = vld [vmem:[#allocation218_spill] sm:$0xff] }
 0x50f   :  { %5566 = vmatprep.subr.bf16.mxu0 %v5565_v54  ;;  %v9624_v54 = vand.u32 4294901760, %v9379_v53  ;;  %v9634_v53 = vand.u32 4294901760, %v9633_v25  ;;  %v9647_v32 = vand.u32 4294901760, %v9646_v62  ;;  %v9649_v12 = vand.u32 4294901760, %v9273_v52  ;;  %v9685_v62 = vld [vmem:[#allocation108_spill] sm:$0xff] }
 0x510   :  { %2796 = vmatmul.mubr.f32.vlgmr.msra.gmra.mrb[2].mxu1 %v9616_v56  ;;  %v5573_v18 = vpack.c.bf16 %v9621_v4, %v9620_v50  ;;  %v5579_v57 = vpack.c.bf16 %v9627_v55, %v9626_v11  ;;  %v5587_v0 = vpack.c.bf16 %v9640_v37, %v9638_v42  ;;  %v9643_v4 = vand.u32 4294901760, %v9397_v44 }
 0x511   :  { %v5577_v58 = vpack.c.bf16 %v9625_v61, %v9624_v54  ;;  %v5583_v15 = vpack.c.bf16 %v9634_v53, %v9632_v59  ;;  %v9648_v54 = vand.u32 4294901760, %v9272_v45  ;;  %v9651_v44 = vand.u32 4294901760, %v9279_v43 }
 0x512   :  { %5568 = vmatpush1.bf16.msra.mxu0 %v5567_v63  ;;  %v5581_v63 = vpack.c.bf16 %v9630_v51, %v9628_v17  ;;  %v9652_v2 = vand.u32 4294901760, %v9407_v7  ;;  %v9653_v8 = vand.u32 4294901760, %v9285_v39  ;;  %v9654_v55 = vand.u32 4294901760, %v7188_v41 }
 0x513   :  { %5570 = vmatprep.subr.bf16.mxu0 %v5569_v49  ;;  %v9636_v49 = vld [vmem:[#allocation157_spill] sm:$0xff]  ;;  %v5595_v61 = vpack.c.bf16 %v9649_v12, %v9648_v54  ;;  %v9657_v52 = vand.u32 4294901760, %v7201_v20  ;;  %v9660_v43 = vand.u32 4294901760, %v7224_v16  ;;  %v9661_v7 = vand.u32 4294901760, %v9297_v29  ;;  %v9669_v29 = vld [vmem:[#allocation216_spill] sm:$0xff]  ;;  %v9688_v54 = vld [vmem:[#allocation114_spill] sm:$0xff] }
 0x514   :  { %v9637_v23 = vand.u32 4294901760, %v9636_v49  ;;  %v5599_v11 = vpack.c.bf16 %v9653_v8, %v9652_v2  ;;  %v9662_v39 = vand.u32 4294901760, %v9223_v13  ;;  %v9663_v41 = vand.u32 4294901760, %v9224_v14  ;;  %v9673_v14 = vld [vmem:[#allocation172_spill] sm:$0xff]  ;;  %v9689_v12 = vld [vmem:[#allocation117_spill] sm:$0xff] }
 0x515   :  { %v9664_v59 = vand.u32 4294901760, %v9419_v47  ;;  %v9665_v20 = vand.u32 4294901760, %v9418_v35  ;;  %v9666_v53 = vand.u32 4294901760, %v9227_v31  ;;  %v9670_v49 = vand.u32 4294901760, %v9669_v29  ;;  %v9677_v35 = vld [vmem:[#allocation219_spill] sm:$0xff]  ;;  %v9694_v2 = vld [vmem:[#allocation133_spill] sm:$0xff] }
 0x516   :  { %5572 = vmatpush1.bf16.msra.mxu0 %v5571_v30  ;;  %v5585_v56 = vpack.c.bf16 %v9637_v23, %v9635_v9  ;;  %v9642_v30 = vand.u32 4294901760, %v9392_v26  ;;  %v9650_v26 = vand.u32 4294901760, %v9278_v22  ;;  %v9659_v22 = vand.u32 4294901760, %v9658_v21  ;;  %v9671_v23 = vld [vmem:[#allocation162_spill] sm:$0xff]  ;;  %v9695_v8 = vld [vmem:[#allocation136_spill] sm:$0xff]  ;;  %v9703_v21 = vld [vmem:[#allocation173_spill] sm:$0xff] }
 0x517   :  { %5574 = vmatprep.subr.bf16.mxu0 %v5573_v18  ;;  %v5591_v18 = vpack.c.bf16 %v9644_v6, %v9643_v4  ;;  %v5607_v33 = vpack.c.bf16 %v9663_v41, %v9662_v39  ;;  %v5609_v25 = vpack.c.bf16 %v9665_v20, %v9664_v59  ;;  %v9672_v13 = vand.u32 4294901760, %v9671_v23  ;;  %v9683_v6 = vld [vmem:[#allocation222_spill] sm:$0xff]  ;;  %v9708_v29 = vld [vmem:[#allocation9_spill] sm:$0xff] }
 0x518   :  { %v5589_v50 = vpack.c.bf16 %v9642_v30, %v9641_v1  ;;  %v5603_v51 = vpack.c.bf16 %v9659_v22, %v9657_v52  ;;  %v9674_v42 = vand.u32 4294901760, %v9673_v14  ;;  %v9676_v47 = vand.u32 4294901760, %v9675_v27  ;;  %v9679_v1 = vld [vmem:[#allocation190_spill] sm:$0xff]  ;;  %v9702_v52 = vld [vmem:[#allocation163_spill] sm:$0xff] }
 0x519   :  { %v9680_v31 = vand.u32 4294901760, %v9679_v1  ;;  %v9704_v22 = vld [vmem:[#allocation194_spill] sm:$0xff] }
 0x51a   :  { %5576 = vmatpush1.bf16.msra.mxu0 %v5575_v40  ;;  %v5593_v40 = vpack.c.bf16 %v9647_v32, %v9645_v24  ;;  %v5615_v37 = vpack.c.bf16 %v9676_v47, %v9674_v42  ;;  %v9686_v32 = vld [vmem:[#allocation223_spill] sm:$0xff] }
 0x51b   :  { %5578 = vmatprep.subr.bf16.mxu0 %v5577_v58  ;;  %v5597_v58 = vpack.c.bf16 %v9651_v44, %v9650_v26  ;;  %v9691_v26 = vld [vmem:[#allocation123_spill] sm:$0xff] }
 0x51c   :  { %v9692_v44 = vld [vmem:[#allocation127_spill] sm:$0xff] }
 0x51d   :  { %v9709_v47 = vld [vmem:[#allocation59_spill] sm:$0xff] }
 0x51e   :  { %5580 = vmatpush1.bf16.msra.mxu0 %v5579_v57  ;;  %v9655_v57 = vld [vmem:[#allocation206_spill] sm:$0xff] }
 0x51f   :  { %5582 = vmatprep.subr.bf16.mxu0 %v5581_v63  ;;  %v9656_v45 = vand.u32 4294901760, %v9655_v57  ;;  %v5605_v63 = vpack.c.bf16 %v9661_v7, %v9660_v43  ;;  %v9699_v57 = vld [vmem:[#allocation151_spill] sm:$0xff]  ;;  %v9706_v43 = vld [vmem:[#allocation205_spill] sm:$0xff] }
 0x520   :  { %v9707_v7 = vld [vmem:[#allocation207_spill] sm:$0xff] }
 0x521   :  { %v5601_v17 = vpack.c.bf16 %v9656_v45, %v9654_v55  ;;  %v9697_v55 = vld [vmem:[#allocation143_spill] sm:$0xff] }
 0x522   :  { %5584 = vmatpush1.bf16.msra.mxu0 %v5583_v15  ;;  %v9667_v15 = vld [vmem:[#allocation154_spill] sm:$0xff]  ;;  %v9700_v45 = vld [vmem:[#allocation155_spill] sm:$0xff] }
 0x523   :  { %5586 = vmatprep.subr.bf16.mxu0 %v5585_v56  ;;  %v9668_v16 = vand.u32 4294901760, %v9667_v15  ;;  %v5613_v56 = vpack.c.bf16 %v9672_v13, %v9670_v49 }
 0x525   :  { %v5611_v9 = vpack.c.bf16 %v9668_v16, %v9666_v53  ;;  %v5819_v53 = vmov 1966171168  }
 0x526   :  { %5588 = vmatpush1.bf16.msra.mxu0 %v5587_v0  ;;  %v9678_v0 = vand.u32 4294901760, %v9677_v35  ;;  %v4239_v15 = vunpack.c.l.s4 %v5819_v53  ;;  %v9710_v35 = vld [vmem:[#allocation67_spill] sm:$0xff] }
 0x527   :  { %5590 = vmatprep.subr.bf16.mxu0 %v5589_v50  ;;  %v9681_v50 = vld [vmem:[#allocation220_spill] sm:$0xff] }
 0x528   :  { %v5617_v30 = vpack.c.bf16 %v9680_v31, %v9678_v0  ;;  %v9682_v4 = vand.u32 4294901760, %v9681_v50  ;;  %v4240_v16 = vunpack.c.0.s8 %v4239_v15 }
 0x52a   :  { %5592 = vmatpush1.bf16.msra.mxu0 %v5591_v18  ;;  %v9684_v18 = vand.u32 4294901760, %v9683_v6  ;;  %v4243_v49 = vsub.s32 %v4240_v16, %v9708_v29 }
 0x52b   :  { %5594 = vmatprep.subr.bf16.mxu0 %v5593_v40  ;;  %v9687_v40 = vld [vmem:[#allocation111_spill] sm:$0xff] }
 0x52c   :  { %v5619_v24 = vpack.c.bf16 %v9684_v18, %v9682_v4  ;;  %v9712_v4 = vld [vmem:[#allocation167_spill] sm:$0xff]  ;;  %v9713_v18 = vld [vmem:[#allocation164_spill] sm:$0xff] }
 0x52e   :  { %5596 = vmatpush1.bf16.msra.mxu0 %v5595_v61  ;;  %v9690_v61 = vld [vmem:[#allocation120_spill] sm:$0xff] }
 0x52f   :  { %5598 = vmatprep.subr.bf16.mxu0 %v5597_v58  ;;  %v9693_v58 = vld [vmem:[#allocation130_spill] sm:$0xff] }
 0x532   :  { %5600 = vmatpush1.bf16.msra.mxu0 %v5599_v11  ;;  %v9696_v11 = vld [vmem:[#allocation139_spill] sm:$0xff] }
 0x533   :  { %5602 = vmatprep.subr.bf16.mxu0 %v5601_v17  ;;  %v9701_v17 = vld [vmem:[#allocation158_spill] sm:$0xff] }
 0x536   :  { %5604 = vmatpush1.bf16.msra.mxu0 %v5603_v51  ;;  %v9705_v51 = vld [vmem:[#allocation203_spill] sm:$0xff] }
 0x537   :  { %5606 = vmatprep.subr.bf16.mxu0 %v5605_v63 }
 0x53a   :  { %5608 = vmatpush1.bf16.msra.mxu0 %v5607_v33 }
 0x53b   :  { %5610 = vmatprep.subr.bf16.mxu0 %v5609_v25 }
 0x53e   :  { %5612 = vmatpush1.bf16.msra.mxu0 %v5611_v9 }
 0x53f   :  { %5614 = vmatprep.subr.bf16.mxu0 %v5613_v56 }
 0x542   :  { %5616 = vmatpush1.bf16.msra.mxu0 %v5615_v37 }
 0x543   :  { %5618 = vmatprep.subr.bf16.mxu0 %v5617_v30  ;;  %v9711_v30 = vld [vmem:[#allocation166_spill] sm:$0xff] }
 0x546   :  { %5620 = vmatpush1.bf16.msra.mxu0 %v5619_v24 }
 0x547   :  { %5622 = vmatprep.subr.bf16.mxu0 %v9685_v62  ;;  %v9714_v62 = vld [vmem:[#allocation165_spill] sm:$0xff] }
 0x549   :  { %4080 = vmatmul.mubr.f32.vlgmr.msra.gmra.mrb[2].mxu0 %v9686_v32 }
 0x54a   :  { %5624 = vmatpush1.bf16.msra.mxu0 %v9687_v40  ;;  %4215 = vmatprep.mubr.f32.mxu0 %v9600_v3  ;;  %v9698_v3 = vld [vmem:[#allocation147_spill] sm:$0xff]  ;;  %v9715_v40 = vld [vmem:[#allocation170_spill] sm:$0xff] }
 0x54b   :  { %5626 = vmatprep.subr.bf16.mxu0 %v9688_v54 }
 0x54e   :  { %5628 = vmatpush1.bf16.msra.mxu0 %v9689_v12  ;;  %v9716_v12 = vld [vmem:[#allocation171_spill] sm:$0xff] }
 0x54f   :  { %5630 = vmatprep.subr.bf16.mxu0 %v9690_v61 }
 0x552   :  { %5632 = vmatpush1.bf16.msra.mxu0 %v9691_v26  ;;  %v9717_v26 = vld [vmem:[#allocation175_spill] sm:$0xff] }
 0x553   :  { %5634 = vmatprep.subr.bf16.mxu0 %v9692_v44 }
 0x556   :  { %5636 = vmatpush1.bf16.msra.mxu0 %v9693_v58  ;;  %v9718_v58 = vld [vmem:[#allocation176_spill] sm:$0xff] }
 0x557   :  { %5638 = vmatprep.subr.bf16.mxu0 %v9694_v2 }
 0x55a   :  { %5640 = vmatpush1.bf16.msra.mxu0 %v9695_v8  ;;  %v9719_v8 = vld [vmem:[#allocation181_spill] sm:$0xff] }
 0x55b   :  { %5642 = vmatprep.subr.bf16.mxu0 %v9696_v11 }
 0x55e   :  { %5644 = vmatpush1.bf16.msra.mxu0 %v9697_v55  ;;  %v9720_v55 = vld [vmem:[#allocation182_spill] sm:$0xff] }
 0x55f   :  { %5646 = vmatprep.subr.bf16.mxu0 %v9698_v3 }
 0x562   :  { %5648 = vmatpush1.bf16.msra.mxu0 %v9699_v57  ;;  %v9721_v57 = vld [vmem:[#allocation179_spill] sm:$0xff] }
 0x563   :  { %5650 = vmatprep.subr.bf16.mxu0 %v9700_v45 }
 0x566   :  { %5652 = vmatpush1.bf16.msra.mxu0 %v9701_v17  ;;  %v9722_v17 = vld [vmem:[#allocation180_spill] sm:$0xff] }
 0x567   :  { %5654 = vmatprep.subr.bf16.mxu0 %v9702_v52 }
 0x56a   :  { %5656 = vmatpush1.bf16.msra.mxu0 %v9703_v21  ;;  %v9723_v21 = vld [vmem:[#allocation183_spill] sm:$0xff] }
 0x56b   :  { %5658 = vmatprep.subr.bf16.mxu0 %v9525_v48 }
 0x56e   :  { %5660 = vmatpush1.bf16.msra.mxu0 %v9530_v46 }
 0x56f   :  { %5662 = vmatprep.subr.bf16.mxu0 %v9704_v22 }
 0x572   :  { %5664 = vmatpush1.bf16.msra.mxu0 %v9705_v51  ;;  %v9724_v51 = vld [vmem:[#allocation184_spill] sm:$0xff] }
 0x573   :  { %5666 = vmatprep.subr.bf16.mxu0 %v9706_v43 }
 0x576   :  { %5668 = vmatpush1.bf16.msra.mxu0 %v9707_v7  ;;  %v9725_v7 = vld [vmem:[#allocation186_spill] sm:$0xff] }
 0x577   :  { %5670 = vmatprep.subr.bf16.mxu0 %v9553_v28  ;;  %v1654_v28 = vstv %s8379_s4  ;;  %s5820_s4 = smov [#allocation6]  }
 0x578   :  { %s4317_s11 = sshll.u32 %s5820_s4, 4  ;;  %s4318_s11 = int_to_ptr.vmem [resolvable:$true] %s4317_s11 }
 0x579   :  { %s5787_s12 = scalar_lea.vmem %s4318_s11, 2048  ;;  %p5792_p9 = scmp.lt.s32.totalorder %s4318_s11, %s4318_s11 }
 0x57a   :  { %5672 = vmatpush1.bf16.msra.mxu0 %v9558_v34  ;;  %p5788_p8 = scmp.ne.s32.totalorder %s4318_s11, %s5787_s12  ;;  %p5793_p10 = scmp.lt.s32.totalorder %s5787_s12, %s5787_s12 }
 0x57b   :  { %5674 = vmatprep.subr.bf16.mxu0 %v9563_v36 }
 0x57c   :  { %p5794_p11 = por %p5793_p10, %p5792_p9 }
 0x57e   :  { %5676 = vmatpush1.bf16.msra.mxu0 %v9566_v38  ;;  %p5795_p12 = pnand %p5794_p11, %p5788_p8 }
 0x57f   :  { %5678 = vmatprep.subr.bf16.mxu0 %v9569_v10 }
 0x582   :  { %5680 = vmatpush1.bf16.msra.mxu0 %v9572_v19 }
 0x583   :  { %5682 = vmatprep.subr.bf16.mxu0 %v9576_v60 }
 0x586   :  { %5684 = vmatpush1.bf16.msra.mxu0 %v9585_v5 }
 0x589   :  { %4217 = vmatmul.mubr.f32.vlgmr.msra.gmra.mrb[2].mxu0 %v9686_v32 }
 0x5e3   :  { %v2797_v48 = vpop.f32.mrb[2].mxu1 }
 0x5e4   :  { %v2799_v46 = vpop.f32.mrb[3].mxu1  ;;  %v5685_v34 = vadd.f32 %v2797_v48, %v1654_v28 }
 0x5e5   :  { %v5687_v36 = vadd.f32 %v2799_v46, %v1654_v28  ;;  %v9726_v46 = vld [vmem:[#allocation187_spill] sm:$0xff] }
 0x65c   :  { %v4218_v63 = vpop.f32.mrb[2].mxu0 }
 0x65d   :  { %v5686_v38 = vadd.f32 %v5685_v34, %v4218_v63  ;;  %v4220_v39 = vpop.f32.mrb[3].mxu0 }
 0x65e   :  { %v5688_v10 = vadd.f32 %v5687_v36, %v4220_v39 }
 0x65f   :  { %v4223_v41 = vsub.f32 0.0, %v5686_v38 }
 0x660   :  { %v4224_v19 = vsub.f32 0.0, %v5688_v10 }
 0x661   :  { %v4225_v33 = vmul.f32 1.442695, %v4223_v41 }
 0x662   :  { %v4227_v60 = vmul.f32 1.442695, %v4224_v19 }
 0x663   :  { %5741 = vpow2.f32 %v4225_v33 }
 0x664   :  { %5743 = vpow2.f32 %v4227_v60 }
 0x66d   :  { %v5742_v5 = vpop.eup %5741 }
 0x66e   :  { %v5744_v59 = vpop.eup %5743  ;;  %v4229_v20 = vadd.f32 1.0, %v5742_v5 }
 0x66f   :  { %v4230_v25 = vadd.f32 1.0, %v5744_v59 }
 0x670   :  { %5745 = vrcp.f32 %v4229_v20 }
 0x671   :  { %5747 = vrcp.f32 %v4230_v25 }
 0x67a   :  { %v5746_v9 = vpop.eup %5745 }
 0x67b   :  { %v5748_v23 = vpop.eup %5747 }
 0x67c   :  { %v4237_v13 = vcombine.low %v5746_v9, %v5748_v23 }
 0x67e   :  { %v4244_v56 = vrot.slane %v4237_v13, %v4243_v49 }
 0x680   :  { %v4245_v14 = vcombine.high %v4244_v56, %v4244_v56  ;;  %v4252_v42 = vrot.slane %v4244_v56, %v4243_v49 }
 0x682   :  { %v4259_v27 = vrot.slane %v4245_v14, %v4243_v49  ;;  %v4263_v37 = vrot.slane %v4252_v42, %v9709_v47  ;;  %v4267_v0 = vrot.slane %v4252_v42, %v9710_v35 }
 0x684   :  { %v4271_v1 = vrot.slane %v4259_v27, %v9709_v47  ;;  %v4275_v31 = vrot.slane %v4259_v27, %v9710_v35  ;;  %v4280_v50 = vmul.f32 %v4263_v37, %v9711_v30  ;;  %v4281_v6 = vmul.f32 %v4267_v0, %v9712_v4 }
 0x685   :  { %v4282_v24 = vmul.f32 %v4263_v37, %v9713_v18  ;;  %v4283_v32 = vmul.f32 %v4267_v0, %v9714_v62  ;;  %v4284_v54 = vmul.f32 %v4263_v37, %v9715_v40  ;;  %v4285_v61 = vmul.f32 %v4267_v0, %v9716_v12 }
 0x686   :  { %v4286_v44 = vmul.f32 %v4263_v37, %v9717_v26  ;;  %v4287_v2 = vmul.f32 %v4267_v0, %v9718_v58  ;;  %v4288_v11 = vmul.f32 %v4271_v1, %v9719_v8  ;;  %v4289_v3 = vmul.f32 %v4275_v31, %v9720_v55  ;;  %4296 = vst [vmem:[#allocation6] sm:$0xff] %v4280_v50 }
 0x687   :  { %4297 = vst [vmem:[#allocation6 + $0x8] sm:$0xff] %v4281_v6  ;;  %v4290_v45 = vmul.f32 %v4271_v1, %v9721_v57  ;;  %v4291_v52 = vmul.f32 %v4275_v31, %v9722_v17  ;;  %v4292_v22 = vmul.f32 %v4271_v1, %v9723_v21  ;;  %v4293_v43 = vmul.f32 %v4275_v31, %v9724_v51 }
 0x688   :  { %4298 = vst [vmem:[#allocation6 + $0x10] sm:$0xff] %v4282_v24  ;;  %4299 = vst [vmem:[#allocation6 + $0x18] sm:$0xff] %v4283_v32  ;;  %v4294_v48 = vmul.f32 %v4271_v1, %v9725_v7  ;;  %v4295_v28 = vmul.f32 %v4275_v31, %v9726_v46 }
 0x689   :  { %4300 = vst [vmem:[#allocation6 + $0x20] sm:$0xff] %v4284_v54  ;;  %4301 = vst [vmem:[#allocation6 + $0x28] sm:$0xff] %v4285_v61 }
 0x68a   :  { %4302 = vst [vmem:[#allocation6 + $0x30] sm:$0xff] %v4286_v44  ;;  %4303 = vst [vmem:[#allocation6 + $0x38] sm:$0xff] %v4287_v2 }
 0x68b   :  { %4304 = vst [vmem:[#allocation6 + $0x40] sm:$0xff] %v4288_v11  ;;  %4305 = vst [vmem:[#allocation6 + $0x48] sm:$0xff] %v4289_v3 }
 0x68c   :  { %4306 = vst [vmem:[#allocation6 + $0x50] sm:$0xff] %v4290_v45  ;;  %4307 = vst [vmem:[#allocation6 + $0x58] sm:$0xff] %v4291_v52 }
 0x68d   :  { %4308 = vst [vmem:[#allocation6 + $0x60] sm:$0xff] %v4292_v22  ;;  %4309 = vst [vmem:[#allocation6 + $0x68] sm:$0xff] %v4293_v43 }
 0x68e   :  { %4310 = vst [vmem:[#allocation6 + $0x70] sm:$0xff] %v4294_v48  ;;  %4311 = vst [vmem:[#allocation6 + $0x78] sm:$0xff] %v4295_v28 }
 0x68f   :  { %5798 = shalt.err (!%p5795_p12)
}
 0x690   :  { %s5799_s3 = scalar_lea.hbm %s8380_s5, 2048 }
 0x691   :  { %p5800_p13 = scmp.ne.s32.totalorder %s8380_s5, %s5799_s3  ;;  %p5803_p0 = scmp.lt.u32.totalorder %s5799_s3, %s8380_s5 }
 0x693   :  { %p5805_p1 = pnand %p5803_p0, %p5800_p13 }
 0x695   :  { %5808 = shalt.err (!%p5805_p1)
}
 0x696   :  { %4323 = dma.vmem_to_hbm [thread:$0]  %s4318_s11, 2048, %s8380_s5, [#allocation5], %s5814_s28, %s5814_s28, %s5815_s29  }
 0x697   :  { %5811 = dma.done.wait [#allocation5], 2048  }
 0x698   :  { %5812 = vsyncadd [#allocation5], 4294965248 }
 0x699   :  { %4327 = vsyncpa [#allocation4], 1 }
 0x69a   :  { %4328 = vsyncpa [#allocation5], 1 }

</bundles_post_ra>
